<compile_context>
chip_gen: v7x
topology: tpu7x:2x2x1
jax: 0.10.0
libtpu: 0.0.40
codegen_flags: <defaults>
</compile_context>

<pallas_src>
import jax
import jax.numpy as jnp
from jax import lax
from jax.experimental import pallas as pl
from jax.experimental.pallas import tpu as pltpu

EPS = 1e-5
LANE = 128        # channel (lane) padding granularity
SUBLANE = 16      # width (sublane) padding granularity (bf16-friendly)
LEAD = 16         # aligned lead/tail rows around the flattened conv window


def _round_up(x, m):
    return (x + m - 1) // m * m


def _divisors(x):
    ds, i = set(), 1
    while i * i <= x:
        if x % i == 0:
            ds.add(i)
            ds.add(x // i)
        i += 1
    return sorted(ds)


def _vmem_limit_bytes():
    # Per-generation VMEM budget: ~96 MiB on the 128 MiB parts (v5e/v6e),
    # ~48 MiB on v7x's 64 MiB part; conservative fallback if the query fails.
    try:
        cap = int(pltpu.get_tpu_info().vmem_capacity_bytes)
    except Exception:
        cap = 64 * 1024 * 1024
    return max(32 * 1024 * 1024, min(cap * 3 // 4, 100 * 1024 * 1024))


def _pick_row_tile(h, wv, cin_p, cout_p, y_bytes, budget, min_tiles):
    """Largest divisor of h whose per-tile VMEM footprint fits the budget.

    TODO(synk): for H with no good divisors this collapses toward th=1; a ragged
    last tile (masked rows) would avoid that, at the cost of extra masking.
    """
    def est(th):
        m = th * wv
        wa = (th + 2) * wv
        b = 2 * th * wv * cin_p * 2           # main input rows, double-buffered (bf16)
        b += 2 * 2 * wv * cin_p * 2           # two halo rows, double-buffered
        b += (wa + 2 * LEAD) * cin_p * 2      # xa scratch (flattened window)
        b += 2 * wa * cin_p * 2               # xs0 / xs2 shifted scratch
        b += 2 * m * cout_p * y_bytes         # conv output block, double-buffered
        b += 2 * m * cout_p * 4               # f32 accumulator + matmul temporaries
        b += 2 * 9 * cin_p * cout_p * 2       # resident 3x3 weights
        return b

    fits = [d for d in _divisors(h) if est(d) <= budget] or [1]
    pref = [d for d in fits if h // d >= min_tiles]   # keep >=2 grid steps (v7x 2 TCs)
    return max(pref if pref else fits)


# -----------------------------------------------------------------------------
# Fused pass: prev-layer BN+ReLU on load -> 3x3 conv (9 shifted MXU matmuls)
# -> bf16/f32 conv output + per-tile BatchNorm partial statistics.
# -----------------------------------------------------------------------------
def _make_conv_stats_kernel(th, wv, w_real, cin_p, cout_p, fuse_prev_act):
    mrows = th * wv
    wa = (th + 2) * wv

    def kernel(xu_ref, xm_ref, xd_ref, scale_ref, shift_ref, w_ref,
               y_ref, stats_ref, xa_ref, xs0_ref, xs2_ref):
        t = pl.program_id(1)
        num_t = pl.num_programs(1)

        def prep(v, valid):
            # previous layer's folded BN + ReLU, fused into the load
            if fuse_prev_act:
                x = jnp.maximum(
                    v.astype(jnp.float32) * scale_ref[...] + shift_ref[...], 0.0)
            else:
                x = v
            # zero the width-alignment padding columns (post-BN they are nonzero)
            if wv > w_real:
                c = lax.broadcasted_iota(jnp.int32, x.shape, 1)
                x = jnp.where(c < w_real, x, jnp.zeros_like(x))
            # zero the conv halo row when it falls outside the image
            if valid is not None:
                x = jnp.where(valid, x, jnp.zeros_like(x))
            return x.astype(jnp.bfloat16)

        # ---- stage the activated (th+2)-row window, flattened to (wa, cin_p) ---
        xa_ref[pl.ds(0, LEAD), :] = jnp.zeros((LEAD, cin_p), jnp.bfloat16)
        xa_ref[pl.ds(LEAD, wv), :] = prep(xu_ref[...], t > 0).reshape(wv, cin_p)
        xa_ref[pl.ds(LEAD + wv, mrows), :] = prep(
            xm_ref[...], None).reshape(mrows, cin_p)
        xa_ref[pl.ds(LEAD + (th + 1) * wv, wv), :] = prep(
            xd_ref[...], t < num_t - 1).reshape(wv, cin_p)
        xa_ref[pl.ds(LEAD + wa, LEAD), :] = jnp.zeros((LEAD, cin_p), jnp.bfloat16)

        # ---- column-shifted copies for the dx=0 / dx=2 taps (aligned stores) ---
        fcol = lax.broadcasted_iota(jnp.int32, (wa, 1), 0) % wv
        s0 = xa_ref[pl.ds(LEAD - 1, wa), :]            # window col c-1
        xs0_ref[...] = jnp.where(fcol == 0, jnp.zeros_like(s0), s0)
        s2 = xa_ref[pl.ds(LEAD + 1, wa), :]            # window col c+1
        xs2_ref[...] = jnp.where(fcol == wv - 1, jnp.zeros_like(s2), s2)

        # ---- 9 shifted MXU matmuls, f32 accumulation ----------------------------
        # TODO(synk): K-pack the 3 dy taps (K = 3*cin_p) to better fill the
        # 256-deep MXU on v6e/v7x once layers become compute-bound.
        acc = None
        for dy in range(3):
            for dx in range(3):
                if dx == 1:
                    lhs = xa_ref[pl.ds(LEAD + dy * wv, mrows), :]
                elif dx == 0:
                    lhs = xs0_ref[pl.ds(dy * wv, mrows), :]
                else:
                    lhs = xs2_ref[pl.ds(dy * wv, mrows), :]
                part = jnp.dot(lhs, w_ref[3 * dy + dx],
                               preferred_element_type=jnp.float32)
                acc = part if acc is None else acc + part

        # bf16 conv output for non-final layers (f32 only for the last layer)
        y_ref[...] = acc.reshape(th, wv, cout_p).astype(y_ref.dtype)

        # ---- per-tile BatchNorm partial statistics (exclude padded columns) ----
        if wv > w_real:
            c = lax.broadcasted_iota(jnp.int32, (mrows, 1), 0) % wv
            acc = jnp.where(c < w_real, acc, jnp.zeros_like(acc))
        stats_ref[pl.ds(0, 1), :] = jnp.sum(acc, axis=0, keepdims=True)
        stats_ref[pl.ds(1, 1), :] = jnp.sum(acc * acc, axis=0, keepdims=True)

    return kernel


def _conv_and_stats(x, w9, scale_prev, shift_prev, *, th, w_real,
                    fuse_prev_act, y_dtype, vmem_limit):
    n, h, wv, cin_p = x.shape
    cout_p = w9.shape[-1]
    num_t = h // th
    wa = (th + 2) * wv
    kernel = _make_conv_stats_kernel(th, wv, w_real, cin_p, cout_p, fuse_prev_act)

    return pl.pallas_call(
        kernel,
        grid=(n, num_t),
        in_specs=[
            # 1 halo row above the tile (row index clamped; masked at t == 0)
            pl.BlockSpec((None, 1, wv, cin_p),
                         lambda i, t: (i, jnp.maximum(t * th - 1, 0), 0, 0)),
            # main th rows of image i
            pl.BlockSpec((None, th, wv, cin_p), lambda i, t: (i, t, 0, 0)),
            # 1 halo row below (clamped; masked at the last tile)
            pl.BlockSpec((None, 1, wv, cin_p),
                         lambda i, t: (i, jnp.minimum(t * th + th, h - 1), 0, 0)),
            # previous layer's folded BN scale / shift (resident)
            pl.BlockSpec((1, cin_p), lambda i, t: (0, 0)),
            pl.BlockSpec((1, cin_p), lambda i, t: (0, 0)),
            # 3x3 weights (9, cin_p, cout_p), resident (constant index map)
            pl.BlockSpec((9, cin_p, cout_p), lambda i, t: (0, 0, 0)),
        ],
        out_specs=(
            pl.BlockSpec((None, th, wv, cout_p), lambda i, t: (i, t, 0, 0)),
            pl.BlockSpec((None, 2, cout_p), lambda i, t: (i * num_t + t, 0, 0)),
        ),
        out_shape=(
            jax.ShapeDtypeStruct((n, h, wv, cout_p), y_dtype),           # raw conv out
            jax.ShapeDtypeStruct((n * num_t, 2, cout_p), jnp.float32),   # partial stats
        ),
        scratch_shapes=[
            pltpu.VMEM((wa + 2 * LEAD, cin_p), jnp.bfloat16),   # xa (flattened window)
            pltpu.VMEM((wa, cin_p), jnp.bfloat16),              # xs0 (dx = 0 shift)
            pltpu.VMEM((wa, cin_p), jnp.bfloat16),              # xs2 (dx = 2 shift)
        ],
        compiler_params=pltpu.CompilerParams(
            dimension_semantics=("parallel", "parallel"),
            vmem_limit_bytes=vmem_limit,
        ),
    )(x, x, x, scale_prev, shift_prev, w9)


# -----------------------------------------------------------------------------
# Final-layer BatchNorm apply (folded scale/shift) + ReLU, lane-dense, M-tiled.
# -----------------------------------------------------------------------------
def _bn_relu_kernel(y_ref, scale_ref, shift_ref, o_ref):
    y = y_ref[...].astype(jnp.float32)
    o_ref[...] = jnp.maximum(y * scale_ref[...] + shift_ref[...], 0.0).astype(o_ref.dtype)


def _bn_relu_apply(y2d, scale, shift, out_dtype, vmem_limit):
    mv, cout_p = y2d.shape
    per_row = cout_p * (jnp.dtype(y2d.dtype).itemsize
                        + jnp.dtype(out_dtype).itemsize) * 2   # double-buffered in+out
    budget = vmem_limit // 4
    fits = [d for d in _divisors(mv)
            if (d % 8 == 0 or d == mv) and d * per_row <= budget]
    fits = fits or ([8] if mv % 8 == 0 else [mv])
    pref = [d for d in fits if mv // d >= 2]                    # keep both TCs busy
    rows = max(pref if pref else fits)

    return pl.pallas_call(
        _bn_relu_kernel,
        grid=(mv // rows,),
        in_specs=[
            pl.BlockSpec((rows, cout_p), lambda i: (i, 0)),
            pl.BlockSpec((1, cout_p), lambda i: (0, 0)),
            pl.BlockSpec((1, cout_p), lambda i: (0, 0)),
        ],
        out_specs=pl.BlockSpec((rows, cout_p), lambda i: (i, 0)),
        out_shape=jax.ShapeDtypeStruct((mv, cout_p), out_dtype),
        compiler_params=pltpu.CompilerParams(
            dimension_semantics=("parallel",),
            vmem_limit_bytes=vmem_limit,
        ),
    )(y2d, scale, shift)


# -----------------------------------------------------------------------------
# Glue: fold BatchNorm statistics + gamma/beta into per-channel scale / shift.
# -----------------------------------------------------------------------------
def _fold_bn(stats, gamma, beta, count, cout, cout_p):
    ssum = jnp.sum(stats, axis=0)                               # (2, cout_p)
    mean = ssum[0] / count
    var = jnp.maximum(ssum[1] / count - mean * mean, 0.0)       # biased batch variance
    inv = lax.rsqrt(var + EPS)
    gamma_p = jnp.pad(gamma.astype(jnp.float32), (0, cout_p - cout))
    beta_p = jnp.pad(beta.astype(jnp.float32), (0, cout_p - cout))
    scale = (gamma_p * inv).reshape(1, cout_p)
    shift = (beta_p - mean * gamma_p * inv).reshape(1, cout_p)
    return scale, shift


def _prep_weights(w, cin_p, cout_p, mxu_dtype=jnp.bfloat16):
    cout, cin = w.shape[0], w.shape[1]
    wt = jnp.transpose(w, (2, 3, 1, 0)).astype(jnp.float32)     # (3, 3, cin, cout)
    wt = jnp.pad(wt, ((0, 0), (0, 0), (0, cin_p - cin), (0, cout_p - cout)))
    return wt.reshape(9, cin_p, cout_p).astype(mxu_dtype)


def conv_block_forward(x_nchw, params):
    """ConvBlock.forward (train-mode BN). x_nchw: (N, Cin, H, W), PyTorch layout."""
    n, cin, h, w_real = x_nchw.shape
    cin_p = _round_up(cin, LANE)
    wv = _round_up(w_real, SUBLANE)
    vmem_limit = _vmem_limit_bytes()
    budget = vmem_limit // 2
    min_tiles = 2 if n == 1 else 1

    # One-time layout change of the network input: NCHW -> NHWC, channels padded
    # to a lane multiple, width to a sublane multiple, cast to the MXU dtype.
    x = jnp.transpose(x_nchw, (0, 2, 3, 1)).astype(jnp.float32)
    x = jnp.pad(x, ((0, 0), (0, 0), (0, wv - w_real), (0, cin_p - cin)))
    x = x.astype(jnp.bfloat16)

    scale = jnp.ones((1, cin_p), jnp.float32)     # identity "previous BN" for layer 0
    shift = jnp.zeros((1, cin_p), jnp.float32)
    fuse = False
    count = jnp.float32(n * h * w_real)
    n_layers = len(params)

    for li, (w, _b, gamma, beta) in enumerate(params):
        # NOTE: the Conv2d bias is intentionally dropped -- it cancels exactly in
        # (x - mean) under train-mode BatchNorm.
        last = li == n_layers - 1
        cout = w.shape[0]
        cur_cin_p = x.shape[-1]
        cout_p = _round_up(cout, LANE)
        w9 = _prep_weights(w, cur_cin_p, cout_p)
        y_dtype = jnp.float32 if last else jnp.bfloat16
        th = _pick_row_tile(h, wv, cur_cin_p, cout_p,
                            jnp.dtype(y_dtype).itemsize, budget, min_tiles)
        y, stats = _conv_and_stats(
            x, w9, scale, shift, th=th, w_real=w_real,
            fuse_prev_act=fuse, y_dtype=y_dtype, vmem_limit=vmem_limit)
        scale, shift = _fold_bn(stats, gamma, beta, count, cout, cout_p)
        x, fuse = y, True

    # Only the final layer needs a standalone BN-apply + ReLU pass.
    cout = params[-1][0].shape[0]
    cout_p = x.shape[-1]
    out2d = _bn_relu_apply(x.reshape(n * h * wv, cout_p), scale, shift,
                           jnp.float32, vmem_limit)
    out = out2d.reshape(n, h, wv, cout_p)[:, :, :w_real, :cout]
    return jnp.transpose(out, (0, 3, 1, 2))


# -----------------------------------------------------------------------------
# Parameter init (PyTorch-default shapes/bounds) and a pure-JAX f32 reference.
# -----------------------------------------------------------------------------
def init_conv_block_params(key, in_channels, out_channels, conv_num):
    params = []
    cin = in_channels
    for _ in range(conv_num):
        key, kw, kb = jax.random.split(key, 3)
        fan_in = cin * 9
        bound = 1.0 / float(fan_in) ** 0.5
        w = jax.random.uniform(kw, (out_channels, cin, 3, 3), jnp.float32, -bound, bound)
        b = jax.random.uniform(kb, (out_channels,), jnp.float32, -bound, bound)
        gamma = jnp.ones((out_channels,), jnp.float32)
        beta = jnp.zeros((out_channels,), jnp.float32)
        params.append((w, b, gamma, beta))
        cin = out_channels
    return params


def reference_forward(x_nchw, params):
    x = x_nchw.astype(jnp.float32)
    for (w, b, gamma, beta) in params:
        y = lax.conv_general_dilated(
            x, w, window_strides=(1, 1), padding=((1, 1), (1, 1)),
            dimension_numbers=("NCHW", "OIHW", "NCHW"),
            precision=lax.Precision.HIGHEST)
        y = y + b[None, :, None, None]
        mean = jnp.mean(y, axis=(0, 2, 3), keepdims=True)
        var = jnp.mean(jnp.square(y - mean), axis=(0, 2, 3), keepdims=True)
        y = (y - mean) * lax.rsqrt(var + EPS)
        y = y * gamma[None, :, None, None] + beta[None, :, None, None]
        x = jnp.maximum(y, 0.0)
    return x


if __name__ == "__main__":
    # ConvBlock(inChannels=4, outChannels=8, convNum=2) on a (2, 4, 16, 16) input.
    N, Cin, H, W = 2, 4, 16, 16
    Cout, conv_num = 8, 2

    key = jax.random.PRNGKey(0)
    kx, kp = jax.random.split(key)
    x = jax.random.normal(kx, (N, Cin, H, W), jnp.float32)
    params = init_conv_block_params(kp, Cin, Cout, conv_num)

    fwd = jax.jit(conv_block_forward)
    out = jax.block_until_ready(fwd(x, params))
    ref = jax.block_until_ready(reference_forward(x, params))

    assert out.shape == (N, Cout, H, W), out.shape
    max_err = float(jnp.max(jnp.abs(out - ref)))
    # bf16 MXU operands and bf16 inter-layer activations vs a float32 reference.
    assert max_err < 5e-2, f"max abs error vs reference: {max_err}"
    print("KERNEL_OK")
</pallas_src>

<mosaic_0001>
module attributes {stable_mosaic.version = 11 : i64} {
  func.func @kernel(%arg0: i32, %arg1: i32, %arg2: memref<1x1x16x128xbf16, #tpu.memory_space<vmem>>, %arg3: memref<1x16x16x128xbf16, #tpu.memory_space<vmem>>, %arg4: memref<1x1x16x128xbf16, #tpu.memory_space<vmem>>, %arg5: memref<1x128xf32, #tpu.memory_space<vmem>>, %arg6: memref<1x128xf32, #tpu.memory_space<vmem>>, %arg7: memref<9x128x128xbf16, #tpu.memory_space<vmem>>, %arg8: memref<1x16x16x128xbf16, #tpu.memory_space<vmem>>, %arg9: memref<1x2x128xf32, #tpu.memory_space<vmem>>, %arg10: memref<320x128xbf16, #tpu.memory_space<vmem>>, %arg11: memref<288x128xbf16, #tpu.memory_space<vmem>>, %arg12: memref<288x128xbf16, #tpu.memory_space<vmem>>) attributes {dimension_semantics = [#tpu.dimension_semantics<parallel>, #tpu.dimension_semantics<parallel>], iteration_bounds = array<i64: 2, 1>, scalar_prefetch = 0 : i64, scratch_operands = 3 : i64, tpu.core_type = #tpu.core_type<tc>, window_params = [{transform_indices = @transform_0, window_bounds = array<i64: 1, 1, 16, 128>}, {transform_indices = @transform_1, window_bounds = array<i64: 1, 16, 16, 128>}, {transform_indices = @transform_2, window_bounds = array<i64: 1, 1, 16, 128>}, {pipeline_mode = #tpu.pipeline_mode<synchronous>, transform_indices = @transform_3, window_bounds = array<i64: 1, 128>}, {pipeline_mode = #tpu.pipeline_mode<synchronous>, transform_indices = @transform_4, window_bounds = array<i64: 1, 128>}, {pipeline_mode = #tpu.pipeline_mode<synchronous>, transform_indices = @transform_5, window_bounds = array<i64: 9, 128, 128>}, {transform_indices = @transform_6, window_bounds = array<i64: 1, 16, 16, 128>}, {transform_indices = @transform_7, window_bounds = array<i64: 1, 2, 128>}]} {
    %cst = arith.constant 0.000000e+00 : bf16
    %0 = vector.broadcast %cst : bf16 to vector<16x128xbf16>
    %c0 = arith.constant 0 : index
    %c0_0 = arith.constant 0 : index
    %1 = vector.load %arg10[%c0, %c0_0] : memref<320x128xbf16, #tpu.memory_space<vmem>>, vector<16x128xbf16>
    tpu.vector_store %arg10[%c0, %c0_0], %0 {strides = array<i32>} : memref<320x128xbf16, #tpu.memory_space<vmem>>, vector<16x128xbf16>,
    %c0_1 = arith.constant 0 : index
    %c0_2 = arith.constant 0 : index
    %c0_3 = arith.constant 0 : index
    %c0_4 = arith.constant 0 : index
    %2 = vector.load %arg2[%c0_1, %c0_2, %c0_3, %c0_4] : memref<1x1x16x128xbf16, #tpu.memory_space<vmem>>, vector<1x1x16x128xbf16>
    %3 = vector.shape_cast %2 : vector<1x1x16x128xbf16> to vector<1x16x128xbf16>
    %c0_i32 = arith.constant 0 : i32
    %4 = arith.cmpi sgt, %arg1, %c0_i32 : i32
    %cst_5 = arith.constant 0.000000e+00 : bf16
    %5 = vector.broadcast %cst_5 : bf16 to vector<1x16x128xbf16>
    %6 = arith.select %4, %3, %5 : vector<1x16x128xbf16>
    %7 = vector.shape_cast %6 : vector<1x16x128xbf16> to vector<16x128xbf16>
    %c16 = arith.constant 16 : index
    %c0_6 = arith.constant 0 : index
    %8 = vector.load %arg10[%c16, %c0_6] : memref<320x128xbf16, #tpu.memory_space<vmem>>, vector<16x128xbf16>
    tpu.vector_store %arg10[%c16, %c0_6], %7 {strides = array<i32>} : memref<320x128xbf16, #tpu.memory_space<vmem>>, vector<16x128xbf16>,
    %c0_7 = arith.constant 0 : index
    %c0_8 = arith.constant 0 : index
    %c0_9 = arith.constant 0 : index
    %c0_10 = arith.constant 0 : index
    %9 = vector.load %arg3[%c0_7, %c0_8, %c0_9, %c0_10] : memref<1x16x16x128xbf16, #tpu.memory_space<vmem>>, vector<1x16x16x128xbf16>
    %10 = vector.shape_cast %9 : vector<1x16x16x128xbf16> to vector<16x16x128xbf16>
    %11 = vector.shape_cast %10 : vector<16x16x128xbf16> to vector<256x128xbf16>
    %c32 = arith.constant 32 : index
    %c0_11 = arith.constant 0 : index
    %12 = vector.load %arg10[%c32, %c0_11] : memref<320x128xbf16, #tpu.memory_space<vmem>>, vector<256x128xbf16>
    tpu.vector_store %arg10[%c32, %c0_11], %11 {strides = array<i32>} : memref<320x128xbf16, #tpu.memory_space<vmem>>, vector<256x128xbf16>,
    %c0_12 = arith.constant 0 : index
    %c0_13 = arith.constant 0 : index
    %c0_14 = arith.constant 0 : index
    %c0_15 = arith.constant 0 : index
    %13 = vector.load %arg4[%c0_12, %c0_13, %c0_14, %c0_15] : memref<1x1x16x128xbf16, #tpu.memory_space<vmem>>, vector<1x1x16x128xbf16>
    %14 = vector.shape_cast %13 : vector<1x1x16x128xbf16> to vector<1x16x128xbf16>
    %c0_i32_16 = arith.constant 0 : i32
    %15 = arith.cmpi slt, %arg1, %c0_i32_16 : i32
    %cst_17 = arith.constant 0.000000e+00 : bf16
    %16 = vector.broadcast %cst_17 : bf16 to vector<1x16x128xbf16>
    %17 = arith.select %15, %14, %16 : vector<1x16x128xbf16>
    %18 = vector.shape_cast %17 : vector<1x16x128xbf16> to vector<16x128xbf16>
    %c288 = arith.constant 288 : index
    %c0_18 = arith.constant 0 : index
    %19 = vector.load %arg10[%c288, %c0_18] : memref<320x128xbf16, #tpu.memory_space<vmem>>, vector<16x128xbf16>
    tpu.vector_store %arg10[%c288, %c0_18], %18 {strides = array<i32>} : memref<320x128xbf16, #tpu.memory_space<vmem>>, vector<16x128xbf16>,
    %cst_19 = arith.constant 0.000000e+00 : bf16
    %20 = vector.broadcast %cst_19 : bf16 to vector<16x128xbf16>
    %c304 = arith.constant 304 : index
    %c0_20 = arith.constant 0 : index
    %21 = vector.load %arg10[%c304, %c0_20] : memref<320x128xbf16, #tpu.memory_space<vmem>>, vector<16x128xbf16>
    tpu.vector_store %arg10[%c304, %c0_20], %20 {strides = array<i32>} : memref<320x128xbf16, #tpu.memory_space<vmem>>, vector<16x128xbf16>,
    %22 = tpu.iota {dimensions = array<i32: 0>} : vector<288x1xi32>
    %c16_i32 = arith.constant 16 : i32
    %c0_i32_21 = arith.constant 0 : i32
    %23 = arith.cmpi eq, %c16_i32, %c0_i32_21 : i32
    %c1_i32 = arith.constant 1 : i32
    %24 = arith.select %23, %c1_i32, %c16_i32 : i32
    %25 = vector.broadcast %24 : i32 to vector<288x1xi32>
    %26 = arith.remsi %22, %25 : vector<288x1xi32>
    %c0_i32_22 = arith.constant 0 : i32
    %27 = vector.broadcast %c0_i32_22 : i32 to vector<288x1xi32>
    %28 = arith.cmpi ne, %26, %27 : vector<288x1xi32>
    %c0_i32_23 = arith.constant 0 : i32
    %29 = vector.broadcast %c0_i32_23 : i32 to vector<288x1xi32>
    %30 = arith.cmpi slt, %26, %29 : vector<288x1xi32>
    %c0_i32_24 = arith.constant 0 : i32
    %31 = arith.cmpi slt, %24, %c0_i32_24 : i32
    %32 = vector.broadcast %31 : i1 to vector<288x1xi1>
    %33 = vector.broadcast %32 : vector<288x1xi1> to vector<288x1xi1>
    %34 = arith.xori %30, %33 : vector<288x1xi1>
    %35 = arith.andi %34, %28 : vector<288x1xi1>
    %36 = vector.broadcast %24 : i32 to vector<288x1xi32>
    %37 = arith.addi %26, %36 : vector<288x1xi32>
    %38 = arith.select %35, %37, %26 : vector<288x1xi1>, vector<288x1xi32>
    %c15 = arith.constant 15 : index
    %c0_25 = arith.constant 0 : index
    %39 = vector.load %arg10[%c15, %c0_25] : memref<320x128xbf16, #tpu.memory_space<vmem>>, vector<288x128xbf16>
    %c0_i32_26 = arith.constant 0 : i32
    %40 = vector.broadcast %c0_i32_26 : i32 to vector<288x1xi32>
    %41 = arith.cmpi eq, %38, %40 : vector<288x1xi32>
    %cst_27 = arith.constant 0.000000e+00 : bf16
    %42 = vector.broadcast %cst_27 : bf16 to vector<288x128xbf16>
    %43 = vector.shape_cast %41 : vector<288x1xi1> to vector<288x1xi1>
    %44 = vector.broadcast %43 : vector<288x1xi1> to vector<288x128xi1>
    %45 = arith.select %44, %42, %39 : vector<288x128xi1>, vector<288x128xbf16>
    %c0_28 = arith.constant 0 : index
    %c0_29 = arith.constant 0 : index
    %46 = vector.load %arg11[%c0_28, %c0_29] : memref<288x128xbf16, #tpu.memory_space<vmem>>, vector<288x128xbf16>
    tpu.vector_store %arg11[%c0_28, %c0_29], %45 {strides = array<i32>} : memref<288x128xbf16, #tpu.memory_space<vmem>>, vector<288x128xbf16>,
    %c17 = arith.constant 17 : index
    %c0_30 = arith.constant 0 : index
    %47 = vector.load %arg10[%c17, %c0_30] : memref<320x128xbf16, #tpu.memory_space<vmem>>, vector<288x128xbf16>
    %c15_i32 = arith.constant 15 : i32
    %48 = vector.broadcast %c15_i32 : i32 to vector<288x1xi32>
    %49 = arith.cmpi eq, %38, %48 : vector<288x1xi32>
    %cst_31 = arith.constant 0.000000e+00 : bf16
    %50 = vector.broadcast %cst_31 : bf16 to vector<288x128xbf16>
    %51 = vector.shape_cast %49 : vector<288x1xi1> to vector<288x1xi1>
    %52 = vector.broadcast %51 : vector<288x1xi1> to vector<288x128xi1>
    %53 = arith.select %52, %50, %47 : vector<288x128xi1>, vector<288x128xbf16>
    %c0_32 = arith.constant 0 : index
    %c0_33 = arith.constant 0 : index
    %54 = vector.load %arg12[%c0_32, %c0_33] : memref<288x128xbf16, #tpu.memory_space<vmem>>, vector<288x128xbf16>
    tpu.vector_store %arg12[%c0_32, %c0_33], %53 {strides = array<i32>} : memref<288x128xbf16, #tpu.memory_space<vmem>>, vector<288x128xbf16>,
    %c0_34 = arith.constant 0 : index
    %c0_35 = arith.constant 0 : index
    %55 = vector.load %arg11[%c0_34, %c0_35] : memref<288x128xbf16, #tpu.memory_space<vmem>>, vector<256x128xbf16>
    %c0_36 = arith.constant 0 : index
    %c0_37 = arith.constant 0 : index
    %c0_38 = arith.constant 0 : index
    %56 = vector.load %arg7[%c0_36, %c0_37, %c0_38] : memref<9x128x128xbf16, #tpu.memory_space<vmem>>, vector<1x128x128xbf16>
    %57 = vector.shape_cast %56 : vector<1x128x128xbf16> to vector<128x128xbf16>
    %cst_39 = arith.constant dense<0.000000e+00> : vector<256x128xf32>
    %58 = tpu.matmul %55, %57, %cst_39 {dimension_numbers = #tpu.dot_dimension_numbers<[1], [0], [0], [1], [0, 0, 1, 1], [], []>} : vector<256x128xbf16>, vector<128x128xbf16>, vector<256x128xf32> -> vector<256x128xf32>
    %c16_40 = arith.constant 16 : index
    %c0_41 = arith.constant 0 : index
    %59 = vector.load %arg10[%c16_40, %c0_41] : memref<320x128xbf16, #tpu.memory_space<vmem>>, vector<256x128xbf16>
    %c1 = arith.constant 1 : index
    %c0_42 = arith.constant 0 : index
    %c0_43 = arith.constant 0 : index
    %60 = vector.load %arg7[%c1, %c0_42, %c0_43] : memref<9x128x128xbf16, #tpu.memory_space<vmem>>, vector<1x128x128xbf16>
    %61 = vector.shape_cast %60 : vector<1x128x128xbf16> to vector<128x128xbf16>
    %cst_44 = arith.constant dense<0.000000e+00> : vector<256x128xf32>
    %62 = tpu.matmul %59, %61, %cst_44 {dimension_numbers = #tpu.dot_dimension_numbers<[1], [0], [0], [1], [0, 0, 1, 1], [], []>} : vector<256x128xbf16>, vector<128x128xbf16>, vector<256x128xf32> -> vector<256x128xf32>
    %63 = arith.addf %58, %62 : vector<256x128xf32>
    %c0_45 = arith.constant 0 : index
    %c0_46 = arith.constant 0 : index
    %64 = vector.load %arg12[%c0_45, %c0_46] : memref<288x128xbf16, #tpu.memory_space<vmem>>, vector<256x128xbf16>
    %c2 = arith.constant 2 : index
    %c0_47 = arith.constant 0 : index
    %c0_48 = arith.constant 0 : index
    %65 = vector.load %arg7[%c2, %c0_47, %c0_48] : memref<9x128x128xbf16, #tpu.memory_space<vmem>>, vector<1x128x128xbf16>
    %66 = vector.shape_cast %65 : vector<1x128x128xbf16> to vector<128x128xbf16>
    %cst_49 = arith.constant dense<0.000000e+00> : vector<256x128xf32>
    %67 = tpu.matmul %64, %66, %cst_49 {dimension_numbers = #tpu.dot_dimension_numbers<[1], [0], [0], [1], [0, 0, 1, 1], [], []>} : vector<256x128xbf16>, vector<128x128xbf16>, vector<256x128xf32> -> vector<256x128xf32>
    %68 = arith.addf %63, %67 : vector<256x128xf32>
    %c16_50 = arith.constant 16 : index
    %c0_51 = arith.constant 0 : index
    %69 = vector.load %arg11[%c16_50, %c0_51] : memref<288x128xbf16, #tpu.memory_space<vmem>>, vector<256x128xbf16>
    %c3 = arith.constant 3 : index
    %c0_52 = arith.constant 0 : index
    %c0_53 = arith.constant 0 : index
    %70 = vector.load %arg7[%c3, %c0_52, %c0_53] : memref<9x128x128xbf16, #tpu.memory_space<vmem>>, vector<1x128x128xbf16>
    %71 = vector.shape_cast %70 : vector<1x128x128xbf16> to vector<128x128xbf16>
    %cst_54 = arith.constant dense<0.000000e+00> : vector<256x128xf32>
    %72 = tpu.matmul %69, %71, %cst_54 {dimension_numbers = #tpu.dot_dimension_numbers<[1], [0], [0], [1], [0, 0, 1, 1], [], []>} : vector<256x128xbf16>, vector<128x128xbf16>, vector<256x128xf32> -> vector<256x128xf32>
    %73 = arith.addf %68, %72 : vector<256x128xf32>
    %c32_55 = arith.constant 32 : index
    %c0_56 = arith.constant 0 : index
    %74 = vector.load %arg10[%c32_55, %c0_56] : memref<320x128xbf16, #tpu.memory_space<vmem>>, vector<256x128xbf16>
    %c4 = arith.constant 4 : index
    %c0_57 = arith.constant 0 : index
    %c0_58 = arith.constant 0 : index
    %75 = vector.load %arg7[%c4, %c0_57, %c0_58] : memref<9x128x128xbf16, #tpu.memory_space<vmem>>, vector<1x128x128xbf16>
    %76 = vector.shape_cast %75 : vector<1x128x128xbf16> to vector<128x128xbf16>
    %cst_59 = arith.constant dense<0.000000e+00> : vector<256x128xf32>
    %77 = tpu.matmul %74, %76, %cst_59 {dimension_numbers = #tpu.dot_dimension_numbers<[1], [0], [0], [1], [0, 0, 1, 1], [], []>} : vector<256x128xbf16>, vector<128x128xbf16>, vector<256x128xf32> -> vector<256x128xf32>
    %78 = arith.addf %73, %77 : vector<256x128xf32>
    %c16_60 = arith.constant 16 : index
    %c0_61 = arith.constant 0 : index
    %79 = vector.load %arg12[%c16_60, %c0_61] : memref<288x128xbf16, #tpu.memory_space<vmem>>, vector<256x128xbf16>
    %c5 = arith.constant 5 : index
    %c0_62 = arith.constant 0 : index
    %c0_63 = arith.constant 0 : index
    %80 = vector.load %arg7[%c5, %c0_62, %c0_63] : memref<9x128x128xbf16, #tpu.memory_space<vmem>>, vector<1x128x128xbf16>
    %81 = vector.shape_cast %80 : vector<1x128x128xbf16> to vector<128x128xbf16>
    %cst_64 = arith.constant dense<0.000000e+00> : vector<256x128xf32>
    %82 = tpu.matmul %79, %81, %cst_64 {dimension_numbers = #tpu.dot_dimension_numbers<[1], [0], [0], [1], [0, 0, 1, 1], [], []>} : vector<256x128xbf16>, vector<128x128xbf16>, vector<256x128xf32> -> vector<256x128xf32>
    %83 = arith.addf %78, %82 : vector<256x128xf32>
    %c32_65 = arith.constant 32 : index
    %c0_66 = arith.constant 0 : index
    %84 = vector.load %arg11[%c32_65, %c0_66] : memref<288x128xbf16, #tpu.memory_space<vmem>>, vector<256x128xbf16>
    %c6 = arith.constant 6 : index
    %c0_67 = arith.constant 0 : index
    %c0_68 = arith.constant 0 : index
    %85 = vector.load %arg7[%c6, %c0_67, %c0_68] : memref<9x128x128xbf16, #tpu.memory_space<vmem>>, vector<1x128x128xbf16>
    %86 = vector.shape_cast %85 : vector<1x128x128xbf16> to vector<128x128xbf16>
    %cst_69 = arith.constant dense<0.000000e+00> : vector<256x128xf32>
    %87 = tpu.matmul %84, %86, %cst_69 {dimension_numbers = #tpu.dot_dimension_numbers<[1], [0], [0], [1], [0, 0, 1, 1], [], []>} : vector<256x128xbf16>, vector<128x128xbf16>, vector<256x128xf32> -> vector<256x128xf32>
    %88 = arith.addf %83, %87 : vector<256x128xf32>
    %c48 = arith.constant 48 : index
    %c0_70 = arith.constant 0 : index
    %89 = vector.load %arg10[%c48, %c0_70] : memref<320x128xbf16, #tpu.memory_space<vmem>>, vector<256x128xbf16>
    %c7 = arith.constant 7 : index
    %c0_71 = arith.constant 0 : index
    %c0_72 = arith.constant 0 : index
    %90 = vector.load %arg7[%c7, %c0_71, %c0_72] : memref<9x128x128xbf16, #tpu.memory_space<vmem>>, vector<1x128x128xbf16>
    %91 = vector.shape_cast %90 : vector<1x128x128xbf16> to vector<128x128xbf16>
    %cst_73 = arith.constant dense<0.000000e+00> : vector<256x128xf32>
    %92 = tpu.matmul %89, %91, %cst_73 {dimension_numbers = #tpu.dot_dimension_numbers<[1], [0], [0], [1], [0, 0, 1, 1], [], []>} : vector<256x128xbf16>, vector<128x128xbf16>, vector<256x128xf32> -> vector<256x128xf32>
    %93 = arith.addf %88, %92 : vector<256x128xf32>
    %c32_74 = arith.constant 32 : index
    %c0_75 = arith.constant 0 : index
    %94 = vector.load %arg12[%c32_74, %c0_75] : memref<288x128xbf16, #tpu.memory_space<vmem>>, vector<256x128xbf16>
    %c8 = arith.constant 8 : index
    %c0_76 = arith.constant 0 : index
    %c0_77 = arith.constant 0 : index
    %95 = vector.load %arg7[%c8, %c0_76, %c0_77] : memref<9x128x128xbf16, #tpu.memory_space<vmem>>, vector<1x128x128xbf16>
    %96 = vector.shape_cast %95 : vector<1x128x128xbf16> to vector<128x128xbf16>
    %cst_78 = arith.constant dense<0.000000e+00> : vector<256x128xf32>
    %97 = tpu.matmul %94, %96, %cst_78 {dimension_numbers = #tpu.dot_dimension_numbers<[1], [0], [0], [1], [0, 0, 1, 1], [], []>} : vector<256x128xbf16>, vector<128x128xbf16>, vector<256x128xf32> -> vector<256x128xf32>
    %98 = arith.addf %93, %97 : vector<256x128xf32>
    %99 = vector.shape_cast %98 : vector<256x128xf32> to vector<16x16x128xf32>
    %100 = arith.truncf %99 : vector<16x16x128xf32> to vector<16x16x128xbf16>
    %c0_79 = arith.constant 0 : index
    %c0_80 = arith.constant 0 : index
    %c0_81 = arith.constant 0 : index
    %c0_82 = arith.constant 0 : index
    %101 = vector.load %arg8[%c0_79, %c0_80, %c0_81, %c0_82] : memref<1x16x16x128xbf16, #tpu.memory_space<vmem>>, vector<1x16x16x128xbf16>
    %102 = vector.shape_cast %101 : vector<1x16x16x128xbf16> to vector<16x16x128xbf16>
    %103 = vector.shape_cast %100 : vector<16x16x128xbf16> to vector<1x16x16x128xbf16>
    tpu.vector_store %arg8[%c0_79, %c0_80, %c0_81, %c0_82], %103 {strides = array<i32>} : memref<1x16x16x128xbf16, #tpu.memory_space<vmem>>, vector<1x16x16x128xbf16>,
    %cst_83 = arith.constant dense<0.000000e+00> : vector<128xf32>
    %104 = vector.multi_reduction <add>, %98, %cst_83 [0] : vector<256x128xf32> to vector<128xf32>
    %105 = vector.shape_cast %104 : vector<128xf32> to vector<1x128xf32>
    %c0_84 = arith.constant 0 : index
    %c0_85 = arith.constant 0 : index
    %c0_86 = arith.constant 0 : index
    %106 = vector.load %arg9[%c0_84, %c0_85, %c0_86] : memref<1x2x128xf32, #tpu.memory_space<vmem>>, vector<1x1x128xf32>
    %107 = vector.shape_cast %106 : vector<1x1x128xf32> to vector<1x128xf32>
    %108 = vector.shape_cast %105 : vector<1x128xf32> to vector<1x1x128xf32>
    tpu.vector_store %arg9[%c0_84, %c0_85, %c0_86], %108 {strides = array<i32>} : memref<1x2x128xf32, #tpu.memory_space<vmem>>, vector<1x1x128xf32>,
    %109 = arith.mulf %98, %98 : vector<256x128xf32>
    %cst_87 = arith.constant dense<0.000000e+00> : vector<128xf32>
    %110 = vector.multi_reduction <add>, %109, %cst_87 [0] : vector<256x128xf32> to vector<128xf32>
    %111 = vector.shape_cast %110 : vector<128xf32> to vector<1x128xf32>
    %c0_88 = arith.constant 0 : index
    %c1_89 = arith.constant 1 : index
    %c0_90 = arith.constant 0 : index
    %112 = vector.load %arg9[%c0_88, %c1_89, %c0_90] : memref<1x2x128xf32, #tpu.memory_space<vmem>>, vector<1x1x128xf32>
    %113 = vector.shape_cast %112 : vector<1x1x128xf32> to vector<1x128xf32>
    %114 = vector.shape_cast %111 : vector<1x128xf32> to vector<1x1x128xf32>
    tpu.vector_store %arg9[%c0_88, %c1_89, %c0_90], %114 {strides = array<i32>} : memref<1x2x128xf32, #tpu.memory_space<vmem>>, vector<1x1x128xf32>,
    return
  }
  func.func @transform_0(%arg0: i32, %arg1: i32) -> (i32, i32, i32, i32) {
    %c16_i32 = arith.constant 16 : i32
    %0 = arith.muli %arg1, %c16_i32 : i32
    %c1_i32 = arith.constant 1 : i32
    %1 = arith.subi %0, %c1_i32 : i32
    %c0_i32 = arith.constant 0 : i32
    %2 = arith.maxsi %1, %c0_i32 : i32
    %c0_i32_0 = arith.constant 0 : i32
    %c0_i32_1 = arith.constant 0 : i32
    %c0_i32_2 = arith.constant 0 : i32
    return %arg0, %2, %c0_i32_0, %c0_i32_1 : i32, i32, i32, i32
  }
  func.func @transform_1(%arg0: i32, %arg1: i32) -> (i32, i32, i32, i32) {
    %c0_i32 = arith.constant 0 : i32
    %c0_i32_0 = arith.constant 0 : i32
    %c0_i32_1 = arith.constant 0 : i32
    return %arg0, %arg1, %c0_i32, %c0_i32_0 : i32, i32, i32, i32
  }
  func.func @transform_2(%arg0: i32, %arg1: i32) -> (i32, i32, i32, i32) {
    %c16_i32 = arith.constant 16 : i32
    %0 = arith.muli %arg1, %c16_i32 : i32
    %c16_i32_0 = arith.constant 16 : i32
    %1 = arith.addi %0, %c16_i32_0 : i32
    %c15_i32 = arith.constant 15 : i32
    %2 = arith.minsi %1, %c15_i32 : i32
    %c0_i32 = arith.constant 0 : i32
    %c0_i32_1 = arith.constant 0 : i32
    %c0_i32_2 = arith.constant 0 : i32
    return %arg0, %2, %c0_i32, %c0_i32_1 : i32, i32, i32, i32
  }
  func.func @transform_3(%arg0: i32, %arg1: i32) -> (i32, i32) {
    %c0_i32 = arith.constant 0 : i32
    %c0_i32_0 = arith.constant 0 : i32
    %c0_i32_1 = arith.constant 0 : i32
    return %c0_i32, %c0_i32_0 : i32, i32
  }
  func.func @transform_4(%arg0: i32, %arg1: i32) -> (i32, i32) {
    %c0_i32 = arith.constant 0 : i32
    %c0_i32_0 = arith.constant 0 : i32
    %c0_i32_1 = arith.constant 0 : i32
    return %c0_i32, %c0_i32_0 : i32, i32
  }
  func.func @transform_5(%arg0: i32, %arg1: i32) -> (i32, i32, i32) {
    %c0_i32 = arith.constant 0 : i32
    %c0_i32_0 = arith.constant 0 : i32
    %c0_i32_1 = arith.constant 0 : i32
    %c0_i32_2 = arith.constant 0 : i32
    return %c0_i32, %c0_i32_0, %c0_i32_1 : i32, i32, i32
  }
  func.func @transform_6(%arg0: i32, %arg1: i32) -> (i32, i32, i32, i32) {
    %c0_i32 = arith.constant 0 : i32
    %c0_i32_0 = arith.constant 0 : i32
    %c0_i32_1 = arith.constant 0 : i32
    return %arg0, %arg1, %c0_i32, %c0_i32_0 : i32, i32, i32, i32
  }
  func.func @transform_7(%arg0: i32, %arg1: i32) -> (i32, i32, i32) {
    %c1_i32 = arith.constant 1 : i32
    %0 = arith.muli %arg0, %c1_i32 : i32
    %1 = arith.addi %0, %arg1 : i32
    %c0_i32 = arith.constant 0 : i32
    %c0_i32_0 = arith.constant 0 : i32
    %c0_i32_1 = arith.constant 0 : i32
    return %1, %c0_i32, %c0_i32_0 : i32, i32, i32
  }
}

module attributes {stable_mosaic.version = 11 : i64} {
  func.func @kernel(%arg0: i32, %arg1: i32, %arg2: memref<1x1x16x128xbf16, #tpu.memory_space<vmem>>, %arg3: memref<1x16x16x128xbf16, #tpu.memory_space<vmem>>, %arg4: memref<1x1x16x128xbf16, #tpu.memory_space<vmem>>, %arg5: memref<1x128xf32, #tpu.memory_space<vmem>>, %arg6: memref<1x128xf32, #tpu.memory_space<vmem>>, %arg7: memref<9x128x128xbf16, #tpu.memory_space<vmem>>, %arg8: memref<1x16x16x128xf32, #tpu.memory_space<vmem>>, %arg9: memref<1x2x128xf32, #tpu.memory_space<vmem>>, %arg10: memref<320x128xbf16, #tpu.memory_space<vmem>>, %arg11: memref<288x128xbf16, #tpu.memory_space<vmem>>, %arg12: memref<288x128xbf16, #tpu.memory_space<vmem>>) attributes {dimension_semantics = [#tpu.dimension_semantics<parallel>, #tpu.dimension_semantics<parallel>], iteration_bounds = array<i64: 2, 1>, scalar_prefetch = 0 : i64, scratch_operands = 3 : i64, tpu.core_type = #tpu.core_type<tc>, window_params = [{transform_indices = @transform_0, window_bounds = array<i64: 1, 1, 16, 128>}, {transform_indices = @transform_1, window_bounds = array<i64: 1, 16, 16, 128>}, {transform_indices = @transform_2, window_bounds = array<i64: 1, 1, 16, 128>}, {pipeline_mode = #tpu.pipeline_mode<synchronous>, transform_indices = @transform_3, window_bounds = array<i64: 1, 128>}, {pipeline_mode = #tpu.pipeline_mode<synchronous>, transform_indices = @transform_4, window_bounds = array<i64: 1, 128>}, {pipeline_mode = #tpu.pipeline_mode<synchronous>, transform_indices = @transform_5, window_bounds = array<i64: 9, 128, 128>}, {transform_indices = @transform_6, window_bounds = array<i64: 1, 16, 16, 128>}, {transform_indices = @transform_7, window_bounds = array<i64: 1, 2, 128>}]} {
    %cst = arith.constant 0.000000e+00 : bf16
    %0 = vector.broadcast %cst : bf16 to vector<16x128xbf16>
    %c0 = arith.constant 0 : index
    %c0_0 = arith.constant 0 : index
    %1 = vector.load %arg10[%c0, %c0_0] : memref<320x128xbf16, #tpu.memory_space<vmem>>, vector<16x128xbf16>
    tpu.vector_store %arg10[%c0, %c0_0], %0 {strides = array<i32>} : memref<320x128xbf16, #tpu.memory_space<vmem>>, vector<16x128xbf16>,
    %c0_1 = arith.constant 0 : index
    %c0_2 = arith.constant 0 : index
    %c0_3 = arith.constant 0 : index
    %c0_4 = arith.constant 0 : index
    %2 = vector.load %arg2[%c0_1, %c0_2, %c0_3, %c0_4] : memref<1x1x16x128xbf16, #tpu.memory_space<vmem>>, vector<1x1x16x128xbf16>
    %3 = vector.shape_cast %2 : vector<1x1x16x128xbf16> to vector<1x16x128xbf16>
    %c0_i32 = arith.constant 0 : i32
    %4 = arith.cmpi sgt, %arg1, %c0_i32 : i32
    %5 = arith.extf %3 : vector<1x16x128xbf16> to vector<1x16x128xf32>
    %c0_5 = arith.constant 0 : index
    %c0_6 = arith.constant 0 : index
    %6 = vector.load %arg5[%c0_5, %c0_6] : memref<1x128xf32, #tpu.memory_space<vmem>>, vector<1x128xf32>
    %7 = vector.shape_cast %6 : vector<1x128xf32> to vector<1x1x128xf32>
    %8 = vector.broadcast %7 : vector<1x1x128xf32> to vector<1x16x128xf32>
    %9 = arith.mulf %5, %8 : vector<1x16x128xf32>
    %c0_7 = arith.constant 0 : index
    %c0_8 = arith.constant 0 : index
    %10 = vector.load %arg6[%c0_7, %c0_8] : memref<1x128xf32, #tpu.memory_space<vmem>>, vector<1x128xf32>
    %11 = vector.shape_cast %10 : vector<1x128xf32> to vector<1x1x128xf32>
    %12 = vector.broadcast %11 : vector<1x1x128xf32> to vector<1x16x128xf32>
    %13 = arith.addf %9, %12 : vector<1x16x128xf32>
    %cst_9 = arith.constant 0.000000e+00 : f32
    %14 = vector.broadcast %cst_9 : f32 to vector<1x16x128xf32>
    %15 = arith.maximumf %13, %14 : vector<1x16x128xf32>
    %cst_10 = arith.constant 0.000000e+00 : f32
    %16 = vector.broadcast %cst_10 : f32 to vector<1x16x128xf32>
    %17 = arith.select %4, %15, %16 : vector<1x16x128xf32>
    %18 = arith.truncf %17 : vector<1x16x128xf32> to vector<1x16x128xbf16>
    %19 = vector.shape_cast %18 : vector<1x16x128xbf16> to vector<16x128xbf16>
    %c16 = arith.constant 16 : index
    %c0_11 = arith.constant 0 : index
    %20 = vector.load %arg10[%c16, %c0_11] : memref<320x128xbf16, #tpu.memory_space<vmem>>, vector<16x128xbf16>
    tpu.vector_store %arg10[%c16, %c0_11], %19 {strides = array<i32>} : memref<320x128xbf16, #tpu.memory_space<vmem>>, vector<16x128xbf16>,
    %c0_12 = arith.constant 0 : index
    %c0_13 = arith.constant 0 : index
    %c0_14 = arith.constant 0 : index
    %c0_15 = arith.constant 0 : index
    %21 = vector.load %arg3[%c0_12, %c0_13, %c0_14, %c0_15] : memref<1x16x16x128xbf16, #tpu.memory_space<vmem>>, vector<1x16x16x128xbf16>
    %22 = vector.shape_cast %21 : vector<1x16x16x128xbf16> to vector<16x16x128xbf16>
    %23 = arith.extf %22 : vector<16x16x128xbf16> to vector<16x16x128xf32>
    %c0_16 = arith.constant 0 : index
    %c0_17 = arith.constant 0 : index
    %24 = vector.load %arg5[%c0_16, %c0_17] : memref<1x128xf32, #tpu.memory_space<vmem>>, vector<1x128xf32>
    %25 = vector.shape_cast %24 : vector<1x128xf32> to vector<1x1x128xf32>
    %26 = vector.broadcast %25 : vector<1x1x128xf32> to vector<16x16x128xf32>
    %27 = arith.mulf %23, %26 : vector<16x16x128xf32>
    %c0_18 = arith.constant 0 : index
    %c0_19 = arith.constant 0 : index
    %28 = vector.load %arg6[%c0_18, %c0_19] : memref<1x128xf32, #tpu.memory_space<vmem>>, vector<1x128xf32>
    %29 = vector.shape_cast %28 : vector<1x128xf32> to vector<1x1x128xf32>
    %30 = vector.broadcast %29 : vector<1x1x128xf32> to vector<16x16x128xf32>
    %31 = arith.addf %27, %30 : vector<16x16x128xf32>
    %cst_20 = arith.constant 0.000000e+00 : f32
    %32 = vector.broadcast %cst_20 : f32 to vector<16x16x128xf32>
    %33 = arith.maximumf %31, %32 : vector<16x16x128xf32>
    %34 = arith.truncf %33 : vector<16x16x128xf32> to vector<16x16x128xbf16>
    %35 = vector.shape_cast %34 : vector<16x16x128xbf16> to vector<256x128xbf16>
    %c32 = arith.constant 32 : index
    %c0_21 = arith.constant 0 : index
    %36 = vector.load %arg10[%c32, %c0_21] : memref<320x128xbf16, #tpu.memory_space<vmem>>, vector<256x128xbf16>
    tpu.vector_store %arg10[%c32, %c0_21], %35 {strides = array<i32>} : memref<320x128xbf16, #tpu.memory_space<vmem>>, vector<256x128xbf16>,
    %c0_22 = arith.constant 0 : index
    %c0_23 = arith.constant 0 : index
    %c0_24 = arith.constant 0 : index
    %c0_25 = arith.constant 0 : index
    %37 = vector.load %arg4[%c0_22, %c0_23, %c0_24, %c0_25] : memref<1x1x16x128xbf16, #tpu.memory_space<vmem>>, vector<1x1x16x128xbf16>
    %38 = vector.shape_cast %37 : vector<1x1x16x128xbf16> to vector<1x16x128xbf16>
    %c0_i32_26 = arith.constant 0 : i32
    %39 = arith.cmpi slt, %arg1, %c0_i32_26 : i32
    %40 = arith.extf %38 : vector<1x16x128xbf16> to vector<1x16x128xf32>
    %c0_27 = arith.constant 0 : index
    %c0_28 = arith.constant 0 : index
    %41 = vector.load %arg5[%c0_27, %c0_28] : memref<1x128xf32, #tpu.memory_space<vmem>>, vector<1x128xf32>
    %42 = vector.shape_cast %41 : vector<1x128xf32> to vector<1x1x128xf32>
    %43 = vector.broadcast %42 : vector<1x1x128xf32> to vector<1x16x128xf32>
    %44 = arith.mulf %40, %43 : vector<1x16x128xf32>
    %c0_29 = arith.constant 0 : index
    %c0_30 = arith.constant 0 : index
    %45 = vector.load %arg6[%c0_29, %c0_30] : memref<1x128xf32, #tpu.memory_space<vmem>>, vector<1x128xf32>
    %46 = vector.shape_cast %45 : vector<1x128xf32> to vector<1x1x128xf32>
    %47 = vector.broadcast %46 : vector<1x1x128xf32> to vector<1x16x128xf32>
    %48 = arith.addf %44, %47 : vector<1x16x128xf32>
    %cst_31 = arith.constant 0.000000e+00 : f32
    %49 = vector.broadcast %cst_31 : f32 to vector<1x16x128xf32>
    %50 = arith.maximumf %48, %49 : vector<1x16x128xf32>
    %cst_32 = arith.constant 0.000000e+00 : f32
    %51 = vector.broadcast %cst_32 : f32 to vector<1x16x128xf32>
    %52 = arith.select %39, %50, %51 : vector<1x16x128xf32>
    %53 = arith.truncf %52 : vector<1x16x128xf32> to vector<1x16x128xbf16>
    %54 = vector.shape_cast %53 : vector<1x16x128xbf16> to vector<16x128xbf16>
    %c288 = arith.constant 288 : index
    %c0_33 = arith.constant 0 : index
    %55 = vector.load %arg10[%c288, %c0_33] : memref<320x128xbf16, #tpu.memory_space<vmem>>, vector<16x128xbf16>
    tpu.vector_store %arg10[%c288, %c0_33], %54 {strides = array<i32>} : memref<320x128xbf16, #tpu.memory_space<vmem>>, vector<16x128xbf16>,
    %cst_34 = arith.constant 0.000000e+00 : bf16
    %56 = vector.broadcast %cst_34 : bf16 to vector<16x128xbf16>
    %c304 = arith.constant 304 : index
    %c0_35 = arith.constant 0 : index
    %57 = vector.load %arg10[%c304, %c0_35] : memref<320x128xbf16, #tpu.memory_space<vmem>>, vector<16x128xbf16>
    tpu.vector_store %arg10[%c304, %c0_35], %56 {strides = array<i32>} : memref<320x128xbf16, #tpu.memory_space<vmem>>, vector<16x128xbf16>,
    %58 = tpu.iota {dimensions = array<i32: 0>} : vector<288x1xi32>
    %c16_i32 = arith.constant 16 : i32
    %c0_i32_36 = arith.constant 0 : i32
    %59 = arith.cmpi eq, %c16_i32, %c0_i32_36 : i32
    %c1_i32 = arith.constant 1 : i32
    %60 = arith.select %59, %c1_i32, %c16_i32 : i32
    %61 = vector.broadcast %60 : i32 to vector<288x1xi32>
    %62 = arith.remsi %58, %61 : vector<288x1xi32>
    %c0_i32_37 = arith.constant 0 : i32
    %63 = vector.broadcast %c0_i32_37 : i32 to vector<288x1xi32>
    %64 = arith.cmpi ne, %62, %63 : vector<288x1xi32>
    %c0_i32_38 = arith.constant 0 : i32
    %65 = vector.broadcast %c0_i32_38 : i32 to vector<288x1xi32>
    %66 = arith.cmpi slt, %62, %65 : vector<288x1xi32>
    %c0_i32_39 = arith.constant 0 : i32
    %67 = arith.cmpi slt, %60, %c0_i32_39 : i32
    %68 = vector.broadcast %67 : i1 to vector<288x1xi1>
    %69 = vector.broadcast %68 : vector<288x1xi1> to vector<288x1xi1>
    %70 = arith.xori %66, %69 : vector<288x1xi1>
    %71 = arith.andi %70, %64 : vector<288x1xi1>
    %72 = vector.broadcast %60 : i32 to vector<288x1xi32>
    %73 = arith.addi %62, %72 : vector<288x1xi32>
    %74 = arith.select %71, %73, %62 : vector<288x1xi1>, vector<288x1xi32>
    %c15 = arith.constant 15 : index
    %c0_40 = arith.constant 0 : index
    %75 = vector.load %arg10[%c15, %c0_40] : memref<320x128xbf16, #tpu.memory_space<vmem>>, vector<288x128xbf16>
    %c0_i32_41 = arith.constant 0 : i32
    %76 = vector.broadcast %c0_i32_41 : i32 to vector<288x1xi32>
    %77 = arith.cmpi eq, %74, %76 : vector<288x1xi32>
    %cst_42 = arith.constant 0.000000e+00 : bf16
    %78 = vector.broadcast %cst_42 : bf16 to vector<288x128xbf16>
    %79 = vector.shape_cast %77 : vector<288x1xi1> to vector<288x1xi1>
    %80 = vector.broadcast %79 : vector<288x1xi1> to vector<288x128xi1>
    %81 = arith.select %80, %78, %75 : vector<288x128xi1>, vector<288x128xbf16>
    %c0_43 = arith.constant 0 : index
    %c0_44 = arith.constant 0 : index
    %82 = vector.load %arg11[%c0_43, %c0_44] : memref<288x128xbf16, #tpu.memory_space<vmem>>, vector<288x128xbf16>
    tpu.vector_store %arg11[%c0_43, %c0_44], %81 {strides = array<i32>} : memref<288x128xbf16, #tpu.memory_space<vmem>>, vector<288x128xbf16>,
    %c17 = arith.constant 17 : index
    %c0_45 = arith.constant 0 : index
    %83 = vector.load %arg10[%c17, %c0_45] : memref<320x128xbf16, #tpu.memory_space<vmem>>, vector<288x128xbf16>
    %c15_i32 = arith.constant 15 : i32
    %84 = vector.broadcast %c15_i32 : i32 to vector<288x1xi32>
    %85 = arith.cmpi eq, %74, %84 : vector<288x1xi32>
    %cst_46 = arith.constant 0.000000e+00 : bf16
    %86 = vector.broadcast %cst_46 : bf16 to vector<288x128xbf16>
    %87 = vector.shape_cast %85 : vector<288x1xi1> to vector<288x1xi1>
    %88 = vector.broadcast %87 : vector<288x1xi1> to vector<288x128xi1>
    %89 = arith.select %88, %86, %83 : vector<288x128xi1>, vector<288x128xbf16>
    %c0_47 = arith.constant 0 : index
    %c0_48 = arith.constant 0 : index
    %90 = vector.load %arg12[%c0_47, %c0_48] : memref<288x128xbf16, #tpu.memory_space<vmem>>, vector<288x128xbf16>
    tpu.vector_store %arg12[%c0_47, %c0_48], %89 {strides = array<i32>} : memref<288x128xbf16, #tpu.memory_space<vmem>>, vector<288x128xbf16>,
    %c0_49 = arith.constant 0 : index
    %c0_50 = arith.constant 0 : index
    %91 = vector.load %arg11[%c0_49, %c0_50] : memref<288x128xbf16, #tpu.memory_space<vmem>>, vector<256x128xbf16>
    %c0_51 = arith.constant 0 : index
    %c0_52 = arith.constant 0 : index
    %c0_53 = arith.constant 0 : index
    %92 = vector.load %arg7[%c0_51, %c0_52, %c0_53] : memref<9x128x128xbf16, #tpu.memory_space<vmem>>, vector<1x128x128xbf16>
    %93 = vector.shape_cast %92 : vector<1x128x128xbf16> to vector<128x128xbf16>
    %cst_54 = arith.constant dense<0.000000e+00> : vector<256x128xf32>
    %94 = tpu.matmul %91, %93, %cst_54 {dimension_numbers = #tpu.dot_dimension_numbers<[1], [0], [0], [1], [0, 0, 1, 1], [], []>} : vector<256x128xbf16>, vector<128x128xbf16>, vector<256x128xf32> -> vector<256x128xf32>
    %c16_55 = arith.constant 16 : index
    %c0_56 = arith.constant 0 : index
    %95 = vector.load %arg10[%c16_55, %c0_56] : memref<320x128xbf16, #tpu.memory_space<vmem>>, vector<256x128xbf16>
    %c1 = arith.constant 1 : index
    %c0_57 = arith.constant 0 : index
    %c0_58 = arith.constant 0 : index
    %96 = vector.load %arg7[%c1, %c0_57, %c0_58] : memref<9x128x128xbf16, #tpu.memory_space<vmem>>, vector<1x128x128xbf16>
    %97 = vector.shape_cast %96 : vector<1x128x128xbf16> to vector<128x128xbf16>
    %cst_59 = arith.constant dense<0.000000e+00> : vector<256x128xf32>
    %98 = tpu.matmul %95, %97, %cst_59 {dimension_numbers = #tpu.dot_dimension_numbers<[1], [0], [0], [1], [0, 0, 1, 1], [], []>} : vector<256x128xbf16>, vector<128x128xbf16>, vector<256x128xf32> -> vector<256x128xf32>
    %99 = arith.addf %94, %98 : vector<256x128xf32>
    %c0_60 = arith.constant 0 : index
    %c0_61 = arith.constant 0 : index
    %100 = vector.load %arg12[%c0_60, %c0_61] : memref<288x128xbf16, #tpu.memory_space<vmem>>, vector<256x128xbf16>
    %c2 = arith.constant 2 : index
    %c0_62 = arith.constant 0 : index
    %c0_63 = arith.constant 0 : index
    %101 = vector.load %arg7[%c2, %c0_62, %c0_63] : memref<9x128x128xbf16, #tpu.memory_space<vmem>>, vector<1x128x128xbf16>
    %102 = vector.shape_cast %101 : vector<1x128x128xbf16> to vector<128x128xbf16>
    %cst_64 = arith.constant dense<0.000000e+00> : vector<256x128xf32>
    %103 = tpu.matmul %100, %102, %cst_64 {dimension_numbers = #tpu.dot_dimension_numbers<[1], [0], [0], [1], [0, 0, 1, 1], [], []>} : vector<256x128xbf16>, vector<128x128xbf16>, vector<256x128xf32> -> vector<256x128xf32>
    %104 = arith.addf %99, %103 : vector<256x128xf32>
    %c16_65 = arith.constant 16 : index
    %c0_66 = arith.constant 0 : index
    %105 = vector.load %arg11[%c16_65, %c0_66] : memref<288x128xbf16, #tpu.memory_space<vmem>>, vector<256x128xbf16>
    %c3 = arith.constant 3 : index
    %c0_67 = arith.constant 0 : index
    %c0_68 = arith.constant 0 : index
    %106 = vector.load %arg7[%c3, %c0_67, %c0_68] : memref<9x128x128xbf16, #tpu.memory_space<vmem>>, vector<1x128x128xbf16>
    %107 = vector.shape_cast %106 : vector<1x128x128xbf16> to vector<128x128xbf16>
    %cst_69 = arith.constant dense<0.000000e+00> : vector<256x128xf32>
    %108 = tpu.matmul %105, %107, %cst_69 {dimension_numbers = #tpu.dot_dimension_numbers<[1], [0], [0], [1], [0, 0, 1, 1], [], []>} : vector<256x128xbf16>, vector<128x128xbf16>, vector<256x128xf32> -> vector<256x128xf32>
    %109 = arith.addf %104, %108 : vector<256x128xf32>
    %c32_70 = arith.constant 32 : index
    %c0_71 = arith.constant 0 : index
    %110 = vector.load %arg10[%c32_70, %c0_71] : memref<320x128xbf16, #tpu.memory_space<vmem>>, vector<256x128xbf16>
    %c4 = arith.constant 4 : index
    %c0_72 = arith.constant 0 : index
    %c0_73 = arith.constant 0 : index
    %111 = vector.load %arg7[%c4, %c0_72, %c0_73] : memref<9x128x128xbf16, #tpu.memory_space<vmem>>, vector<1x128x128xbf16>
    %112 = vector.shape_cast %111 : vector<1x128x128xbf16> to vector<128x128xbf16>
    %cst_74 = arith.constant dense<0.000000e+00> : vector<256x128xf32>
    %113 = tpu.matmul %110, %112, %cst_74 {dimension_numbers = #tpu.dot_dimension_numbers<[1], [0], [0], [1], [0, 0, 1, 1], [], []>} : vector<256x128xbf16>, vector<128x128xbf16>, vector<256x128xf32> -> vector<256x128xf32>
    %114 = arith.addf %109, %113 : vector<256x128xf32>
    %c16_75 = arith.constant 16 : index
    %c0_76 = arith.constant 0 : index
    %115 = vector.load %arg12[%c16_75, %c0_76] : memref<288x128xbf16, #tpu.memory_space<vmem>>, vector<256x128xbf16>
    %c5 = arith.constant 5 : index
    %c0_77 = arith.constant 0 : index
    %c0_78 = arith.constant 0 : index
    %116 = vector.load %arg7[%c5, %c0_77, %c0_78] : memref<9x128x128xbf16, #tpu.memory_space<vmem>>, vector<1x128x128xbf16>
    %117 = vector.shape_cast %116 : vector<1x128x128xbf16> to vector<128x128xbf16>
    %cst_79 = arith.constant dense<0.000000e+00> : vector<256x128xf32>
    %118 = tpu.matmul %115, %117, %cst_79 {dimension_numbers = #tpu.dot_dimension_numbers<[1], [0], [0], [1], [0, 0, 1, 1], [], []>} : vector<256x128xbf16>, vector<128x128xbf16>, vector<256x128xf32> -> vector<256x128xf32>
    %119 = arith.addf %114, %118 : vector<256x128xf32>
    %c32_80 = arith.constant 32 : index
    %c0_81 = arith.constant 0 : index
    %120 = vector.load %arg11[%c32_80, %c0_81] : memref<288x128xbf16, #tpu.memory_space<vmem>>, vector<256x128xbf16>
    %c6 = arith.constant 6 : index
    %c0_82 = arith.constant 0 : index
    %c0_83 = arith.constant 0 : index
    %121 = vector.load %arg7[%c6, %c0_82, %c0_83] : memref<9x128x128xbf16, #tpu.memory_space<vmem>>, vector<1x128x128xbf16>
    %122 = vector.shape_cast %121 : vector<1x128x128xbf16> to vector<128x128xbf16>
    %cst_84 = arith.constant dense<0.000000e+00> : vector<256x128xf32>
    %123 = tpu.matmul %120, %122, %cst_84 {dimension_numbers = #tpu.dot_dimension_numbers<[1], [0], [0], [1], [0, 0, 1, 1], [], []>} : vector<256x128xbf16>, vector<128x128xbf16>, vector<256x128xf32> -> vector<256x128xf32>
    %124 = arith.addf %119, %123 : vector<256x128xf32>
    %c48 = arith.constant 48 : index
    %c0_85 = arith.constant 0 : index
    %125 = vector.load %arg10[%c48, %c0_85] : memref<320x128xbf16, #tpu.memory_space<vmem>>, vector<256x128xbf16>
    %c7 = arith.constant 7 : index
    %c0_86 = arith.constant 0 : index
    %c0_87 = arith.constant 0 : index
    %126 = vector.load %arg7[%c7, %c0_86, %c0_87] : memref<9x128x128xbf16, #tpu.memory_space<vmem>>, vector<1x128x128xbf16>
    %127 = vector.shape_cast %126 : vector<1x128x128xbf16> to vector<128x128xbf16>
    %cst_88 = arith.constant dense<0.000000e+00> : vector<256x128xf32>
    %128 = tpu.matmul %125, %127, %cst_88 {dimension_numbers = #tpu.dot_dimension_numbers<[1], [0], [0], [1], [0, 0, 1, 1], [], []>} : vector<256x128xbf16>, vector<128x128xbf16>, vector<256x128xf32> -> vector<256x128xf32>
    %129 = arith.addf %124, %128 : vector<256x128xf32>
    %c32_89 = arith.constant 32 : index
    %c0_90 = arith.constant 0 : index
    %130 = vector.load %arg12[%c32_89, %c0_90] : memref<288x128xbf16, #tpu.memory_space<vmem>>, vector<256x128xbf16>
    %c8 = arith.constant 8 : index
    %c0_91 = arith.constant 0 : index
    %c0_92 = arith.constant 0 : index
    %131 = vector.load %arg7[%c8, %c0_91, %c0_92] : memref<9x128x128xbf16, #tpu.memory_space<vmem>>, vector<1x128x128xbf16>
    %132 = vector.shape_cast %131 : vector<1x128x128xbf16> to vector<128x128xbf16>
    %cst_93 = arith.constant dense<0.000000e+00> : vector<256x128xf32>
    %133 = tpu.matmul %130, %132, %cst_93 {dimension_numbers = #tpu.dot_dimension_numbers<[1], [0], [0], [1], [0, 0, 1, 1], [], []>} : vector<256x128xbf16>, vector<128x128xbf16>, vector<256x128xf32> -> vector<256x128xf32>
    %134 = arith.addf %129, %133 : vector<256x128xf32>
    %135 = vector.shape_cast %134 : vector<256x128xf32> to vector<16x16x128xf32>
    %c0_94 = arith.constant 0 : index
    %c0_95 = arith.constant 0 : index
    %c0_96 = arith.constant 0 : index
    %c0_97 = arith.constant 0 : index
    %136 = vector.load %arg8[%c0_94, %c0_95, %c0_96, %c0_97] : memref<1x16x16x128xf32, #tpu.memory_space<vmem>>, vector<1x16x16x128xf32>
    %137 = vector.shape_cast %136 : vector<1x16x16x128xf32> to vector<16x16x128xf32>
    %138 = vector.shape_cast %135 : vector<16x16x128xf32> to vector<1x16x16x128xf32>
    tpu.vector_store %arg8[%c0_94, %c0_95, %c0_96, %c0_97], %138 {strides = array<i32>} : memref<1x16x16x128xf32, #tpu.memory_space<vmem>>, vector<1x16x16x128xf32>,
    %cst_98 = arith.constant dense<0.000000e+00> : vector<128xf32>
    %139 = vector.multi_reduction <add>, %134, %cst_98 [0] : vector<256x128xf32> to vector<128xf32>
    %140 = vector.shape_cast %139 : vector<128xf32> to vector<1x128xf32>
    %c0_99 = arith.constant 0 : index
    %c0_100 = arith.constant 0 : index
    %c0_101 = arith.constant 0 : index
    %141 = vector.load %arg9[%c0_99, %c0_100, %c0_101] : memref<1x2x128xf32, #tpu.memory_space<vmem>>, vector<1x1x128xf32>
    %142 = vector.shape_cast %141 : vector<1x1x128xf32> to vector<1x128xf32>
    %143 = vector.shape_cast %140 : vector<1x128xf32> to vector<1x1x128xf32>
    tpu.vector_store %arg9[%c0_99, %c0_100, %c0_101], %143 {strides = array<i32>} : memref<1x2x128xf32, #tpu.memory_space<vmem>>, vector<1x1x128xf32>,
    %144 = arith.mulf %134, %134 : vector<256x128xf32>
    %cst_102 = arith.constant dense<0.000000e+00> : vector<128xf32>
    %145 = vector.multi_reduction <add>, %144, %cst_102 [0] : vector<256x128xf32> to vector<128xf32>
    %146 = vector.shape_cast %145 : vector<128xf32> to vector<1x128xf32>
    %c0_103 = arith.constant 0 : index
    %c1_104 = arith.constant 1 : index
    %c0_105 = arith.constant 0 : index
    %147 = vector.load %arg9[%c0_103, %c1_104, %c0_105] : memref<1x2x128xf32, #tpu.memory_space<vmem>>, vector<1x1x128xf32>
    %148 = vector.shape_cast %147 : vector<1x1x128xf32> to vector<1x128xf32>
    %149 = vector.shape_cast %146 : vector<1x128xf32> to vector<1x1x128xf32>
    tpu.vector_store %arg9[%c0_103, %c1_104, %c0_105], %149 {strides = array<i32>} : memref<1x2x128xf32, #tpu.memory_space<vmem>>, vector<1x1x128xf32>,
    return
  }
  func.func @transform_0(%arg0: i32, %arg1: i32) -> (i32, i32, i32, i32) {
    %c16_i32 = arith.constant 16 : i32
    %0 = arith.muli %arg1, %c16_i32 : i32
    %c1_i32 = arith.constant 1 : i32
    %1 = arith.subi %0, %c1_i32 : i32
    %c0_i32 = arith.constant 0 : i32
    %2 = arith.maxsi %1, %c0_i32 : i32
    %c0_i32_0 = arith.constant 0 : i32
    %c0_i32_1 = arith.constant 0 : i32
    %c0_i32_2 = arith.constant 0 : i32
    return %arg0, %2, %c0_i32_0, %c0_i32_1 : i32, i32, i32, i32
  }
  func.func @transform_1(%arg0: i32, %arg1: i32) -> (i32, i32, i32, i32) {
    %c0_i32 = arith.constant 0 : i32
    %c0_i32_0 = arith.constant 0 : i32
    %c0_i32_1 = arith.constant 0 : i32
    return %arg0, %arg1, %c0_i32, %c0_i32_0 : i32, i32, i32, i32
  }
  func.func @transform_2(%arg0: i32, %arg1: i32) -> (i32, i32, i32, i32) {
    %c16_i32 = arith.constant 16 : i32
    %0 = arith.muli %arg1, %c16_i32 : i32
    %c16_i32_0 = arith.constant 16 : i32
    %1 = arith.addi %0, %c16_i32_0 : i32
    %c15_i32 = arith.constant 15 : i32
    %2 = arith.minsi %1, %c15_i32 : i32
    %c0_i32 = arith.constant 0 : i32
    %c0_i32_1 = arith.constant 0 : i32
    %c0_i32_2 = arith.constant 0 : i32
    return %arg0, %2, %c0_i32, %c0_i32_1 : i32, i32, i32, i32
  }
  func.func @transform_3(%arg0: i32, %arg1: i32) -> (i32, i32) {
    %c0_i32 = arith.constant 0 : i32
    %c0_i32_0 = arith.constant 0 : i32
    %c0_i32_1 = arith.constant 0 : i32
    return %c0_i32, %c0_i32_0 : i32, i32
  }
  func.func @transform_4(%arg0: i32, %arg1: i32) -> (i32, i32) {
    %c0_i32 = arith.constant 0 : i32
    %c0_i32_0 = arith.constant 0 : i32
    %c0_i32_1 = arith.constant 0 : i32
    return %c0_i32, %c0_i32_0 : i32, i32
  }
  func.func @transform_5(%arg0: i32, %arg1: i32) -> (i32, i32, i32) {
    %c0_i32 = arith.constant 0 : i32
    %c0_i32_0 = arith.constant 0 : i32
    %c0_i32_1 = arith.constant 0 : i32
    %c0_i32_2 = arith.constant 0 : i32
    return %c0_i32, %c0_i32_0, %c0_i32_1 : i32, i32, i32
  }
  func.func @transform_6(%arg0: i32, %arg1: i32) -> (i32, i32, i32, i32) {
    %c0_i32 = arith.constant 0 : i32
    %c0_i32_0 = arith.constant 0 : i32
    %c0_i32_1 = arith.constant 0 : i32
    return %arg0, %arg1, %c0_i32, %c0_i32_0 : i32, i32, i32, i32
  }
  func.func @transform_7(%arg0: i32, %arg1: i32) -> (i32, i32, i32) {
    %c1_i32 = arith.constant 1 : i32
    %0 = arith.muli %arg0, %c1_i32 : i32
    %1 = arith.addi %0, %arg1 : i32
    %c0_i32 = arith.constant 0 : i32
    %c0_i32_0 = arith.constant 0 : i32
    %c0_i32_1 = arith.constant 0 : i32
    return %1, %c0_i32, %c0_i32_0 : i32, i32, i32
  }
}

module attributes {stable_mosaic.version = 11 : i64} {
  func.func @_bn_relu_kernel(%arg0: i32, %arg1: memref<256x128xf32, #tpu.memory_space<vmem>>, %arg2: memref<1x128xf32, #tpu.memory_space<vmem>>, %arg3: memref<1x128xf32, #tpu.memory_space<vmem>>, %arg4: memref<256x128xf32, #tpu.memory_space<vmem>>) attributes {dimension_semantics = [#tpu.dimension_semantics<parallel>], iteration_bounds = array<i64: 2>, scalar_prefetch = 0 : i64, scratch_operands = 0 : i64, tpu.core_type = #tpu.core_type<tc>, window_params = [{transform_indices = @transform_0, window_bounds = array<i64: 256, 128>}, {pipeline_mode = #tpu.pipeline_mode<synchronous>, transform_indices = @transform_1, window_bounds = array<i64: 1, 128>}, {pipeline_mode = #tpu.pipeline_mode<synchronous>, transform_indices = @transform_2, window_bounds = array<i64: 1, 128>}, {transform_indices = @transform_3, window_bounds = array<i64: 256, 128>}]} {
    %c0 = arith.constant 0 : index
    %c0_0 = arith.constant 0 : index
    %0 = vector.load %arg1[%c0, %c0_0] : memref<256x128xf32, #tpu.memory_space<vmem>>, vector<256x128xf32>
    %c0_1 = arith.constant 0 : index
    %c0_2 = arith.constant 0 : index
    %1 = vector.load %arg2[%c0_1, %c0_2] : memref<1x128xf32, #tpu.memory_space<vmem>>, vector<1x128xf32>
    %2 = vector.broadcast %1 : vector<1x128xf32> to vector<256x128xf32>
    %3 = arith.mulf %0, %2 : vector<256x128xf32>
    %c0_3 = arith.constant 0 : index
    %c0_4 = arith.constant 0 : index
    %4 = vector.load %arg3[%c0_3, %c0_4] : memref<1x128xf32, #tpu.memory_space<vmem>>, vector<1x128xf32>
    %5 = vector.broadcast %4 : vector<1x128xf32> to vector<256x128xf32>
    %6 = arith.addf %3, %5 : vector<256x128xf32>
    %cst = arith.constant 0.000000e+00 : f32
    %7 = vector.broadcast %cst : f32 to vector<256x128xf32>
    %8 = arith.maximumf %6, %7 : vector<256x128xf32>
    %c0_5 = arith.constant 0 : index
    %c0_6 = arith.constant 0 : index
    %9 = vector.load %arg4[%c0_5, %c0_6] : memref<256x128xf32, #tpu.memory_space<vmem>>, vector<256x128xf32>
    tpu.vector_store %arg4[%c0_5, %c0_6], %8 {strides = array<i32>} : memref<256x128xf32, #tpu.memory_space<vmem>>, vector<256x128xf32>,
    return
  }
  func.func @transform_0(%arg0: i32) -> (i32, i32) {
    %c0_i32 = arith.constant 0 : i32
    %c0_i32_0 = arith.constant 0 : i32
    return %arg0, %c0_i32 : i32, i32
  }
  func.func @transform_1(%arg0: i32) -> (i32, i32) {
    %c0_i32 = arith.constant 0 : i32
    %c0_i32_0 = arith.constant 0 : i32
    %c0_i32_1 = arith.constant 0 : i32
    return %c0_i32, %c0_i32_0 : i32, i32
  }
  func.func @transform_2(%arg0: i32) -> (i32, i32) {
    %c0_i32 = arith.constant 0 : i32
    %c0_i32_0 = arith.constant 0 : i32
    %c0_i32_1 = arith.constant 0 : i32
    return %c0_i32, %c0_i32_0 : i32, i32
  }
  func.func @transform_3(%arg0: i32) -> (i32, i32) {
    %c0_i32 = arith.constant 0 : i32
    %c0_i32_0 = arith.constant 0 : i32
    return %arg0, %c0_i32 : i32, i32
  }
}

</mosaic_0001>

<bundles_post_ra>
// kernel: conv_block_forward.5
= control target key start
LH: loop header
LB: loop body
LE: loop exit
PB: predicated region body
PF: predicated region fallthrough
CT: control target
= control target key end

     0   :  { %s453_s12 = smov 0   ;;  %s612_s0 = inlined_call_operand.vmem [shape: f32[512,128], index: 0, kind: input, shape index: {}]   ;;  %s613_s1 = inlined_call_operand.vmem [shape: f32[1,128], index: 1, kind: input, shape index: {}]   ;;  %s614_s2 = inlined_call_operand.vmem [shape: f32[1,128], index: 2, kind: input, shape index: {}]   ;;  %s615_s3 = inlined_call_operand.vmem [shape: f32[512,128], index: 3, kind: output, shape index: {}]  }
   0x1 LB: > { %s404_s13 = sadd.s32 4294967295, %s431_s12   ;;  %p408_p0 = scmp.ge.s32.totalorder %s431_s12, 1  ;;  %s431_s12 = sphi %s453_s12, %s13_s12  }
   0x2   : > { %p138_p1 = scmp.lt.s32.totalorder %s431_s12, 3 }
   0x4   : > { %p139_p2 = pnand %p408_p0, %p138_p1 }
   0x5   : > { %s409_s14 = sshll.u32 (!%p139_p2), %s404_s13, 5  ;;  %v464_v0 = vld [vmem:[%s613_s1] ss:$0 sm:$0xff] (!%p139_p2) }
   0x6   : > { %142 = sbr.rel (%p139_p2) target bundleno = 46 (0x2e), region = 32  ;;  %p163_p3 = scmp.lt.s32.totalorder (!%p139_p2), %s409_s14, 63  ;;  %v474_v1 = vld [vmem:[%s614_s2] ss:$0 sm:$0xff] (!%p139_p2) }
   0xd   : > { %s617_s14 = smov (!%p163_p3, %s409_s14), 63 }
   0xe   : > { %s410_s15 = sshll.u32 %s617_s14, 3 }
   0xf   : > { %s469_s20 = scalar_lea.vmem %s612_s0, %s410_s15  ;;  %s497_s25 = scalar_lea.vmem %s615_s3, %s410_s15 }
  0x10   : > { %v174_v2 = vld [vmem:[%s469_s20] sm:$0xff]  ;;  %v175_v3 = vld [vmem:[%s469_s20 + $0x8] sm:$0xff]  ;;  %v176_v4 = vld [vmem:[%s469_s20 + $0x10] sm:$0xff] }
  0x11   : > { %v213_v5 = vmul.f32 %v464_v0, %v174_v2  ;;  %v214_v6 = vmul.f32 %v464_v0, %v175_v3  ;;  %v215_v7 = vmul.f32 %v464_v0, %v176_v4  ;;  %v177_v8 = vld [vmem:[%s469_s20 + $0x18] sm:$0xff]  ;;  %v178_v9 = vld [vmem:[%s469_s20 + $0x20] sm:$0xff]  ;;  %v179_v10 = vld [vmem:[%s469_s20 + $0x28] sm:$0xff] }
  0x12   : > { %v216_v11 = vmul.f32 %v464_v0, %v177_v8  ;;  %v217_v12 = vmul.f32 %v464_v0, %v178_v9  ;;  %v218_v13 = vmul.f32 %v464_v0, %v179_v10  ;;  %v180_v14 = vld [vmem:[%s469_s20 + $0x30] sm:$0xff]  ;;  %v181_v15 = vld [vmem:[%s469_s20 + $0x38] sm:$0xff]  ;;  %v182_v24 = vld [vmem:[%s469_s20 + $0x40] sm:$0xff] }
  0x13   : > { %v252_v16 = vadd.f32 %v474_v1, %v213_v5  ;;  %v253_v17 = vadd.f32 %v474_v1, %v214_v6  ;;  %v254_v18 = vadd.f32 %v474_v1, %v215_v7  ;;  %v219_v19 = vmul.f32 %v464_v0, %v180_v14  ;;  %v183_v25 = vld [vmem:[%s469_s20 + $0x48] sm:$0xff]  ;;  %v184_v26 = vld [vmem:[%s469_s20 + $0x50] sm:$0xff]  ;;  %v185_v31 = vld [vmem:[%s469_s20 + $0x58] sm:$0xff] }
  0x14   : > { %v255_v20 = vadd.f32 %v474_v1, %v216_v11  ;;  %v256_v21 = vadd.f32 %v474_v1, %v217_v12  ;;  %v257_v22 = vadd.f32 %v474_v1, %v218_v13  ;;  %v220_v23 = vmul.f32 %v464_v0, %v181_v15  ;;  %v186_v32 = vld [vmem:[%s469_s20 + $0x60] sm:$0xff]  ;;  %v187_v33 = vld [vmem:[%s469_s20 + $0x68] sm:$0xff]  ;;  %v188_v38 = vld [vmem:[%s469_s20 + $0x70] sm:$0xff] }
  0x15   : > { %v284_v27 = vmax.f32 %v252_v16, 0.0  ;;  %v285_v28 = vmax.f32 %v253_v17, 0.0  ;;  %v286_v29 = vmax.f32 %v254_v18, 0.0  ;;  %v258_v30 = vadd.f32 %v474_v1, %v219_v19  ;;  %v189_v43 = vld [vmem:[%s469_s20 + $0x78] sm:$0xff]  ;;  %v190_v56 = vld [vmem:[%s469_s20 + $0x80] sm:$0xff]  ;;  %v191_v57 = vld [vmem:[%s469_s20 + $0x88] sm:$0xff] }
  0x16   : > { %v287_v34 = vmax.f32 %v255_v20, 0.0  ;;  %v288_v35 = vmax.f32 %v256_v21, 0.0  ;;  %v289_v36 = vmax.f32 %v257_v22, 0.0  ;;  %v259_v37 = vadd.f32 %v474_v1, %v220_v23  ;;  %v192_v58 = vld [vmem:[%s469_s20 + $0x90] sm:$0xff]  ;;  %v193_v63 = vld [vmem:[%s469_s20 + $0x98] sm:$0xff]  ;;  %v194_v2 = vld [vmem:[%s469_s20 + $0xa0] sm:$0xff] }
  0x17   : > { %316 = vst [vmem:[%s497_s25] sm:$0xff] %v284_v27  ;;  %317 = vst [vmem:[%s497_s25 + $0x8] sm:$0xff] %v285_v28  ;;  %v290_v39 = vmax.f32 %v258_v30, 0.0  ;;  %v221_v40 = vmul.f32 %v464_v0, %v182_v24  ;;  %v222_v41 = vmul.f32 %v464_v0, %v183_v25  ;;  %v223_v42 = vmul.f32 %v464_v0, %v184_v26  ;;  %v195_v3 = vld [vmem:[%s469_s20 + $0xa8] sm:$0xff]  ;;  %v196_v8 = vld [vmem:[%s469_s20 + $0xb0] sm:$0xff] }
  0x18   : > { %318 = vst [vmem:[%s497_s25 + $0x10] sm:$0xff] %v286_v29  ;;  %319 = vst [vmem:[%s497_s25 + $0x18] sm:$0xff] %v287_v34  ;;  %v291_v44 = vmax.f32 %v259_v37, 0.0  ;;  %v224_v45 = vmul.f32 %v464_v0, %v185_v31  ;;  %v225_v46 = vmul.f32 %v464_v0, %v186_v32  ;;  %v226_v47 = vmul.f32 %v464_v0, %v187_v33  ;;  %v197_v13 = vld [vmem:[%s469_s20 + $0xb8] sm:$0xff]  ;;  %v198_v26 = vld [vmem:[%s469_s20 + $0xc0] sm:$0xff] }
  0x19   : > { %320 = vst [vmem:[%s497_s25 + $0x20] sm:$0xff] %v288_v35  ;;  %321 = vst [vmem:[%s497_s25 + $0x28] sm:$0xff] %v289_v36  ;;  %v260_v48 = vadd.f32 %v474_v1, %v221_v40  ;;  %v261_v49 = vadd.f32 %v474_v1, %v222_v41  ;;  %v262_v50 = vadd.f32 %v474_v1, %v223_v42  ;;  %v199_v27 = vld [vmem:[%s469_s20 + $0xc8] sm:$0xff]  ;;  %v200_v28 = vld [vmem:[%s469_s20 + $0xd0] sm:$0xff] }
  0x1a   : > { %322 = vst [vmem:[%s497_s25 + $0x30] sm:$0xff] %v290_v39  ;;  %v227_v51 = vmul.f32 %v464_v0, %v188_v38  ;;  %323 = vst [vmem:[%s497_s25 + $0x38] sm:$0xff] %v291_v44  ;;  %v263_v52 = vadd.f32 %v474_v1, %v224_v45  ;;  %v264_v53 = vadd.f32 %v474_v1, %v225_v46  ;;  %v201_v33 = vld [vmem:[%s469_s20 + $0xd8] sm:$0xff]  ;;  %v202_v34 = vld [vmem:[%s469_s20 + $0xe0] sm:$0xff] }
  0x1b   : > { %v265_v54 = vadd.f32 %v474_v1, %v226_v47  ;;  %v228_v55 = vmul.f32 %v464_v0, %v189_v43  ;;  %v292_v59 = vmax.f32 %v260_v48, 0.0  ;;  %v293_v60 = vmax.f32 %v261_v49, 0.0  ;;  %v203_v35 = vld [vmem:[%s469_s20 + $0xe8] sm:$0xff]  ;;  %v204_v40 = vld [vmem:[%s469_s20 + $0xf0] sm:$0xff]  ;;  %v205_v45 = vld [vmem:[%s469_s20 + $0xf8] sm:$0xff] }
  0x1c   : > { %v294_v61 = vmax.f32 %v262_v50, 0.0  ;;  %v266_v62 = vadd.f32 %v474_v1, %v227_v51  ;;  %v295_v4 = vmax.f32 %v263_v52, 0.0  ;;  %v296_v5 = vmax.f32 %v264_v53, 0.0 }
  0x1d   : > { %v297_v6 = vmax.f32 %v265_v54, 0.0  ;;  %v267_v7 = vadd.f32 %v474_v1, %v228_v55  ;;  %324 = vst [vmem:[%s497_s25 + $0x40] sm:$0xff] %v292_v59  ;;  %325 = vst [vmem:[%s497_s25 + $0x48] sm:$0xff] %v293_v60  ;;  %v229_v10 = vmul.f32 %v464_v0, %v190_v56  ;;  %v230_v11 = vmul.f32 %v464_v0, %v191_v57 }
  0x1e   : > { %326 = vst [vmem:[%s497_s25 + $0x50] sm:$0xff] %v294_v61  ;;  %v298_v9 = vmax.f32 %v266_v62, 0.0  ;;  %v231_v12 = vmul.f32 %v464_v0, %v192_v58  ;;  %327 = vst [vmem:[%s497_s25 + $0x58] sm:$0xff] %v295_v4  ;;  %v232_v15 = vmul.f32 %v464_v0, %v193_v63  ;;  %v233_v16 = vmul.f32 %v464_v0, %v194_v2 }
  0x1f   : > { %328 = vst [vmem:[%s497_s25 + $0x60] sm:$0xff] %v296_v5  ;;  %329 = vst [vmem:[%s497_s25 + $0x68] sm:$0xff] %v297_v6  ;;  %v299_v14 = vmax.f32 %v267_v7, 0.0  ;;  %v234_v17 = vmul.f32 %v464_v0, %v195_v3  ;;  %v268_v18 = vadd.f32 %v474_v1, %v229_v10  ;;  %v269_v19 = vadd.f32 %v474_v1, %v230_v11 }
  0x20   : > { %330 = vst [vmem:[%s497_s25 + $0x70] sm:$0xff] %v298_v9  ;;  %v270_v20 = vadd.f32 %v474_v1, %v231_v12  ;;  %v235_v21 = vmul.f32 %v464_v0, %v196_v8  ;;  %v271_v22 = vadd.f32 %v474_v1, %v232_v15  ;;  %v272_v23 = vadd.f32 %v474_v1, %v233_v16 }
  0x21   : > { %331 = vst [vmem:[%s497_s25 + $0x78] sm:$0xff] %v299_v14  ;;  %v273_v24 = vadd.f32 %v474_v1, %v234_v17  ;;  %v236_v25 = vmul.f32 %v464_v0, %v197_v13  ;;  %v300_v29 = vmax.f32 %v268_v18, 0.0  ;;  %v301_v30 = vmax.f32 %v269_v19, 0.0 }
  0x22   : > { %v302_v31 = vmax.f32 %v270_v20, 0.0  ;;  %v274_v32 = vadd.f32 %v474_v1, %v235_v21  ;;  %v303_v36 = vmax.f32 %v271_v22, 0.0  ;;  %v304_v37 = vmax.f32 %v272_v23, 0.0 }
  0x23   : > { %v305_v38 = vmax.f32 %v273_v24, 0.0  ;;  %v275_v39 = vadd.f32 %v474_v1, %v236_v25  ;;  %332 = vst [vmem:[%s497_s25 + $0x80] sm:$0xff] %v300_v29  ;;  %333 = vst [vmem:[%s497_s25 + $0x88] sm:$0xff] %v301_v30  ;;  %v237_v42 = vmul.f32 %v464_v0, %v198_v26  ;;  %v238_v43 = vmul.f32 %v464_v0, %v199_v27 }
  0x24   : > { %334 = vst [vmem:[%s497_s25 + $0x90] sm:$0xff] %v302_v31  ;;  %v306_v41 = vmax.f32 %v274_v32, 0.0  ;;  %v239_v44 = vmul.f32 %v464_v0, %v200_v28  ;;  %335 = vst [vmem:[%s497_s25 + $0x98] sm:$0xff] %v303_v36  ;;  %v240_v47 = vmul.f32 %v464_v0, %v201_v33  ;;  %v241_v48 = vmul.f32 %v464_v0, %v202_v34 }
  0x25   : > { %336 = vst [vmem:[%s497_s25 + $0xa0] sm:$0xff] %v304_v37  ;;  %337 = vst [vmem:[%s497_s25 + $0xa8] sm:$0xff] %v305_v38  ;;  %v307_v46 = vmax.f32 %v275_v39, 0.0  ;;  %v242_v49 = vmul.f32 %v464_v0, %v203_v35  ;;  %v276_v50 = vadd.f32 %v474_v1, %v237_v42  ;;  %v277_v51 = vadd.f32 %v474_v1, %v238_v43 }
  0x26   : > { %338 = vst [vmem:[%s497_s25 + $0xb0] sm:$0xff] %v306_v41  ;;  %v278_v52 = vadd.f32 %v474_v1, %v239_v44  ;;  %v243_v53 = vmul.f32 %v464_v0, %v204_v40  ;;  %v279_v54 = vadd.f32 %v474_v1, %v240_v47  ;;  %v280_v55 = vadd.f32 %v474_v1, %v241_v48 }
  0x27   : > { %339 = vst [vmem:[%s497_s25 + $0xb8] sm:$0xff] %v307_v46  ;;  %v281_v56 = vadd.f32 %v474_v1, %v242_v49  ;;  %v244_v57 = vmul.f32 %v464_v0, %v205_v45  ;;  %v308_v58 = vmax.f32 %v276_v50, 0.0  ;;  %v309_v59 = vmax.f32 %v277_v51, 0.0 }
  0x28   : > { %v310_v60 = vmax.f32 %v278_v52, 0.0  ;;  %v282_v61 = vadd.f32 %v474_v1, %v243_v53  ;;  %v311_v62 = vmax.f32 %v279_v54, 0.0  ;;  %v312_v63 = vmax.f32 %v280_v55, 0.0 }
  0x29   : > { %v313_v2 = vmax.f32 %v281_v56, 0.0  ;;  %v283_v3 = vadd.f32 %v474_v1, %v244_v57  ;;  %340 = vst [vmem:[%s497_s25 + $0xc0] sm:$0xff] %v308_v58  ;;  %341 = vst [vmem:[%s497_s25 + $0xc8] sm:$0xff] %v309_v59 }
  0x2a   : > { %342 = vst [vmem:[%s497_s25 + $0xd0] sm:$0xff] %v310_v60  ;;  %v314_v4 = vmax.f32 %v282_v61, 0.0  ;;  %343 = vst [vmem:[%s497_s25 + $0xd8] sm:$0xff] %v311_v62 }
  0x2b   : > { %344 = vst [vmem:[%s497_s25 + $0xe0] sm:$0xff] %v312_v63  ;;  %345 = vst [vmem:[%s497_s25 + $0xe8] sm:$0xff] %v313_v2  ;;  %v315_v0 = vmax.f32 %v283_v3, 0.0 }
  0x2c   : > { %346 = vst [vmem:[%s497_s25 + $0xf0] sm:$0xff] %v314_v4 }
  0x2d   : > { %347 = vst [vmem:[%s497_s25 + $0xf8] sm:$0xff] %v315_v0 }
  0x2e PF: > { %s13_s12 = sadd.s32 1, %s431_s12  }
  0x2f   : > { %p10_p4 = scmp.ge.s32.totalorder %s13_s12, 4  }
  0x31   :  { %12 = sbr.rel (!%p10_p4) target bundleno = 1 (0x1), region = 62 }

// kernel: conv_block_forward.4
= control target key start
LH: loop header
LB: loop body
LE: loop exit
PB: predicated region body
PF: predicated region fallthrough
CT: control target
= control target key end

     0   :  { %s6600_s23 = smov 0   ;;  %s6602_s24 = smov 0   ;;  %s7792_s0 = inlined_call_operand.vmem [shape: bf16[2,16,16,128], index: 0, kind: input, shape index: {}, may-alias: {0,1,2}]   ;;  %s7793_s1 = inlined_call_operand.vmem [shape: bf16[2,16,16,128], index: 1, kind: input, shape index: {}, may-alias: {0,1,2}]   ;;  %s7794_s2 = inlined_call_operand.vmem [shape: bf16[2,16,16,128], index: 2, kind: input, shape index: {}, may-alias: {0,1,2}]   ;;  %s7795_s3 = inlined_call_operand.vmem [shape: f32[1,128], index: 3, kind: input, shape index: {}]   ;;  %s7796_s4 = inlined_call_operand.vmem [shape: f32[1,128], index: 4, kind: input, shape index: {}]   ;;  %s7797_s5 = inlined_call_operand.vmem [shape: bf16[9,128,128], index: 5, kind: input, shape index: {}]   ;;  %s7798_s6 = inlined_call_operand.vmem [shape: f32[2,16,16,128], index: 6, kind: output, shape index: {0}]   ;;  %s7799_s7 = inlined_call_operand.vmem [shape: f32[2,2,128], index: 7, kind: output, shape index: {1}]  }
   0x1   :  { %s6604_s2 = smov 0  }
   0x2 LB: > { %s30_s25 = sadd.s32 1, %s6551_s24  ;;  %p5162_p0 = scmp.ge.s32.totalorder %s6555_s2, 1  ;;  %s6555_s2 = sphi %s6604_s2, %s18_s2   ;;  %s6551_s24 = sphi %s6602_s24, %s7854_s24   ;;  %s6547_s23 = sphi %s6600_s23, %s7853_s23  }
   0x3   : > { %p32_p1 = scmp.ge.s32.totalorder %s30_s25, 2  ;;  %p328_p2 = scmp.lt.s32.totalorder %s6555_s2, 3 }
   0x5   : > { %s7856_s25 = smov (%p32_p1, %s30_s25), 0  ;;  %p329_p3 = pnand %p5162_p0, %p328_p2 }
   0x7   : > { %332 = sbr.rel (%p329_p3) target bundleno = 613 (0x265), region = 44 }
   0xe   : > { %v6447_v0 = vld [vmem:[%s7797_s5 + $0x40] sm:$0xff]   ;;  %v6557_v2 = vmov 0.0|0.0   ;;  %p419_p4 = scmp.lt.s32.totalorder %s6547_s23, 1  ;;  %v6449_v3 = vld [vmem:[%s7797_s5 + $0x48] sm:$0xff]   ;;  %v6558_v5 = vmov 0   ;;  %v6451_v6 = vld [vmem:[%s7797_s5 + $0x50] sm:$0xff]   ;;  %v738_v7 = vlaneseq }
   0xf   : > { %v6448_v1 = vld [vmem:[%s7797_s5 + $0x100] sm:$0xff]   ;;  %498 = vst [vmem:[#allocation2 + $0x8] sm:$0xff] %v6557_v2  ;;  %5732 = vmatprep.mubr.bf16.mxu1 %v6557_v2  ;;  %5716 = vmatprep.subr.bf16.mxu1 %v6447_v0  ;;  %v6450_v4 = vld [vmem:[%s7797_s5 + $0x108] sm:$0xff]   ;;  %466 = vst [vmem:[#allocation2] sm:$0xff] %v6558_v5  ;;  %vm6559_vm3 = vmmov 0  }
  0x10   : > { %5908 = vmatprep.subr.bf16.mxu0 %v6448_v1  ;;  %5717 = vmatpush3.bf16.msra.mxu1 %v6447_v0  ;;  %737 = vst [vmem:[#allocation2 + $0x98] sm:$0xff] %v6558_v5  ;;  %v6452_v8 = vld [vmem:[%s7797_s5 + $0x110] sm:$0xff]   ;;  %s7858_s23 = smov (!%p419_p4, %s6547_s23), 1  ;;  %v6453_v9 = vld [vmem:[%s7797_s5 + $0x58] sm:$0xff]   ;;  %v6649_v10 = vshrl.u32 %v738_v7, 7  ;;  %v6455_v13 = vld [vmem:[%s7797_s5 + $0x60] sm:$0xff]  }
  0x11   : > { %5909 = vmatpush3.bf16.msra.mxu0 %v6448_v1  ;;  %5718 = vmatprep.subr.bf16.mxu1 %v6449_v3  ;;  %v6454_v11 = vld [vmem:[%s7797_s5 + $0x118] sm:$0xff]   ;;  %s5417_s19 = sshll.u32 %s7858_s23, 7  ;;  %v6456_v15 = vld [vmem:[%s7797_s5 + $0x120] sm:$0xff]   ;;  %v6457_v17 = vld [vmem:[%s7797_s5 + $0x68] sm:$0xff]   ;;  %vm1642_vm8 = vsmask.f32 256 }
  0x12   : > { %5910 = vmatprep.subr.bf16.mxu0 %v6450_v4  ;;  %v740_v12 = vadd.s32 8, %v6649_v10  ;;  %v742_v14 = vadd.s32 24, %v6649_v10  ;;  %s6666_s28 = scalar_lea.vmem %s7793_s1, %s5417_s19  ;;  %v744_v16 = vadd.s32 40, %v6649_v10  ;;  %v6458_v18 = vld [vmem:[%s7797_s5 + $0x128] sm:$0xff]   ;;  %v6679_v20 = vld [vmem:[%s7795_s3] ss:$0 sm:$0xff]  ;;  %vm6763_vm4 = vmpackc.low %vm6559_vm3, %vm6559_vm3 }
  0x13   : > { %v5422_v19 = vld [vmem:[%s6666_s28] sm:$0xff]   ;;  %v5485_v26 = vld [vmem:[%s6666_s28 + $0x8] sm:$0xff]   ;;  %v6459_v32 = vld [vmem:[%s7797_s5 + $0x70] sm:$0xff]   ;;  %v6694_v34 = vadd.s32 56, %v6649_v10  ;;  %v6726_v57 = vadd.s32 72, %v6649_v10  ;;  %s5420_s10 = sshll.u32 %s7858_s23, 8 }
  0x14   : > { %5719 = vmatpush3.bf16.msra.mxu1 %v6449_v3  ;;  %v786_v21 = vand.u32 15, %v740_v12  ;;  %v800_v22 = vand.u32 15, %v742_v14  ;;  %v5423_v23 = vunpack.c.l.bf16 %v5422_v19  ;;  %v5424_v24 = vunpack.c.h.bf16 %v5422_v19  ;;  %v6684_v25 = vld [vmem:[%s7796_s4] ss:$0 sm:$0xff]  ;;  %v5486_v33 = vld [vmem:[%s6666_s28 + $0x10] sm:$0xff]   ;;  %v5487_v40 = vld [vmem:[%s6666_s28 + $0x18] sm:$0xff]   ;;  %s7740_s13 = scalar_lea.vmem %s7798_s6, %s5420_s10 }
  0x15   : > { %5911 = vmatpush3.bf16.msra.mxu0 %v6450_v4  ;;  %5720 = vmatprep.subr.bf16.mxu1 %v6451_v6  ;;  %v814_v27 = vand.u32 15, %v744_v16  ;;  %v5427_v30 = vunpack.c.l.bf16 %v5485_v26  ;;  %v5428_v31 = vunpack.c.h.bf16 %v5485_v26  ;;  %v6460_v35 = vld [vmem:[%s7797_s5 + $0x130] sm:$0xff]   ;;  %v5431_v42 = vunpack.c.l.bf16 %v5486_v33  ;;  %v6461_v52 = vld [vmem:[%s7797_s5 + $0x78] sm:$0xff]   ;;  %v5488_v56 = vld [vmem:[%s6666_s28 + $0x20] sm:$0xff]   ;;  %s5171_s14 = sshll.u32 %s7858_s23, 1 }
  0x16   : > { %5912 = vmatprep.subr.bf16.mxu0 %v6452_v8  ;;  %v570_v28 = vmul.f32 %v5423_v23, %v6679_v20  ;;  %v571_v29 = vmul.f32 %v5424_v24, %v6679_v20  ;;  %vm6704_vm0 = vcmp.eq.s32.totalorder %v786_v21, 15  ;;  %v5432_v43 = vunpack.c.h.bf16 %v5486_v33  ;;  %v6462_v58 = vld [vmem:[%s7797_s5 + $0x138] sm:$0xff]   ;;  %v5489_v63 = vld [vmem:[%s6666_s28 + $0x28] sm:$0xff]   ;;  %v6463_v4 = vld [vmem:[%s7797_s5] sm:$0xff]   ;;  %s461_s17 = scalar_lea.vmem %s7799_s7, %s5171_s14 }
  0x17   : > { %v572_v38 = vmul.f32 %v5427_v30, %v6679_v20  ;;  %v573_v39 = vmul.f32 %v5428_v31, %v6679_v20  ;;  %v5435_v44 = vunpack.c.l.bf16 %v5487_v40  ;;  %v5436_v45 = vunpack.c.h.bf16 %v5487_v40  ;;  %v6464_v16 = vld [vmem:[%s7797_s5 + $0x140] sm:$0xff]   ;;  %v6465_v33 = vld [vmem:[%s7797_s5 + $0x148] sm:$0xff]   ;;  %vm1955_vm5 = vmpackc.low %vm6704_vm0, %vm6704_vm0 }
  0x18   : > { %5721 = vmatpush3.bf16.msra.mxu1 %v6451_v6  ;;  %v609_v36 = vadd.f32 %v6684_v25, %v570_v28  ;;  %v610_v37 = vadd.f32 %v6684_v25, %v571_v29  ;;  %vm6708_vm1 = vcmp.eq.s32.totalorder %v800_v22, 15  ;;  %vm6714_vm2 = vcmp.eq.s32.totalorder %v814_v27, 15  ;;  %v5491_v22 = vld [vmem:[%s6666_s28 + $0x38] sm:$0xff]   ;;  %v6467_v41 = vld [vmem:[%s7797_s5 + $0x150] sm:$0xff]  }
  0x19   : > { %5913 = vmatpush3.bf16.msra.mxu0 %v6452_v8  ;;  %5722 = vmatprep.subr.bf16.mxu1 %v6453_v9  ;;  %v611_v49 = vadd.f32 %v6684_v25, %v572_v38  ;;  %v612_v50 = vadd.f32 %v6684_v25, %v573_v39  ;;  %v574_v53 = vmul.f32 %v5431_v42, %v6679_v20  ;;  %v5439_v3 = vunpack.c.l.bf16 %v5488_v56  ;;  %v6466_v39 = vld [vmem:[%s7797_s5 + $0x8] sm:$0xff]   ;;  %vm1957_vm6 = vmpackc.low %vm6708_vm1, %vm6708_vm1 }
  0x1a   : > { %5914 = vmatprep.subr.bf16.mxu0 %v6454_v11  ;;  %v641_v47 = vmax.f32 %v609_v36, 0.0  ;;  %v642_v48 = vmax.f32 %v610_v37, 0.0  ;;  %v575_v54 = vmul.f32 %v5432_v43, %v6679_v20  ;;  %v576_v55 = vmul.f32 %v5435_v44, %v6679_v20  ;;  %vm1959_vm7 = vmpackc.low %vm6714_vm2, %vm6714_vm2 }
  0x1b   : > { %v643_v60 = vmax.f32 %v611_v49, 0.0  ;;  %v644_v61 = vmax.f32 %v612_v50, 0.0  ;;  %v577_v62 = vmul.f32 %v5436_v45, %v6679_v20  ;;  %v613_v0 = vadd.f32 %v6684_v25, %v574_v53 }
  0x1c   : > { %5723 = vmatpush3.bf16.msra.mxu1 %v6453_v9  ;;  %v6731_v59 = vpack.c.bf16 %v642_v48, %v641_v47  ;;  %v614_v1 = vadd.f32 %v6684_v25, %v575_v54  ;;  %v615_v2 = vadd.f32 %v6684_v25, %v576_v55  ;;  %v5440_v8 = vunpack.c.h.bf16 %v5488_v56 }
  0x1d   : > { %5915 = vmatpush3.bf16.msra.mxu0 %v6454_v11  ;;  %5724 = vmatprep.subr.bf16.mxu1 %v6455_v13  ;;  %v6743_v6 = vpack.c.bf16 %v644_v61, %v643_v60  ;;  %v616_v7 = vadd.f32 %v6684_v25, %v577_v62  ;;  %v5443_v9 = vunpack.c.l.bf16 %v5489_v63  ;;  %v645_v11 = vmax.f32 %v613_v0, 0.0  ;;  %v5492_v62 = vld [vmem:[%s6666_s28 + $0x40] sm:$0xff]  }
  0x1e   : > { %5916 = vmatprep.subr.bf16.mxu0 %v6456_v15  ;;  %689 = vst [vmem:[#allocation2 + $0x10] sm:$0xff] %v6731_v59  ;;  %5924 = vmatprep.mubr.bf16.mxu0 %v6731_v59  ;;  %v646_v12 = vmax.f32 %v614_v1, 0.0  ;;  %v578_v14 = vmul.f32 %v5439_v3, %v6679_v20  ;;  %v5444_v19 = vunpack.c.h.bf16 %v5489_v63  ;;  %v5451_v38 = vunpack.c.l.bf16 %v5491_v22 }
  0x1f   : > { %690 = vst [vmem:[#allocation2 + $0x18] sm:$0xff] %v6743_v6  ;;  %v580_v21 = vmul.f32 %v5443_v9, %v6679_v20  ;;  %v5452_v44 = vunpack.c.h.bf16 %v5491_v22  ;;  %v6791_v49 = vsel %vm6763_vm4, 65537, %v6558_v5  ;;  %v1991_v55 = vsel %vm1955_vm5, 65537, %v6558_v5 }
  0x20   : > { %5725 = vmatpush3.bf16.msra.mxu1 %v6455_v13  ;;  %v647_v13 = vmax.f32 %v615_v2, 0.0  ;;  %v6755_v23 = vpack.c.bf16 %v646_v12, %v645_v11  ;;  %v617_v24 = vadd.f32 %v6684_v25, %v578_v14  ;;  %v581_v30 = vmul.f32 %v5444_v19, %v6679_v20 }
  0x21   : > { %5917 = vmatpush3.bf16.msra.mxu0 %v6456_v15  ;;  %5726 = vmatprep.subr.bf16.mxu1 %v6457_v17  ;;  %v5490_v15 = vld [vmem:[%s6666_s28 + $0x30] sm:$0xff]   ;;  %v619_v31 = vadd.f32 %v6684_v25, %v580_v21  ;;  %v584_v48 = vmul.f32 %v5451_v38, %v6679_v20  ;;  %v585_v54 = vmul.f32 %v5452_v44, %v6679_v20  ;;  %v1993_v61 = vsel %vm1957_vm6, 65537, %v6558_v5  ;;  %v6470_v38 = vld [vmem:[%s7797_s5 + $0x160] sm:$0xff]  }
  0x22   : > { %5918 = vmatprep.subr.bf16.mxu0 %v6458_v18  ;;  %v5447_v26 = vunpack.c.l.bf16 %v5490_v15  ;;  %v5448_v27 = vunpack.c.h.bf16 %v5490_v15  ;;  %691 = vst [vmem:[#allocation2 + $0x20] sm:$0xff] %v6755_v23  ;;  %v620_v42 = vadd.f32 %v6684_v25, %v581_v30  ;;  %v1995_v46 = vsel %vm1959_vm7, 65537, %v6558_v5 }
  0x23   : > { %v651_v43 = vmax.f32 %v619_v31, 0.0  ;;  %v623_v60 = vadd.f32 %v6684_v25, %v584_v48  ;;  %v624_v0 = vadd.f32 %v6684_v25, %v585_v54  ;;  %v6835_v1 = vcombine.low %v6791_v49, %v1991_v55  ;;  %v6471_v54 = vld [vmem:[%s7797_s5 + $0x168] sm:$0xff]  }
  0x24   : > { %5727 = vmatpush3.bf16.msra.mxu1 %v6457_v17  ;;  %v648_v17 = vmax.f32 %v616_v7, 0.0  ;;  %v582_v36 = vmul.f32 %v5447_v26, %v6679_v20  ;;  %v583_v37 = vmul.f32 %v5448_v27, %v6679_v20  ;;  %v652_v53 = vmax.f32 %v620_v42, 0.0 }
  0x25   : > { %5919 = vmatpush3.bf16.msra.mxu0 %v6458_v18  ;;  %5728 = vmatprep.subr.bf16.mxu1 %v6459_v32  ;;  %v579_v18 = vmul.f32 %v5440_v8, %v6679_v20  ;;  %v655_v3 = vmax.f32 %v623_v60, 0.0  ;;  %v5198_v7 = vcombine.low %v6791_v49, %v1995_v46  ;;  %v5493_v8 = vld [vmem:[%s6666_s28 + $0x48] sm:$0xff]   ;;  %v656_v9 = vmax.f32 %v624_v0, 0.0 }
  0x26   : > { %5920 = vmatprep.subr.bf16.mxu0 %v6460_v35  ;;  %v6758_v28 = vpack.c.bf16 %v648_v17, %v647_v13  ;;  %v621_v45 = vadd.f32 %v6684_v25, %v582_v36  ;;  %v622_v47 = vadd.f32 %v6684_v25, %v583_v37  ;;  %v6825_v63 = vpack.c.bf16 %v652_v53, %v651_v43  ;;  %v6468_v17 = vld [vmem:[%s7797_s5 + $0x158] sm:$0xff]  }
  0x27   : > { %v618_v29 = vadd.f32 %v6684_v25, %v579_v18  ;;  %v2081_v51 = vshrl.u32 %v6835_v1, 16  ;;  %v5455_v11 = vunpack.c.l.bf16 %v5492_v62  ;;  %v5456_v12 = vunpack.c.h.bf16 %v5492_v62  ;;  %v6477_v62 = vld [vmem:[%s7797_s5 + $0x28] sm:$0xff]  }
  0x28   : > { %5729 = vmatpush3.bf16.msra.mxu1 %v6459_v32  ;;  %692 = vst [vmem:[#allocation2 + $0x28] sm:$0xff] %v6758_v28  ;;  %v653_v56 = vmax.f32 %v621_v45, 0.0  ;;  %694 = vst [vmem:[#allocation2 + $0x38] sm:$0xff] %v6825_v63  ;;  %v2096_v15 = vshrl.u32 %v5198_v7, 16  ;;  %v6849_v18 = vpack.c.bf16 %v656_v9, %v655_v3  ;;  %v5459_v30 = vunpack.c.l.bf16 %v5493_v8  ;;  %v6475_v45 = vld [vmem:[%s7797_s5 + $0x20] sm:$0xff]  }
  0x29   : > { %5921 = vmatpush3.bf16.msra.mxu0 %v6460_v35  ;;  %5730 = vmatprep.subr.bf16.mxu1 %v6461_v52  ;;  %v649_v35 = vmax.f32 %v617_v24, 0.0  ;;  %v650_v40 = vmax.f32 %v618_v29, 0.0  ;;  %v6851_v19 = vrot.slane %v2081_v51, 7  ;;  %v586_v21 = vmul.f32 %v5455_v11, %v6679_v20  ;;  %v6472_v24 = vld [vmem:[%s7797_s5 + $0x18] sm:$0xff]  }
  0x2a   : > { %5922 = vmatprep.subr.bf16.mxu0 %v6462_v58  ;;  %v587_v22 = vmul.f32 %v5456_v12, %v6679_v20  ;;  %v6859_v27 = vrot.slane %v2096_v15, 7  ;;  %v828_v29 = vand.u32 15, %v6694_v34  ;;  %696 = vst [vmem:[#allocation2 + $0x48] sm:$0xff] %v6849_v18  ;;  %vm1460_vm9 = vsmask.f32 7424  ;;  %v6473_v12 = vld [vmem:[%s7797_s5 + $0x170] sm:$0xff]  }
  0x2b   : > { %v6797_v50 = vpack.c.bf16 %v650_v40, %v649_v35  ;;  %v625_v31 = vadd.f32 %v6684_v25, %v586_v21  ;;  %v842_v35 = vand.u32 15, %v6726_v57  ;;  %v588_v37 = vmul.f32 %v5459_v30, %v6679_v20 }
  0x2c   : > { %5731 = vmatpush3.bf16.msra.mxu1 %v6461_v52  ;;  %v6802_v52 = vld [vmem:[%s7797_s5 + $0x10] sm:$0xff]   ;;  %v626_v32 = vadd.f32 %v6684_v25, %v587_v22  ;;  %vm1853_vm10 = vcmp.eq.s32.totalorder %v828_v29, 15 }
  0x2d   : > { %5923 = vmatpush3.bf16.msra.mxu0 %v6462_v58  ;;  %5764 = vmatprep.subr.bf16.mxu1 %v6463_v4  ;;  %v654_v58 = vmax.f32 %v622_v47, 0.0  ;;  %693 = vst [vmem:[#allocation2 + $0x30] sm:$0xff] %v6797_v50  ;;  %vm1961_vm11 = vmpackc.low %vm1853_vm10, %vm1853_vm10  ;;  %vm6876_vm12 = vcmp.eq.s32.totalorder %v842_v35, 15  ;;  %v627_v48 = vadd.f32 %v6684_v25, %v588_v37 }
  0x2e   : > { %5956 = vmatprep.subr.bf16.mxu0 %v6464_v16  ;;  %v658_v40 = vmax.f32 %v626_v32, 0.0  ;;  %v1997_v47 = vsel %vm1961_vm11, 65537, %v6558_v5  ;;  %vm1963_vm15 = vmpackc.low %vm6876_vm12, %vm6876_vm12 }
  0x2f   : > { %5733 = vmatmul.mubr.bf16.vlgmr.msra.gmra.mrb[0].mxu1 %v6731_v59  ;;  %v6837_v2 = vpack.c.bf16 %v654_v58, %v653_v56  ;;  %v5199_v53 = vcombine.low %v6791_v49, %v1997_v47  ;;  %v659_v60 = vmax.f32 %v627_v48, 0.0 }
  0x30   : > { %5925 = vmatmul.mubr.bf16.vlgmr.msra.gmra.mrb[0].mxu0 %v6743_v6  ;;  %5765 = vmatpush3.bf16.msra.mxu1 %v6463_v4  ;;  %v5197_v4 = vcombine.low %v6791_v49, %v1993_v61  ;;  %v5494_v61 = vld [vmem:[%s6666_s28 + $0x50] sm:$0xff]  }
  0x31   : > { %5957 = vmatpush3.bf16.msra.mxu0 %v6464_v16  ;;  %5736 = vmatprep.mubr.bf16.mxu1 %v6743_v6  ;;  %695 = vst [vmem:[#allocation2 + $0x40] sm:$0xff] %v6837_v2  ;;  %v2099_v16 = vshll.u32 %v5198_v7, 16  ;;  %v1999_v7 = vsel %vm1963_vm15, 65537, %v6558_v5  ;;  %v5463_v11 = vunpack.c.l.bf16 %v5494_v61  ;;  %v5464_v15 = vunpack.c.h.bf16 %v5494_v61 }
  0x32   : > { %5958 = vmatprep.subr.bf16.mxu0 %v6465_v33  ;;  %5928 = vmatprep.mubr.bf16.mxu0 %v6755_v23  ;;  %v2088_v13 = vshrl.u32 %v5197_v4, 16  ;;  %v2091_v14 = vshll.u32 %v5197_v4, 16  ;;  %v5200_v51 = vcombine.low %v6791_v49, %v1999_v7 }
  0x33   : > { %5766 = vmatprep.subr.bf16.mxu1 %v6466_v39  ;;  %v2101_v34 = vor.u32 %v2099_v16, %v6859_v27  ;;  %v750_v16 = vadd.s32 88, %v6649_v10  ;;  %v590_v30 = vmul.f32 %v5463_v11, %v6679_v20 }
  0x34   : > { %5767 = vmatpush3.bf16.msra.mxu1 %v6466_v39  ;;  %v2090_v26 = vrot.slane %v2088_v13, 7  ;;  %v657_v39 = vmax.f32 %v625_v31, 0.0  ;;  %v591_v31 = vmul.f32 %v5464_v15, %v6679_v20  ;;  %v752_v15 = vadd.s32 104, %v6649_v10 }
  0x35   : > { %5959 = vmatpush3.bf16.msra.mxu0 %v6465_v33  ;;  %5768 = vmatprep.subr.bf16.mxu1 %v6802_v52  ;;  %v5460_v33 = vunpack.c.h.bf16 %v5493_v8  ;;  %v856_v32 = vand.u32 15, %v750_v16 }
  0x36   : > { %5960 = vmatprep.subr.bf16.mxu0 %v6467_v41  ;;  %v2093_v36 = vor.u32 %v2091_v14, %v2090_v26  ;;  %v2102_v44 = vsel %vm1642_vm8, %v2090_v26, %v2101_v34  ;;  %v2115_v26 = vshll.u32 %v5200_v51, 16 }
  0x37   : > { %5737 = vmatmul.mubr.bf16.gmra.mrb[4].mxu1 %v6755_v23  ;;  %v589_v57 = vmul.f32 %v5460_v33, %v6679_v20  ;;  %vm2225_vm14 = vcmp.ne.s16.totalorder %v2102_v44, 0  ;;  %v6479_v33 = vld [vmem:[%s7797_s5 + $0x30] sm:$0xff]   ;;  %vm1857_vm0 = vcmp.eq.s32.totalorder %v856_v32, 15 }
  0x38   : > { %5929 = vmatmul.mubr.bf16.gmra.mrb[4].mxu0 %v6758_v28  ;;  %5740 = vmatprep.mubr.bf16.mxu1 %v6758_v28  ;;  %v2094_v43 = vsel %vm1642_vm8, %v6851_v19, %v2093_v36  ;;  %v2244_v56 = vsel %vm2225_vm14, 0, %v6743_v6  ;;  %v2107_v6 = vshll.u32 %v5199_v53, 16  ;;  %vm1965_vm2 = vmpackc.low %vm1857_vm0, %vm1857_vm0 }
  0x39   : > { %5961 = vmatpush3.bf16.msra.mxu0 %v6467_v41  ;;  %5932 = vmatprep.mubr.bf16.mxu0 %v6797_v50  ;;  %vm2224_vm13 = vcmp.ne.s16.totalorder %v2094_v43, 0  ;;  %v628_v58 = vadd.f32 %v6684_v25, %v589_v57  ;;  %v2277_v46 = vshll.u32 %v2244_v56, 16  ;;  %v2281_v3 = vshrl.u32 %v2244_v56, 16 }
  0x3a   : > { %5962 = vmatprep.subr.bf16.mxu0 %v6468_v17  ;;  %5769 = vmatpush3.bf16.msra.mxu1 %v6802_v52  ;;  %v6888_v52 = vpack.c.bf16 %v658_v40, %v657_v39  ;;  %v2243_v55 = vsel %vm2224_vm13, 0, %v6731_v59  ;;  %v2104_v59 = vshrl.u32 %v5199_v53, 16  ;;  %v629_v40 = vadd.f32 %v6684_v25, %v590_v30 }
  0x3b   : > { %5770 = vmatprep.subr.bf16.mxu1 %v6472_v24  ;;  %v2269_v41 = vshll.u32 %v2243_v55, 16  ;;  %v2273_v0 = vshrl.u32 %v2243_v55, 16  ;;  %v660_v4 = vmax.f32 %v628_v58, 0.0  ;;  %v2279_v9 = vrot.slane %v2277_v46, 1  ;;  %v6476_v55 = vld [vmem:[%s7797_s5 + $0x180] sm:$0xff]  }
  0x3c   : > { %697 = vst [vmem:[#allocation2 + $0x50] sm:$0xff] %v6888_v52  ;;  %v2106_v13 = vrot.slane %v2104_v59, 7  ;;  %v630_v57 = vadd.f32 %v6684_v25, %v591_v31  ;;  %v661_v47 = vmax.f32 %v629_v40, 0.0  ;;  %v2001_v53 = vsel %vm1965_vm2, 65537, %v6558_v5  ;;  %v6988_v31 = vld [vmem:[%s7797_s5 + $0x80] sm:$0xff]  }
  0x3d   : > { %5963 = vmatpush3.bf16.msra.mxu0 %v6468_v17  ;;  %v6914_v8 = vrot.slane %v2269_v41, 1  ;;  %v6921_v14 = vpack.c.bf16 %v660_v4, %v659_v60  ;;  %v5495_v17 = vld [vmem:[%s6666_s28 + $0x58] sm:$0xff]   ;;  %v6926_v22 = vor.u32 %v2281_v3, %v2279_v9  ;;  %v5496_v60 = vld [vmem:[%s6666_s28 + $0x60] sm:$0xff]  }
  0x3e   : > { %5964 = vmatprep.subr.bf16.mxu0 %v6470_v38  ;;  %5771 = vmatpush3.bf16.msra.mxu1 %v6472_v24  ;;  %v2112_v24 = vshrl.u32 %v5200_v51, 16  ;;  %v2109_v29 = vor.u32 %v2107_v6, %v2106_v13  ;;  %v5467_v34 = vunpack.c.l.bf16 %v5495_v17  ;;  %v5468_v37 = vunpack.c.h.bf16 %v5495_v17 }
  0x3f   : > { %5741 = vmatmul.mubr.bf16.gmra.mrb[8].mxu1 %v6797_v50  ;;  %5772 = vmatprep.subr.bf16.mxu1 %v6475_v45  ;;  %v2275_v21 = vor.u32 %v2273_v0, %v6914_v8  ;;  %698 = vst [vmem:[#allocation2 + $0x58] sm:$0xff] %v6921_v14  ;;  %v662_v48 = vmax.f32 %v630_v57, 0.0  ;;  %v5497_v0 = vld [vmem:[%s6666_s28 + $0x68] sm:$0xff]   ;;  %v5471_v17 = vunpack.c.l.bf16 %v5496_v60 }
  0x40   : > { %5933 = vmatmul.mubr.bf16.gmra.mrb[8].mxu0 %v6825_v63  ;;  %5744 = vmatprep.mubr.bf16.mxu1 %v6825_v63  ;;  %v6937_v36 = vrot.slane %v2112_v24, 7  ;;  %v2110_v39 = vsel %vm1642_vm8, %v6859_v27, %v2109_v29  ;;  %v592_v43 = vmul.f32 %v5467_v34, %v6679_v20  ;;  %v593_v44 = vmul.f32 %v5468_v37, %v6679_v20  ;;  %v6481_v27 = vld [vmem:[%s7797_s5 + $0x38] sm:$0xff]  }
  0x41   : > { %5965 = vmatpush3.bf16.msra.mxu0 %v6470_v38  ;;  %5936 = vmatprep.mubr.bf16.mxu0 %v6837_v2  ;;  %v6935_v35 = vsel %vm1460_vm9, %v2275_v21, %v2279_v9  ;;  %v6474_v38 = vld [vmem:[%s7797_s5 + $0x178] sm:$0xff]   ;;  %vm2226_vm1 = vcmp.ne.s16.totalorder %v2110_v39, 0  ;;  %v6964_v61 = vpack.c.bf16 %v662_v48, %v661_v47  ;;  %v5472_v21 = vunpack.c.h.bf16 %v5496_v60 }
  0x42   : > { %5966 = vmatprep.subr.bf16.mxu0 %v6471_v54  ;;  %5773 = vmatpush3.bf16.msra.mxu1 %v6475_v45  ;;  %v2117_v42 = vor.u32 %v2115_v26, %v6937_v36  ;;  %v2245_v45 = vsel %vm2226_vm1, 0, %v6755_v23  ;;  %v5201_v23 = vcombine.low %v6791_v49, %v2001_v53  ;;  %v632_v41 = vadd.f32 %v6684_v25, %v593_v44  ;;  %v6478_v26 = vld [vmem:[%s7797_s5 + $0x188] sm:$0xff]  }
  0x43   : > { %5774 = vmatprep.subr.bf16.mxu1 %v6477_v62  ;;  %v2289_v58 = vshrl.u32 %v2245_v45, 16  ;;  %699 = vst [vmem:[#allocation2 + $0x60] sm:$0xff] %v6964_v61  ;;  %v754_v29 = vadd.s32 120, %v6649_v10  ;;  %v5475_v30 = vunpack.c.l.bf16 %v5497_v0  ;;  %v594_v34 = vmul.f32 %v5471_v17, %v6679_v20 }
  0x44   : > { %v2118_v56 = vsel %vm1642_vm8, %v2106_v13, %v2117_v42  ;;  %v2120_v59 = vshrl.u32 %v5201_v23, 16  ;;  %v2123_v6 = vshll.u32 %v5201_v23, 16  ;;  %v664_v51 = vmax.f32 %v632_v41, 0.0 }
  0x45   : > { %5967 = vmatpush3.bf16.msra.mxu0 %v6471_v54  ;;  %v2285_v54 = vshll.u32 %v2245_v45, 16  ;;  %vm2227_vm3 = vcmp.ne.s16.totalorder %v2118_v56, 0  ;;  %v595_v37 = vmul.f32 %v5472_v21, %v6679_v20  ;;  %v884_v39 = vand.u32 15, %v754_v29 }
  0x46   : > { %5968 = vmatprep.subr.bf16.mxu0 %v6473_v12  ;;  %5775 = vmatpush3.bf16.msra.mxu1 %v6477_v62  ;;  %v631_v62 = vadd.f32 %v6684_v25, %v592_v43  ;;  %v2246_v3 = vsel %vm2227_vm3, 0, %v6758_v28  ;;  %v6975_v13 = vrot.slane %v2120_v59, 7  ;;  %v5476_v40 = vunpack.c.h.bf16 %v5497_v0  ;;  %v5498_v0 = vld [vmem:[%s6666_s28 + $0x70] sm:$0xff]  }
  0x47   : > { %5745 = vmatmul.mubr.bf16.gmra.mrb[12].mxu1 %v6837_v2  ;;  %5776 = vmatprep.subr.bf16.mxu1 %v6479_v33  ;;  %v2287_v46 = vrot.slane %v2285_v54, 1  ;;  %v2293_v4 = vshll.u32 %v2246_v3, 16  ;;  %v2297_v7 = vshrl.u32 %v2246_v3, 16  ;;  %v633_v57 = vadd.f32 %v6684_v25, %v594_v34  ;;  %v6484_v34 = vld [vmem:[%s7797_s5 + $0x1a0] sm:$0xff]  }
  0x48   : > { %5937 = vmatmul.mubr.bf16.gmra.mrb[12].mxu0 %v6849_v18  ;;  %5748 = vmatprep.mubr.bf16.mxu1 %v6849_v18  ;;  %v663_v9 = vmax.f32 %v631_v62, 0.0  ;;  %v2125_v24 = vor.u32 %v2123_v6, %v6975_v13  ;;  %v634_v42 = vadd.f32 %v6684_v25, %v595_v37  ;;  %v596_v43 = vmul.f32 %v5475_v30, %v6679_v20 }
  0x49   : > { %5969 = vmatpush3.bf16.msra.mxu0 %v6473_v12  ;;  %5972 = vmatprep.mubr.bf16.mxu0 %v6935_v35  ;;  %v6973_v11 = vsel %vm1460_vm9, %v6926_v22, %v2287_v46  ;;  %v2291_v12 = vor.u32 %v2289_v58, %v2287_v46  ;;  %v2295_v28 = vrot.slane %v2293_v4, 1  ;;  %v870_v22 = vand.u32 15, %v752_v15 }
  0x4a   : > { %5970 = vmatprep.subr.bf16.mxu0 %v6474_v38  ;;  %5777 = vmatpush3.bf16.msra.mxu1 %v6479_v33  ;;  %v6978_v16 = vpack.c.bf16 %v664_v51, %v663_v9  ;;  %vm1861_vm7 = vcmp.eq.s32.totalorder %v884_v39, 15  ;;  %v597_v45 = vmul.f32 %v5476_v40, %v6679_v20  ;;  %v665_v54 = vmax.f32 %v633_v57, 0.0  ;;  %v7047_v57 = vld [vmem:[#allocation2] sm:$0xff] }
  0x4b   : > { %5778 = vmatprep.subr.bf16.mxu1 %v6481_v27  ;;  %v6992_v32 = vsel %vm1460_vm9, %v2291_v12, %v2295_v28  ;;  %v2299_v33 = vor.u32 %v2297_v7, %v2295_v28  ;;  %vm1859_vm4 = vcmp.eq.s32.totalorder %v870_v22, 15  ;;  %vm1969_vm10 = vmpackc.low %vm1861_vm7, %vm1861_vm7  ;;  %v635_v56 = vadd.f32 %v6684_v25, %v596_v43 }
  0x4c   : > { %700 = vst [vmem:[#allocation2 + $0x68] sm:$0xff] %v6978_v16  ;;  %vm1967_vm6 = vmpackc.low %vm1859_vm4, %vm1859_vm4  ;;  %v636_v58 = vadd.f32 %v6684_v25, %v597_v45  ;;  %v756_v6 = vadd.s32 136, %v6649_v10  ;;  %v5479_v17 = vunpack.c.l.bf16 %v5498_v0  ;;  %v758_v22 = vadd.s32 152, %v6649_v10 }
  0x4d   : > { %5971 = vmatpush3.bf16.msra.mxu0 %v6474_v38  ;;  %v2126_v38 = vsel %vm1642_vm8, %v6937_v36, %v2125_v24  ;;  %v6480_v36 = vld [vmem:[%s7797_s5 + $0x190] sm:$0xff]   ;;  %v667_v3 = vmax.f32 %v635_v56, 0.0  ;;  %v741_v30 = vadd.s32 16, %v6649_v10 }
  0x4e   : > { %6004 = vmatprep.subr.bf16.mxu0 %v6476_v55  ;;  %5779 = vmatpush3.bf16.msra.mxu1 %v6481_v27  ;;  %vm2228_vm5 = vcmp.ne.s16.totalorder %v2126_v38, 0  ;;  %v2003_v27 = vsel %vm1967_vm6, 65537, %v6558_v5  ;;  %v668_v59 = vmax.f32 %v636_v58, 0.0  ;;  %v898_v28 = vand.u32 15, %v756_v6 }
  0x4f   : > { %5749 = vmatmul.mubr.bf16.gmra.mrb[16].mxu1 %v6888_v52  ;;  %v2247_v44 = vsel %vm2228_vm5, 0, %v6797_v50  ;;  %5812 = vmatprep.subr.bf16.mxu1 %v6988_v31  ;;  %v5202_v48 = vcombine.low %v6791_v49, %v2003_v27  ;;  %v666_v50 = vmax.f32 %v634_v42, 0.0  ;;  %v598_v29 = vmul.f32 %v5479_v17, %v6679_v20 }
  0x50   : > { %5973 = vmatmul.mubr.bf16.vlgmr.msra.gmra.mrb[0].mxu0 %v6973_v11  ;;  %5752 = vmatprep.mubr.bf16.mxu1 %v6921_v14  ;;  %v2301_v47 = vshll.u32 %v2247_v44, 16  ;;  %v2305_v53 = vshrl.u32 %v2247_v44, 16  ;;  %v7031_v15 = vpack.c.bf16 %v668_v59, %v667_v3  ;;  %vm1863_vm11 = vcmp.eq.s32.totalorder %v898_v28, 15 }
  0x51   : > { %6005 = vmatpush3.bf16.msra.mxu0 %v6476_v55  ;;  %5976 = vmatprep.mubr.bf16.mxu0 %v6992_v32  ;;  %v2005_v55 = vsel %vm1969_vm10, 65537, %v6558_v5  ;;  %v2128_v60 = vshrl.u32 %v5202_v48, 16  ;;  %v2131_v62 = vshll.u32 %v5202_v48, 16  ;;  %v7018_v46 = vpack.c.bf16 %v666_v50, %v665_v54  ;;  %v6482_v5 = vld [vmem:[%s7797_s5 + $0x198] sm:$0xff]   ;;  %vm1971_vm12 = vmpackc.low %vm1863_vm11, %vm1863_vm11 }
  0x52   : > { %6006 = vmatprep.subr.bf16.mxu0 %v6478_v26  ;;  %v2303_v23 = vrot.slane %v2301_v47, 1  ;;  %v5203_v41 = vcombine.low %v6791_v49, %v2005_v55  ;;  %702 = vst [vmem:[#allocation2 + $0x78] sm:$0xff] %v7031_v15  ;;  %v912_v40 = vand.u32 15, %v758_v22  ;;  %v2007_v42 = vsel %vm1971_vm12, 65537, %v7047_v57 }
  0x53   : > { %v2130_v7 = vrot.slane %v2128_v60, 7  ;;  %701 = vst [vmem:[#allocation2 + $0x70] sm:$0xff] %v7018_v46  ;;  %v637_v43 = vadd.f32 %v6684_v25, %v598_v29  ;;  %v793_v44 = vand.u32 15, %v741_v30 }
  0x54   : > { %v7026_v4 = vsel %vm1460_vm9, %v2299_v33, %v2303_v23  ;;  %v2307_v9 = vor.u32 %v2305_v53, %v2303_v23  ;;  %v2136_v51 = vshrl.u32 %v5203_v41, 16  ;;  %v2139_v12 = vshll.u32 %v5203_v41, 16 }
  0x55   : > { %6007 = vmatpush3.bf16.msra.mxu0 %v6478_v26  ;;  %v2133_v21 = vor.u32 %v2131_v62, %v2130_v7  ;;  %v5480_v26 = vunpack.c.h.bf16 %v5498_v0  ;;  %v779_v33 = vand.u32 15, %v6649_v10  ;;  %v669_v53 = vmax.f32 %v637_v43, 0.0 }
  0x56   : > { %6008 = vmatprep.subr.bf16.mxu0 %v6480_v36  ;;  %v7033_v24 = vrot.slane %v2136_v51, 7  ;;  %vm1865_vm15 = vcmp.eq.s32.totalorder %v912_v40, 15  ;;  %vm7067_vm2 = vcmp.eq.s32.totalorder %v793_v44, 0  ;;  %v760_v51 = vadd.s32 168, %v6649_v10 }
  0x57   : > { %5753 = vmatmul.mubr.bf16.gmra.mrb[20].mxu1 %v6964_v61  ;;  %v2134_v37 = vsel %vm1642_vm8, %v6975_v13, %v2133_v21  ;;  %v599_v39 = vmul.f32 %v5480_v26, %v6679_v20  ;;  %v5204_v13 = vcombine.low %v6791_v49, %v2007_v42  ;;  %v6486_v20 = vld [vmem:[%s7797_s5 + $0x1a8] sm:$0xff]   ;;  %vm1973_vm0 = vmpackc.low %vm1865_vm15, %vm1865_vm15  ;;  %vm7063_vm1 = vcmp.eq.s32.totalorder %v779_v33, 0  ;;  %v6490_v33 = vld [vmem:[%s7797_s5 + $0x1b8] sm:$0xff]  }
  0x58   : > { %5977 = vmatmul.mubr.bf16.gmra.mrb[4].mxu0 %v7026_v4  ;;  %5756 = vmatprep.mubr.bf16.mxu1 %v6978_v16  ;;  %v2141_v38 = vor.u32 %v2139_v12, %v7033_v24  ;;  %vm2229_vm13 = vcmp.ne.s16.totalorder %v2134_v37, 0  ;;  %v2009_v6 = vsel %vm1973_vm0, 65537, %v7047_v57  ;;  %vm1334_vm3 = vmpackc.low %vm7063_vm1, %vm7063_vm1 }
  0x59   : > { %6009 = vmatpush3.bf16.msra.mxu0 %v6480_v36  ;;  %v2248_v27 = vsel %vm2229_vm13, 0, %v6825_v63  ;;  %v638_v45 = vadd.f32 %v6684_v25, %v599_v39  ;;  %v2144_v54 = vshrl.u32 %v5204_v13, 16  ;;  %v2147_v50 = vshll.u32 %v5204_v13, 16  ;;  %vm1336_vm4 = vmpackc.low %vm7067_vm2, %vm7067_vm2 }
  0x5a   : > { %6010 = vmatprep.subr.bf16.mxu0 %v6482_v5  ;;  %v2142_v36 = vsel %vm1642_vm8, %v2130_v7, %v2141_v38  ;;  %v2309_v47 = vshll.u32 %v2248_v27, 16  ;;  %v2313_v48 = vshrl.u32 %v2248_v27, 16  ;;  %v5205_v7 = vcombine.low %v6791_v49, %v2009_v6 }
  0x5b   : > { %vm2230_vm14 = vcmp.ne.s16.totalorder %v2142_v36, 0  ;;  %v670_v55 = vmax.f32 %v638_v45, 0.0  ;;  %v2146_v23 = vrot.slane %v2144_v54, 7  ;;  %v1372_v17 = vsel %vm1336_vm4, 65537, %v7047_v57 }
  0x5c   : > { %v2249_v63 = vsel %vm2230_vm14, 0, %v6837_v2  ;;  %v2311_v56 = vrot.slane %v2309_v47, 1  ;;  %v6488_v2 = vld [vmem:[%s7797_s5 + $0x1b0] sm:$0xff]   ;;  %v2152_v22 = vshrl.u32 %v5205_v7, 16  ;;  %v2155_v29 = vshll.u32 %v5205_v7, 16 }
  0x5d   : > { %6011 = vmatpush3.bf16.msra.mxu0 %v6482_v5  ;;  %v2317_v58 = vshll.u32 %v2249_v63, 16  ;;  %v2321_v25 = vshrl.u32 %v2249_v63, 16  ;;  %v7061_v60 = vpack.c.bf16 %v670_v55, %v669_v53  ;;  %v2149_v5 = vor.u32 %v2147_v50, %v2146_v23 }
  0x5e   : > { %6012 = vmatprep.subr.bf16.mxu0 %v6484_v34  ;;  %v7075_v0 = vsel %vm1460_vm9, %v2307_v9, %v2311_v56  ;;  %v2315_v3 = vor.u32 %v2313_v48, %v2311_v56  ;;  %v1370_v9 = vsel %vm1334_vm3, 65537, %v7047_v57  ;;  %v5179_v30 = vcombine.low %v1372_v17, %v6791_v49  ;;  %v7113_v56 = vld [vmem:[%s7797_s5 + $0x1c0] sm:$0xff]  }
  0x5f   : > { %5757 = vmatmul.mubr.bf16.gmra.mrb[24].mxu1 %v7018_v46  ;;  %v2319_v59 = vrot.slane %v2317_v58, 1  ;;  %5980 = vmatprep.mubr.bf16.mxu0 %v7075_v0  ;;  %703 = vst [vmem:[#allocation2 + $0x80] sm:$0xff] %v7061_v60  ;;  %v5178_v21 = vcombine.low %v1370_v9, %v6791_v49  ;;  %v2150_v26 = vsel %vm1642_vm8, %v7033_v24, %v2149_v5  ;;  %v926_v39 = vand.u32 15, %v760_v51 }
  0x60   : > { %5760 = vmatprep.mubr.bf16.mxu1 %v7031_v15  ;;  %vm2231_vm5 = vcmp.ne.s16.totalorder %v2150_v26, 0  ;;  %v2154_v42 = vrot.slane %v2152_v22, 7  ;;  %v1469_v24 = vshll.u32 %v5179_v30, 16  ;;  %v1473_v43 = vshrl.u32 %v5179_v30, 16 }
  0x61   : > { %6013 = vmatpush3.bf16.msra.mxu0 %v6484_v34  ;;  %v7090_v12 = vsel %vm1460_vm9, %v2315_v3, %v2319_v59  ;;  %v2323_v28 = vor.u32 %v2321_v25, %v2319_v59  ;;  %v1207_v34 = vld [vmem:[#allocation2] sm:$0x80]  ;;  %v1462_v37 = vshll.u32 %v5178_v21, 16  ;;  %v1465_v38 = vshrl.u32 %v5178_v21, 16  ;;  %v7121_v59 = vld [vmem:[#allocation2 + $0x8] sm:$0xff] }
  0x62   : > { %6014 = vmatprep.subr.bf16.mxu0 %v6486_v20  ;;  %5981 = vmatmul.mubr.bf16.gmra.mrb[8].mxu0 %v7090_v12  ;;  %v2250_v40 = vsel %vm2231_vm5, 0, %v6849_v18  ;;  %vm1867_vm6 = vcmp.eq.s32.totalorder %v926_v39, 15  ;;  %v2157_v13 = vor.u32 %v2155_v29, %v2154_v42  ;;  %v1471_v45 = vrot.slane %v1469_v24, 1 }
  0x63   : > { %v2325_v44 = vshll.u32 %v2250_v40, 16  ;;  %v2329_v27 = vshrl.u32 %v2250_v40, 16  ;;  %v1464_v36 = vrot.slane %v1462_v37, 1  ;;  %vm1975_vm7 = vmpackc.low %vm1867_vm6, %vm1867_vm6  ;;  %v743_v47 = vadd.s32 32, %v6649_v10 }
  0x64   : > { %v762_v48 = vadd.s32 184, %v6649_v10  ;;  %v2011_v18 = vsel %vm1975_vm7, 65537, %v7047_v57  ;;  %v2158_v63 = vsel %vm1642_vm8, %v2146_v23, %v2157_v13  ;;  %v7107_v54 = vor.u32 %v1473_v43, %v1471_v45 }
  0x65   : > { %6015 = vmatpush3.bf16.msra.mxu0 %v6486_v20  ;;  %v2327_v20 = vrot.slane %v2325_v44, 1  ;;  %v1467_v53 = vor.u32 %v1465_v38, %v1464_v36  ;;  %vm1604_vm10 = vcmp.ne.s16.totalorder %v1464_v36, 0  ;;  %v5206_v55 = vcombine.low %v6791_v49, %v2011_v18 }
  0x66   : > { %6016 = vmatprep.subr.bf16.mxu0 %v6488_v2  ;;  %v1623_v50 = vsel %vm1604_vm10, 0, %v1207_v34  ;;  %vm2232_vm11 = vcmp.ne.s16.totalorder %v2158_v63, 0  ;;  %v940_v26 = vand.u32 15, %v762_v48  ;;  %v745_v22 = vadd.s32 48, %v6649_v10 }
  0x67   : > { %5761 = vmatmul.mubr.bf16.gmra.mrb[28].mxu1 %v7061_v60  ;;  %v7116_v58 = vsel %vm1460_vm9, %v2323_v28, %v2327_v20  ;;  %v2331_v25 = vor.u32 %v2329_v27, %v2327_v20  ;;  %v1472_v62 = vsel %vm1460_vm9, %v1467_v53, %v1471_v45  ;;  %v2251_v23 = vsel %vm2232_vm11, 0, %v6888_v52 }
  0x68   : > { %5984 = vmatprep.mubr.bf16.mxu0 %v7116_v58  ;;  %vm1605_vm12 = vcmp.ne.s16.totalorder %v1472_v62, 0  ;;  %v1644_v41 = vshrl.u32 %v1623_v50, 16  ;;  %v2333_v3 = vshll.u32 %v2251_v23, 16  ;;  %v2163_v5 = vshll.u32 %v5206_v55, 16 }
  0x69   : > { %6017 = vmatpush3.bf16.msra.mxu0 %v6488_v2  ;;  %v2160_v2 = vshrl.u32 %v5206_v55, 16  ;;  %v1624_v6 = vsel %vm1605_vm12, 0, %v7121_v59  ;;  %v2337_v7 = vshrl.u32 %v2251_v23, 16  ;;  %v807_v52 = vand.u32 15, %v743_v47 }
  0x6a   : > { %6018 = vmatprep.subr.bf16.mxu0 %v6490_v33  ;;  %v1646_v9 = vrot.slane %v1644_v41, 7  ;;  %v1648_v51 = vshrl.u32 %v1624_v6, 16  ;;  %v1651_v28 = vshll.u32 %v1624_v6, 16  ;;  %v2335_v21 = vrot.slane %v2333_v3, 1 }
  0x6b   : > { %v7124_v17 = vrot.slane %v2160_v2, 7  ;;  %v764_v34 = vadd.s32 200, %v6649_v10  ;;  %vm1230_vm13 = vcmp.eq.s32.totalorder %v807_v52, 0  ;;  %vm7136_vm14 = vcmp.eq.s32.totalorder %v940_v26, 15 }
  0x6c   : > { %v7128_v29 = vrot.slane %v1648_v51, 7  ;;  %v7134_v37 = vsel %vm1460_vm9, %v2331_v25, %v2335_v21  ;;  %v2339_v38 = vor.u32 %v2337_v7, %v2335_v21  ;;  %vm1338_vm15 = vmpackc.low %vm1230_vm13, %vm1230_vm13  ;;  %v821_v43 = vand.u32 15, %v745_v22  ;;  %v1209_v7 = vld [vmem:[#allocation2 + $0x10] sm:$0xff] }
  0x6d   : > { %6019 = vmatpush3.bf16.msra.mxu0 %v6490_v33  ;;  %v2165_v30 = vor.u32 %v2163_v5, %v7124_v17  ;;  %v747_v33 = vadd.s32 64, %v6649_v10  ;;  %v954_v44 = vand.u32 15, %v764_v34  ;;  %v1374_v27 = vsel %vm1338_vm15, 65537, %v7047_v57  ;;  %vm1977_vm1 = vmpackc.low %vm7136_vm14, %vm7136_vm14 }
  0x6e   : > { %6052 = vmatprep.subr.bf16.mxu0 %v7113_v56  ;;  %5985 = vmatmul.mubr.bf16.gmra.mrb[12].mxu0 %v7134_v37  ;;  %v1653_v40 = vor.u32 %v1651_v28, %v7128_v29  ;;  %v7148_v13 = vadd.s32 216, %v6649_v10  ;;  %v2013_v48 = vsel %vm1977_vm1, 65537, %v7047_v57  ;;  %vm1232_vm2 = vcmp.eq.s32.totalorder %v821_v43, 0 }
  0x6f   : > { %v2166_v24 = vsel %vm1642_vm8, %v2154_v42, %v2165_v30  ;;  %v835_v36 = vand.u32 15, %v747_v33  ;;  %v5180_v42 = vcombine.low %v1374_v27, %v6791_v49  ;;  %v5207_v53 = vcombine.low %v6791_v49, %v2013_v48  ;;  %vm1340_vm3 = vmpackc.low %vm1232_vm2, %vm1232_vm2 }
  0x70   : > { %vm2233_vm0 = vcmp.ne.s16.totalorder %v2166_v24, 0  ;;  %v1654_v45 = vsel %vm1642_vm8, %v1646_v9, %v1653_v40  ;;  %vm1871_vm4 = vcmp.eq.s32.totalorder %v954_v44, 15  ;;  %v1376_v23 = vsel %vm1340_vm3, 65537, %v7047_v57 }
  0x71   : > { %v2252_v47 = vsel %vm2233_vm0, 0, %v6921_v14  ;;  %5780 = vmatprep.mubr.bf16.mxu1 %v1654_v45  ;;  %v1477_v63 = vshll.u32 %v5180_v42, 16  ;;  %v1481_v50 = vshrl.u32 %v5180_v42, 16  ;;  %vm7155_vm5 = vcmp.eq.s32.totalorder %v835_v36, 0  ;;  %vm1979_vm6 = vmpackc.low %vm1871_vm4, %vm1871_vm4 }
  0x72   : > { %v2341_v20 = vshll.u32 %v2252_v47, 16  ;;  %v2345_v18 = vshrl.u32 %v2252_v47, 16  ;;  %v2168_v14 = vshrl.u32 %v5207_v53, 16  ;;  %v2171_v62 = vshll.u32 %v5207_v53, 16  ;;  %vm1342_vm7 = vmpackc.low %vm7155_vm5, %vm7155_vm5 }
  0x73   : > { %v1479_v41 = vrot.slane %v1477_v63, 1  ;;  %v5181_v2 = vcombine.low %v1376_v23, %v6791_v49  ;;  %v2015_v3 = vsel %vm1979_vm6, 65537, %v7047_v57  ;;  %v968_v6 = vand.u32 15, %v7148_v13 }
  0x74   : > { %v2343_v25 = vrot.slane %v2341_v20, 1  ;;  %v2170_v9 = vrot.slane %v2168_v14, 7  ;;  %v5208_v28 = vcombine.low %v6791_v49, %v2015_v3  ;;  %v1378_v22 = vsel %vm1342_vm7, 65537, %v7047_v57 }
  0x75   : > { %v1480_v21 = vsel %vm1460_vm9, %v7107_v54, %v1479_v41  ;;  %v1483_v52 = vor.u32 %v1481_v50, %v1479_v41  ;;  %v1485_v26 = vshll.u32 %v5181_v2, 16  ;;  %v7175_v40 = vcombine.low %v1378_v22, %v6791_v49  ;;  %v1210_v54 = vld [vmem:[#allocation2 + $0x18] sm:$0xff] }
  0x76   : > { %v7167_v5 = vsel %vm1460_vm9, %v2339_v38, %v2343_v25  ;;  %v2347_v51 = vor.u32 %v2345_v18, %v2343_v25  ;;  %vm1606_vm10 = vcmp.ne.s16.totalorder %v1480_v21, 0  ;;  %v2173_v30 = vor.u32 %v2171_v62, %v2170_v9  ;;  %v1211_v62 = vld [vmem:[#allocation2 + $0x20] sm:$0xff] }
  0x77   : > { %5988 = vmatprep.mubr.bf16.mxu0 %v7167_v5  ;;  %v2176_v34 = vshrl.u32 %v5208_v28, 16  ;;  %v2179_v33 = vshll.u32 %v5208_v28, 16  ;;  %v1625_v38 = vsel %vm1606_vm10, 0, %v1209_v7  ;;  %v1487_v39 = vrot.slane %v1485_v26, 1 }
  0x78   : > { %v1489_v24 = vshrl.u32 %v5181_v2, 16  ;;  %v1656_v43 = vshrl.u32 %v1625_v38, 16  ;;  %v1659_v44 = vshll.u32 %v1625_v38, 16  ;;  %v2174_v27 = vsel %vm1642_vm8, %v7124_v17, %v2173_v30  ;;  %v6487_v38 = vld [vmem:[%s7797_s5 + $0x90] sm:$0xff]  }
  0x79   : > { %v7179_v36 = vrot.slane %v2176_v34, 7  ;;  %vm2234_vm11 = vcmp.ne.s16.totalorder %v2174_v27, 0  ;;  %v1488_v13 = vsel %vm1460_vm9, %v1483_v52, %v1487_v39  ;;  %v1493_v47 = vshll.u32 %v7175_v40, 16 }
  0x7a   : > { %v1491_v45 = vor.u32 %v1489_v24, %v1487_v39  ;;  %v1658_v42 = vrot.slane %v1656_v43, 7  ;;  %v2253_v48 = vsel %vm2234_vm11, 0, %v6964_v61  ;;  %vm1607_vm12 = vcmp.ne.s16.totalorder %v1488_v13, 0  ;;  %v6485_v61 = vld [vmem:[%s7797_s5 + $0x88] sm:$0xff]  }
  0x7b   : > { %v2181_v20 = vor.u32 %v2179_v33, %v7179_v36  ;;  %v2349_v53 = vshll.u32 %v2253_v48, 16  ;;  %v1626_v18 = vsel %vm1607_vm12, 0, %v1210_v54  ;;  %v2353_v63 = vshrl.u32 %v2253_v48, 16 }
  0x7c   : > { %v1495_v50 = vrot.slane %v1493_v47, 1  ;;  %v1661_v17 = vor.u32 %v1659_v44, %v1658_v42  ;;  %v1664_v55 = vshrl.u32 %v1626_v18, 16  ;;  %v1667_v25 = vshll.u32 %v1626_v18, 16 }
  0x7d   : > { %v2182_v14 = vsel %vm1642_vm8, %v2170_v9, %v2181_v20  ;;  %v2351_v23 = vrot.slane %v2349_v53, 1  ;;  %vm7190_vm14 = vcmp.eq.s32.totalorder %v968_v6, 15  ;;  %v1497_v24 = vshrl.u32 %v7175_v40, 16 }
  0x7e   : > { %vm2235_vm13 = vcmp.ne.s16.totalorder %v2182_v14, 0  ;;  %v1496_v41 = vsel %vm1460_vm9, %v1491_v45, %v1495_v50  ;;  %v7196_v3 = vsel %vm1642_vm8, %v7128_v29, %v1661_v17  ;;  %v1666_v7 = vrot.slane %v1664_v55, 7  ;;  %vm1981_vm0 = vmpackc.low %vm7190_vm14, %vm7190_vm14  ;;  %v7228_v45 = vld [vmem:[%s6666_s28 + $0x78] sm:$0xff]  }
  0x7f   : > { %v2254_v9 = vsel %vm2235_vm13, 0, %v6978_v16  ;;  %vm1608_vm15 = vcmp.ne.s16.totalorder %v1496_v41, 0  ;;  %5781 = vmatmul.mubr.bf16.vlgmr.msra.gmra.mrb[0].mxu1 %v7196_v3  ;;  %v7204_v28 = vsel %vm1460_vm9, %v2347_v51, %v2351_v23  ;;  %v2355_v6 = vor.u32 %v2353_v63, %v2351_v23  ;;  %v6489_v17 = vld [vmem:[%s7797_s5 + $0x98] sm:$0xff]  }
  0x80   : > { %v2357_v21 = vshll.u32 %v2254_v9, 16  ;;  %v1627_v52 = vsel %vm1608_vm15, 0, %v1211_v62  ;;  %5989 = vmatmul.mubr.bf16.gmra.mrb[16].mxu0 %v7204_v28  ;;  %5813 = vmatpush3.bf16.msra.mxu1 %v6988_v31  ;;  %v1669_v29 = vor.u32 %v1667_v25, %v1666_v7  ;;  %v2017_v22 = vsel %vm1981_vm0, 65537, %v7047_v57 }
  0x81   : > { %v1672_v26 = vshrl.u32 %v1627_v52, 16  ;;  %v1675_v16 = vshll.u32 %v1627_v52, 16  ;;  %5814 = vmatprep.subr.bf16.mxu1 %v6485_v61  ;;  %v5209_v34 = vcombine.low %v6791_v49, %v2017_v22  ;;  %v2361_v33 = vshrl.u32 %v2254_v9, 16 }
  0x82   : > { %v2359_v30 = vrot.slane %v2357_v21, 1  ;;  %v749_v51 = vadd.s32 80, %v6649_v10  ;;  %v7215_v39 = vsel %vm1642_vm8, %v1658_v42, %v1669_v29  ;;  %v768_v43 = vadd.s32 232, %v6649_v10 }
  0x83   : > { %v7217_v31 = vrot.slane %v1672_v26, 7  ;;  %5784 = vmatprep.mubr.bf16.mxu1 %v7215_v39  ;;  %v2184_v27 = vshrl.u32 %v5209_v34, 16  ;;  %v2187_v54 = vshll.u32 %v5209_v34, 16  ;;  %v1499_v40 = vor.u32 %v1497_v24, %v1495_v50  ;;  %v6491_v26 = vld [vmem:[%s7797_s5 + $0xa0] sm:$0xff]  }
  0x84   : > { %v7223_v44 = vsel %vm1460_vm9, %v2355_v6, %v2359_v30  ;;  %v7225_v13 = vor.u32 %v2361_v33, %v2359_v30  ;;  %5815 = vmatpush3.bf16.msra.mxu1 %v6485_v61  ;;  %v849_v42 = vand.u32 15, %v749_v51  ;;  %v982_v48 = vand.u32 15, %v768_v43 }
  0x85   : > { %5992 = vmatprep.mubr.bf16.mxu0 %v7223_v44  ;;  %v1677_v47 = vor.u32 %v1675_v16, %v7217_v31  ;;  %v7232_v20 = vrot.slane %v2184_v27, 7  ;;  %v751_v53 = vadd.s32 96, %v6649_v10  ;;  %5816 = vmatprep.subr.bf16.mxu1 %v6487_v38  ;;  %v770_v18 = vadd.s32 248, %v6649_v10 }
  0x86   : > { %v753_v63 = vadd.s32 112, %v6649_v10  ;;  %vm1236_vm1 = vcmp.eq.s32.totalorder %v849_v42, 0  ;;  %vm7243_vm2 = vcmp.eq.s32.totalorder %v982_v48, 15  ;;  %v5483_v25 = vunpack.c.l.bf16 %v7228_v45  ;;  %v6493_v48 = vld [vmem:[%s7797_s5 + $0xa8] sm:$0xff]  }
  0x87   : > { %v7241_v55 = vsel %vm1642_vm8, %v1666_v7, %v1677_v47  ;;  %v2189_v14 = vor.u32 %v2187_v54, %v7232_v20  ;;  %vm1344_vm3 = vmpackc.low %vm1236_vm1, %vm1236_vm1  ;;  %v863_v62 = vand.u32 15, %v751_v53  ;;  %v996_v23 = vand.u32 15, %v770_v18  ;;  %v7258_v7 = vld [vmem:[%s7795_s3] ss:$0 sm:$0xff]  ;;  %v7296_v18 = vld [vmem:[#allocation2 + $0x28] sm:$0xff] }
  0x88   : > { %5785 = vmatmul.mubr.bf16.gmra.mrb[4].mxu1 %v7241_v55  ;;  %v877_v41 = vand.u32 15, %v753_v63  ;;  %v1380_v61 = vsel %vm1344_vm3, 65537, %v7047_v57  ;;  %vm1983_vm4 = vmpackc.low %vm7243_vm2, %vm7243_vm2  ;;  %v5484_v2 = vunpack.c.h.bf16 %v7228_v45  ;;  %v7261_v9 = vmul.f32 %v7258_v7, %v5483_v25 }
  0x89   : > { %5817 = vmatpush3.bf16.msra.mxu1 %v6487_v38  ;;  %v7264_v6 = vadd.s32 264, %v6649_v10  ;;  %v2190_v21 = vsel %vm1642_vm8, %v7179_v36, %v2189_v14  ;;  %v5183_v52 = vcombine.low %v1380_v61, %v6791_v49  ;;  %v2019_v29 = vsel %vm1983_vm4, 65537, %v7047_v57 }
  0x8a   : > { %vm1238_vm5 = vcmp.eq.s32.totalorder %v863_v62, 0  ;;  %5818 = vmatprep.subr.bf16.mxu1 %v6489_v17  ;;  %vm2236_vm6 = vcmp.ne.s16.totalorder %v2190_v21, 0  ;;  %v5210_v16 = vcombine.low %v6791_v49, %v2019_v29  ;;  %vm7274_vm10 = vcmp.eq.s32.totalorder %v996_v23, 15 }
  0x8b   : > { %vm1346_vm7 = vmpackc.low %vm1238_vm5, %vm1238_vm5  ;;  %vm7278_vm11 = vcmp.eq.s32.totalorder %v877_v41, 0  ;;  %v2255_v30 = vsel %vm2236_vm6, 0, %v7018_v46  ;;  %v1501_v34 = vshll.u32 %v5183_v52, 16  ;;  %v1505_v51 = vshrl.u32 %v5183_v52, 16 }
  0x8c   : > { %v1382_v33 = vsel %vm1346_vm7, 65537, %v7047_v57  ;;  %vm1985_vm12 = vmpackc.low %vm7274_vm10, %vm7274_vm10  ;;  %v2365_v38 = vshll.u32 %v2255_v30, 16  ;;  %v2192_v24 = vshrl.u32 %v5210_v16, 16  ;;  %v2195_v43 = vshll.u32 %v5210_v16, 16 }
  0x8d   : > { %v2369_v27 = vshrl.u32 %v2255_v30, 16  ;;  %vm1348_vm13 = vmpackc.low %vm7278_vm11, %vm7278_vm11  ;;  %5819 = vmatpush3.bf16.msra.mxu1 %v6489_v17  ;;  %v1503_v54 = vrot.slane %v1501_v34, 1  ;;  %v5184_v46 = vcombine.low %v1382_v33, %v6791_v49  ;;  %v2021_v47 = vsel %vm1985_vm12, 65537, %v7047_v57  ;;  %v7314_v34 = vld [vmem:[#allocation2 + $0x30] sm:$0xff] }
  0x8e   : > { %v1384_v42 = vsel %vm1348_vm13, 65537, %v7047_v57  ;;  %5820 = vmatprep.subr.bf16.mxu1 %v6491_v26  ;;  %v2367_v53 = vrot.slane %v2365_v38, 1  ;;  %v2194_v63 = vrot.slane %v2192_v24, 7  ;;  %v5211_v50 = vcombine.low %v6791_v49, %v2021_v47 }
  0x8f   : > { %v7300_v17 = vcombine.low %v1384_v42, %v6791_v49  ;;  %v1504_v25 = vsel %vm1460_vm9, %v1499_v40, %v1503_v54  ;;  %v1507_v14 = vor.u32 %v1505_v51, %v1503_v54  ;;  %v1509_v62 = vshll.u32 %v5184_v46, 16  ;;  %v6495_v40 = vld [vmem:[%s7797_s5 + $0xb0] sm:$0xff]   ;;  %v7323_v42 = vld [vmem:[#allocation2 + $0x38] sm:$0xff] }
  0x90   : > { %v1513_v23 = vshrl.u32 %v5184_v46, 16  ;;  %v7305_v41 = vsel %vm1460_vm9, %v7225_v13, %v2367_v53  ;;  %vm1609_vm14 = vcmp.ne.s16.totalorder %v1504_v25, 0  ;;  %v2197_v61 = vor.u32 %v2195_v43, %v2194_v63 }
  0x91   : > { %v2371_v21 = vor.u32 %v2369_v27, %v2367_v53  ;;  %5821 = vmatpush3.bf16.msra.mxu1 %v6491_v26  ;;  %5993 = vmatmul.mubr.bf16.gmra.mrb[20].mxu0 %v7305_v41  ;;  %v1628_v52 = vsel %vm1609_vm14, 0, %v7296_v18  ;;  %v1511_v29 = vrot.slane %v1509_v62, 1  ;;  %v2200_v16 = vshrl.u32 %v5211_v50, 16  ;;  %v6497_v53 = vld [vmem:[%s7797_s5 + $0xb8] sm:$0xff]  }
  0x92   : > { %v2203_v22 = vshll.u32 %v5211_v50, 16  ;;  %5822 = vmatprep.subr.bf16.mxu1 %v6493_v48  ;;  %v1680_v36 = vshrl.u32 %v1628_v52, 16  ;;  %v1683_v30 = vshll.u32 %v1628_v52, 16  ;;  %v2198_v13 = vsel %vm1642_vm8, %v7232_v20, %v2197_v61 }
  0x93   : > { %v1517_v26 = vshll.u32 %v7300_v17, 16  ;;  %vm2237_vm15 = vcmp.ne.s16.totalorder %v2198_v13, 0  ;;  %v1512_v33 = vsel %vm1460_vm9, %v1507_v14, %v1511_v29  ;;  %v7318_v51 = vrot.slane %v2200_v16, 7 }
  0x94   : > { %v1515_v38 = vor.u32 %v1513_v23, %v1511_v29  ;;  %v1682_v24 = vrot.slane %v1680_v36, 7  ;;  %v2256_v43 = vsel %vm2237_vm15, 0, %v7031_v15  ;;  %vm1610_vm0 = vcmp.ne.s16.totalorder %v1512_v33, 0 }
  0x95   : > { %v1519_v27 = vrot.slane %v1517_v26, 1  ;;  %5823 = vmatpush3.bf16.msra.mxu1 %v6493_v48  ;;  %v2373_v54 = vshll.u32 %v2256_v43, 16  ;;  %v1629_v46 = vsel %vm1610_vm0, 0, %v7314_v34  ;;  %v2205_v20 = vor.u32 %v2203_v22, %v7318_v51 }
  0x96   : > { %v2377_v47 = vshrl.u32 %v2256_v43, 16  ;;  %5824 = vmatprep.subr.bf16.mxu1 %v6495_v40  ;;  %v1685_v50 = vor.u32 %v1683_v30, %v1682_v24  ;;  %v1688_v25 = vshrl.u32 %v1629_v46, 16  ;;  %v1691_v14 = vshll.u32 %v1629_v46, 16 }
  0x97   : > { %v1520_v15 = vsel %vm1460_vm9, %v1515_v38, %v1519_v27  ;;  %v2375_v62 = vrot.slane %v2373_v54, 1  ;;  %v2206_v48 = vsel %vm1642_vm8, %v2194_v63, %v2205_v20  ;;  %v601_v23 = vmul.f32 %v7258_v7, %v5484_v2 }
  0x98   : > { %vm1611_vm1 = vcmp.ne.s16.totalorder %v1520_v15, 0  ;;  %v7335_v61 = vsel %vm1642_vm8, %v7217_v31, %v1685_v50  ;;  %v1690_v52 = vrot.slane %v1688_v25, 7  ;;  %vm2238_vm2 = vcmp.ne.s16.totalorder %v2206_v48, 0  ;;  %v7346_v31 = vld [vmem:[%s7797_s5 + $0xc0] sm:$0xff]  }
  0x99   : > { %7833 = vst [vmem:[#allocation5_spill] sm:$0xff] %v7335_v61  ;;  %v1630_v29 = vsel %vm1611_vm1, 0, %v7323_v42  ;;  %5825 = vmatpush3.bf16.msra.mxu1 %v6495_v40  ;;  %5788 = vmatprep.mubr.bf16.mxu1 %v7335_v61  ;;  %v7340_v16 = vsel %vm1460_vm9, %v2371_v21, %v2375_v62  ;;  %v2257_v63 = vsel %vm2238_vm2, 0, %v7061_v60  ;;  %v2379_v22 = vor.u32 %v2377_v47, %v2375_v62  ;;  %v6522_v21 = vld [vmem:[%s7796_s4] ss:$0 sm:$0xff] }
  0x9a   : > { %v1696_v45 = vshrl.u32 %v1630_v29, 16  ;;  %5826 = vmatprep.subr.bf16.mxu1 %v6497_v53  ;;  %5996 = vmatprep.mubr.bf16.mxu0 %v7340_v16  ;;  %v1693_v2 = vor.u32 %v1691_v14, %v1690_v52  ;;  %v2381_v7 = vshll.u32 %v2257_v63, 16  ;;  %v1699_v40 = vshll.u32 %v1630_v29, 16 }
  0x9b   : > { %v639_v36 = vadd.f32 %v6522_v21, %v7261_v9  ;;  %v640_v30 = vadd.f32 %v6522_v21, %v601_v23  ;;  %v1010_v13 = vand.u32 15, %v7264_v6  ;;  %v2385_v26 = vshrl.u32 %v2257_v63, 16 }
  0x9c   : > { %v7353_v60 = vrot.slane %v1696_v45, 7  ;;  %v7357_v33 = vsel %vm1642_vm8, %v1682_v24, %v1693_v2  ;;  %v2383_v38 = vrot.slane %v2381_v7, 1  ;;  %v755_v54 = vadd.s32 128, %v6649_v10 }
  0x9d   : > { %7834 = vst [vmem:[#allocation6_spill] sm:$0xff] %v7357_v33  ;;  %v671_v43 = vmax.f32 %v639_v36, 0.0  ;;  %5827 = vmatpush3.bf16.msra.mxu1 %v6497_v53  ;;  %v672_v20 = vmax.f32 %v640_v30, 0.0  ;;  %vm1879_vm3 = vcmp.eq.s32.totalorder %v1010_v13, 15  ;;  %v1521_v9 = vshrl.u32 %v7300_v17, 16 }
  0x9e   : > { %5789 = vmatmul.mubr.bf16.gmra.mrb[8].mxu1 %v7357_v33  ;;  %v1701_v46 = vor.u32 %v1699_v40, %v7353_v60  ;;  %5860 = vmatprep.subr.bf16.mxu1 %v7346_v31  ;;  %v7365_v6 = vsel %vm1460_vm9, %v2379_v22, %v2383_v38  ;;  %vm1987_vm4 = vmpackc.low %vm1879_vm3, %vm1879_vm3  ;;  %v7367_v24 = vor.u32 %v2385_v26, %v2383_v38  ;;  %v891_v47 = vand.u32 15, %v755_v54 }
  0x9f   : > { %v774_v50 = vadd.s32 280, %v6649_v10  ;;  %5997 = vmatmul.mubr.bf16.gmra.mrb[24].mxu0 %v7365_v6  ;;  %v7374_v25 = vpack.c.bf16 %v672_v20, %v671_v43  ;;  %v2023_v17 = vsel %vm1987_vm4, 65537, %v7047_v57  ;;  %v1523_v14 = vor.u32 %v1521_v9, %v1519_v27 }
  0xa0   : > { %v7372_v53 = vsel %vm1642_vm8, %v1690_v52, %v1701_v46  ;;  %v5212_v15 = vcombine.low %v6791_v49, %v2023_v17  ;;  %vm1242_vm5 = vcmp.eq.s32.totalorder %v891_v47, 0  ;;  %v757_v48 = vadd.s32 144, %v6649_v10 }
  0xa1   : > { %7835 = vst [vmem:[#allocation7_spill] sm:$0xff] %v7372_v53  ;;  %5792 = vmatprep.mubr.bf16.mxu1 %v7372_v53  ;;  %v1024_v62 = vand.u32 15, %v774_v50  ;;  %704 = vst [vmem:[#allocation2 + $0x88] sm:$0xff] %v7374_v25  ;;  %v759_v23 = vadd.s32 160, %v6649_v10  ;;  %v761_v52 = vadd.s32 176, %v6649_v10  ;;  %v763_v29 = vadd.s32 192, %v6649_v10 }
  0xa2   : > { %vm1350_vm6 = vmpackc.low %vm1242_vm5, %vm1242_vm5  ;;  %v765_v63 = vadd.s32 208, %v6649_v10  ;;  %v2208_v27 = vshrl.u32 %v5212_v15, 16  ;;  %v2211_v22 = vshll.u32 %v5212_v15, 16  ;;  %v905_v7 = vand.u32 15, %v757_v48  ;;  %v7400_v48 = vld [vmem:[#allocation2 + $0x40] sm:$0xff] }
  0xa3   : > { %v1386_v45 = vsel %vm1350_vm6, 65537, %v7047_v57  ;;  %vm1881_vm7 = vcmp.eq.s32.totalorder %v1024_v62, 15  ;;  %v919_v40 = vand.u32 15, %v759_v23  ;;  %v933_v21 = vand.u32 15, %v761_v52 }
  0xa4   : > { %v5186_v2 = vcombine.low %v1386_v45, %v6791_v49  ;;  %vm1989_vm10 = vmpackc.low %vm1881_vm7, %vm1881_vm7  ;;  %v2210_v36 = vrot.slane %v2208_v27, 7  ;;  %v947_v13 = vand.u32 15, %v763_v29  ;;  %v961_v26 = vand.u32 15, %v765_v63  ;;  %v7459_v29 = vld [vmem:[#allocation2 + $0x58] sm:$0xff] }
  0xa5   : > { %v2025_v30 = vsel %vm1989_vm10, 65537, %v7047_v57  ;;  %vm1244_vm11 = vcmp.eq.s32.totalorder %v905_v7, 0  ;;  %vm1246_vm13 = vcmp.eq.s32.totalorder %v919_v40, 0  ;;  %vm7389_vm14 = vcmp.eq.s32.totalorder %v933_v21, 0 }
  0xa6   : > { %v1525_v38 = vshll.u32 %v5186_v2, 16  ;;  %v5213_v43 = vcombine.low %v6791_v49, %v2025_v30  ;;  %v1529_v54 = vshrl.u32 %v5186_v2, 16  ;;  %v2213_v46 = vor.u32 %v2211_v22, %v2210_v36  ;;  %vm1352_vm12 = vmpackc.low %vm1244_vm11, %vm1244_vm11 }
  0xa7   : > { %vm7393_vm15 = vcmp.eq.s32.totalorder %v947_v13, 0  ;;  %v1388_v15 = vsel %vm1352_vm12, 65537, %v7047_v57  ;;  %vm1354_vm0 = vmpackc.low %vm1246_vm13, %vm1246_vm13  ;;  %vm7404_vm1 = vcmp.eq.s32.totalorder %v961_v26, 0 }
  0xa8   : > { %v1527_v47 = vrot.slane %v1525_v38, 1  ;;  %v2216_v50 = vshrl.u32 %v5213_v43, 16  ;;  %v2219_v17 = vshll.u32 %v5213_v43, 16  ;;  %v2214_v62 = vsel %vm1642_vm8, %v7318_v51, %v2213_v46  ;;  %vm1356_vm4 = vmpackc.low %vm7389_vm14, %vm7389_vm14  ;;  %v7419_v46 = vld [vmem:[#allocation2 + $0x48] sm:$0xff] }
  0xa9   : > { %v5187_v23 = vcombine.low %v1388_v15, %v6791_v49  ;;  %v1390_v52 = vsel %vm1354_vm0, 65537, %v7047_v57  ;;  %vm2239_vm2 = vcmp.ne.s16.totalorder %v2214_v62, 0  ;;  %v1392_v20 = vsel %vm1356_vm4, 65537, %v7047_v57  ;;  %vm1358_vm7 = vmpackc.low %vm7393_vm15, %vm7393_vm15 }
  0xaa   : > { %v1528_v63 = vsel %vm1460_vm9, %v1523_v14, %v1527_v47  ;;  %v7409_v27 = vrot.slane %v2216_v50, 7  ;;  %v1531_v22 = vor.u32 %v1529_v54, %v1527_v47  ;;  %v2258_v45 = vsel %vm2239_vm2, 0, %v7374_v25  ;;  %vm1360_vm11 = vmpackc.low %vm7404_vm1, %vm7404_vm1 }
  0xab   : > { %vm1612_vm3 = vcmp.ne.s16.totalorder %v1528_v63, 0  ;;  %v1533_v51 = vshll.u32 %v5187_v23, 16  ;;  %v5188_v2 = vcombine.low %v1390_v52, %v6791_v49  ;;  %v2389_v7 = vshll.u32 %v2258_v45, 16 }
  0xac   : > { %7842 = vst [vmem:[#allocation8_spill] sm:$0xff] %v7409_v27  ;;  %v1631_v40 = vsel %vm1612_vm3, 0, %v7400_v48  ;;  %v2221_v21 = vor.u32 %v2219_v17, %v7409_v27  ;;  %v2393_v30 = vshrl.u32 %v2258_v45, 16  ;;  %v1537_v38 = vshrl.u32 %v5187_v23, 16 }
  0xad   : > { %v1704_v14 = vshrl.u32 %v1631_v40, 16  ;;  %v1707_v13 = vshll.u32 %v1631_v40, 16  ;;  %v1535_v26 = vrot.slane %v1533_v51, 1  ;;  %v2391_v43 = vrot.slane %v2389_v7, 1  ;;  %v7436_v7 = vld [vmem:[#allocation2 + $0x50] sm:$0xff] }
  0xae   : > { %v2222_v54 = vsel %vm1642_vm8, %v2210_v36, %v2221_v21  ;;  %v1541_v47 = vshll.u32 %v5188_v2, 16  ;;  %v5189_v40 = vcombine.low %v1392_v20, %v6791_v49  ;;  %v1545_v21 = vshrl.u32 %v5188_v2, 16 }
  0xaf   : > { %v1706_v50 = vrot.slane %v1704_v14, 7  ;;  %vm2240_vm5 = vcmp.ne.s16.totalorder %v2222_v54, 0  ;;  %v1536_v15 = vsel %vm1460_vm9, %v1531_v22, %v1535_v26  ;;  %v1539_v62 = vor.u32 %v1537_v38, %v1535_v26 }
  0xb0   : > { %v7425_v17 = vsel %vm1460_vm9, %v7367_v24, %v2391_v43  ;;  %v7428_v52 = vsel %vm2240_vm5, 0, %v7121_v59  ;;  %v2395_v23 = vor.u32 %v2393_v30, %v2391_v43  ;;  %vm1613_vm6 = vcmp.ne.s16.totalorder %v1536_v15, 0 }
  0xb1   : > { %7843 = vst [vmem:[#allocation9_spill] sm:$0xff] %v7428_v52  ;;  %6000 = vmatprep.mubr.bf16.mxu0 %v7425_v17  ;;  %v1709_v36 = vor.u32 %v1707_v13, %v1706_v50  ;;  %v2397_v63 = vshll.u32 %v7428_v52, 16  ;;  %v1632_v22 = vsel %vm1613_vm6, 0, %v7419_v46  ;;  %v1543_v45 = vrot.slane %v1541_v47, 1 }
  0xb2   : > { %v1712_v51 = vshrl.u32 %v1632_v22, 16  ;;  %v1715_v24 = vshll.u32 %v1632_v22, 16  ;;  %v1394_v13 = vsel %vm1358_vm7, 65537, %v7047_v57  ;;  %v1549_v43 = vshll.u32 %v5189_v40, 16 }
  0xb3   : > { %v7441_v9 = vsel %vm1642_vm8, %v7353_v60, %v1709_v36  ;;  %v7443_v30 = vrot.slane %v2397_v63, 1  ;;  %v1544_v14 = vsel %vm1460_vm9, %v1539_v62, %v1543_v45  ;;  %v1547_v38 = vor.u32 %v1545_v21, %v1543_v45 }
  0xb4   : > { %5793 = vmatmul.mubr.bf16.gmra.mrb[12].mxu1 %v7441_v9  ;;  %v1714_v26 = vrot.slane %v1712_v51, 7  ;;  %vm1614_vm10 = vcmp.ne.s16.totalorder %v1544_v14, 0  ;;  %v5190_v54 = vcombine.low %v1394_v13, %v6791_v49  ;;  %v1553_v47 = vshrl.u32 %v5189_v40, 16 }
  0xb5   : > { %7844 = vst [vmem:[#allocation10_spill] sm:$0xff] %v7443_v30  ;;  %v7453_v60 = vsel %vm1460_vm9, %v2395_v23, %v7443_v30  ;;  %v1633_v2 = vsel %vm1614_vm10, 0, %v7436_v7  ;;  %v1551_v36 = vrot.slane %v1549_v43, 1  ;;  %v1396_v22 = vsel %vm1360_vm11, 65537, %v7047_v57 }
  0xb6   : > { %7845 = vst [vmem:[#allocation11_spill] sm:$0xff] %v7453_v60  ;;  %6001 = vmatmul.mubr.bf16.gmra.mrb[28].mxu0 %v7453_v60  ;;  %v1717_v20 = vor.u32 %v1715_v24, %v1714_v26  ;;  %v1720_v15 = vshrl.u32 %v1633_v2, 16  ;;  %v1723_v62 = vshll.u32 %v1633_v2, 16  ;;  %v1557_v63 = vshll.u32 %v5190_v54, 16  ;;  %v6496_v60 = vld [vmem:[%s7797_s5 + $0x1d0] sm:$0xff]  }
  0xb7   : > { %6020 = vmatprep.mubr.bf16.mxu0 %v7215_v39  ;;  %v1561_v23 = vshrl.u32 %v5190_v54, 16  ;;  %v767_v45 = vadd.s32 224, %v6649_v10  ;;  %v1552_v21 = vsel %vm1460_vm9, %v1547_v38, %v1551_v36  ;;  %v1555_v24 = vor.u32 %v1553_v47, %v1551_v36  ;;  %v7470_v54 = vld [vmem:[#allocation2 + $0x60] sm:$0xff] }
  0xb8   : > { %v7464_v51 = vsel %vm1642_vm8, %v1706_v50, %v1717_v20  ;;  %v1722_v40 = vrot.slane %v1720_v15, 7  ;;  %vm1615_vm12 = vcmp.ne.s16.totalorder %v1552_v21, 0  ;;  %v1559_v14 = vrot.slane %v1557_v63, 1 }
  0xb9   : > { %5796 = vmatprep.mubr.bf16.mxu1 %v7464_v51  ;;  %v5191_v13 = vcombine.low %v1396_v22, %v6791_v49  ;;  %v975_v43 = vand.u32 15, %v767_v45  ;;  %v1634_v57 = vsel %vm1615_vm12, 0, %v7459_v29  ;;  %v769_v30 = vadd.s32 240, %v6649_v10 }
  0xba   : > { %v1725_v2 = vor.u32 %v1723_v62, %v1722_v40  ;;  %v771_v50 = vadd.s32 256, %v6649_v10  ;;  %v1728_v20 = vshrl.u32 %v1634_v57, 16  ;;  %v1731_v15 = vshll.u32 %v1634_v57, 16  ;;  %v6494_v62 = vld [vmem:[%s7797_s5 + $0x1c8] sm:$0xff]  }
  0xbb   : > { %v1560_v38 = vsel %vm1460_vm9, %v1555_v24, %v1559_v14  ;;  %v1563_v47 = vor.u32 %v1561_v23, %v1559_v14  ;;  %v1565_v63 = vshll.u32 %v5191_v13, 16  ;;  %vm1254_vm14 = vcmp.eq.s32.totalorder %v975_v43, 0  ;;  %v7484_v14 = vld [vmem:[#allocation2] sm:$0xff] }
  0xbc   : > { %v7476_v36 = vsel %vm1642_vm8, %v1714_v26, %v1725_v2  ;;  %vm1616_vm13 = vcmp.ne.s16.totalorder %v1560_v38, 0  ;;  %v1730_v22 = vrot.slane %v1728_v20, 7  ;;  %vm1362_vm15 = vmpackc.low %vm1254_vm14, %vm1254_vm14  ;;  %v1569_v21 = vshrl.u32 %v5191_v13, 16  ;;  %v7489_v20 = vld [vmem:[#allocation2 + $0x68] sm:$0xff] }
  0xbd   : > { %5797 = vmatmul.mubr.bf16.gmra.mrb[16].mxu1 %v7476_v36  ;;  %v1635_v45 = vsel %vm1616_vm13, 0, %v7470_v54  ;;  %v989_v57 = vand.u32 15, %v769_v30  ;;  %v1567_v24 = vrot.slane %v1565_v63, 1  ;;  %v1398_v2 = vsel %vm1362_vm15, 65537, %v7484_v14 }
  0xbe   : > { %6021 = vmatmul.mubr.bf16.vlgmr.msra.gmra.mrb[0].mxu0 %v7241_v55  ;;  %v1736_v23 = vshrl.u32 %v1635_v45, 16  ;;  %v1739_v26 = vshll.u32 %v1635_v45, 16  ;;  %v1733_v43 = vor.u32 %v1731_v15, %v1730_v22  ;;  %v5192_v38 = vcombine.low %v1398_v2, %v6791_v49 }
  0xbf   : > { %6053 = vmatpush3.bf16.msra.mxu0 %v7113_v56  ;;  %6024 = vmatprep.mubr.bf16.mxu0 %v7335_v61  ;;  %vm1256_vm0 = vcmp.eq.s32.totalorder %v989_v57, 0  ;;  %v1003_v30 = vand.u32 15, %v771_v50  ;;  %v1568_v45 = vsel %vm1460_vm9, %v1563_v47, %v1567_v24  ;;  %v1571_v63 = vor.u32 %v1569_v21, %v1567_v24  ;;  %v7533_v61 = vld [vmem:[#allocation2 + $0x80] sm:$0xff] }
  0xc0   : > { %v1738_v13 = vrot.slane %v1736_v23, 7  ;;  %6054 = vmatprep.subr.bf16.mxu0 %v6494_v62  ;;  %vm1364_vm1 = vmpackc.low %vm1256_vm0, %vm1256_vm0  ;;  %v2084_v56 = vshll.u32 %v6835_v1, 16  ;;  %v7498_v15 = vsel %vm1642_vm8, %v1722_v40, %v1733_v43  ;;  %vm1617_vm2 = vcmp.ne.s16.totalorder %v1568_v45, 0  ;;  %v7507_v40 = vld [vmem:[#allocation2 + $0x70] sm:$0xff] }
  0xc1   : > { %v1573_v52 = vshll.u32 %v5192_v38, 16  ;;  %v1400_v57 = vsel %vm1364_vm1, 65537, %v7484_v14  ;;  %5800 = vmatprep.mubr.bf16.mxu1 %v7498_v15  ;;  %v1636_v47 = vsel %vm1617_vm2, 0, %v7489_v20  ;;  %v1577_v23 = vshrl.u32 %v5192_v38, 16 }
  0xc2   : > { %v1741_v50 = vor.u32 %v1739_v26, %v1738_v13  ;;  %v5193_v21 = vcombine.low %v1400_v57, %v6791_v49  ;;  %v1744_v24 = vshrl.u32 %v1636_v47, 16  ;;  %v1747_v2 = vshll.u32 %v1636_v47, 16  ;;  %v6498_v26 = vld [vmem:[%s7797_s5 + $0x1d8] sm:$0xff]  }
  0xc3   : > { %6055 = vmatpush3.bf16.msra.mxu0 %v6494_v62  ;;  %v1575_v27 = vrot.slane %v1573_v52, 1  ;;  %vm1258_vm3 = vcmp.eq.s32.totalorder %v1003_v30, 0  ;;  %v2086_v38 = vor.u32 %v2084_v56, %v6851_v19  ;;  %v7520_v56 = vld [vmem:[#allocation2 + $0x78] sm:$0xff] }
  0xc4   : > { %v7505_v1 = vsel %vm1642_vm8, %v1730_v22, %v1741_v50  ;;  %6056 = vmatprep.subr.bf16.mxu0 %v6496_v60  ;;  %v1581_v43 = vshll.u32 %v5193_v21, 16  ;;  %vm1366_vm4 = vmpackc.low %vm1258_vm3, %vm1258_vm3  ;;  %v1585_v45 = vshrl.u32 %v5193_v21, 16  ;;  %v1746_v62 = vrot.slane %v1744_v24, 7 }
  0xc5   : > { %5801 = vmatmul.mubr.bf16.gmra.mrb[20].mxu1 %v7505_v1  ;;  %v1576_v52 = vsel %vm1460_vm9, %v1571_v63, %v1575_v27  ;;  %v1579_v30 = vor.u32 %v1577_v23, %v1575_v27  ;;  %v1402_v22 = vsel %vm1366_vm4, 65537, %v7484_v14  ;;  %vm2223_vm6 = vcmp.ne.s16.totalorder %v2086_v38, 0 }
  0xc6   : > { %6025 = vmatmul.mubr.bf16.gmra.mrb[4].mxu0 %v7357_v33  ;;  %vm1618_vm5 = vcmp.ne.s16.totalorder %v1576_v52, 0  ;;  %v1583_v57 = vrot.slane %v1581_v43, 1  ;;  %v5194_v50 = vcombine.low %v1402_v22, %v6791_v49  ;;  %v1749_v47 = vor.u32 %v1747_v2, %v1746_v62  ;;  %v6500_v2 = vld [vmem:[%s7797_s5 + $0x1e0] sm:$0xff]  }
  0xc7   : > { %6028 = vmatprep.mubr.bf16.mxu0 %v7372_v53  ;;  %v1637_v19 = vsel %vm1618_vm5, 0, %v7507_v40  ;;  %6057 = vmatpush3.bf16.msra.mxu0 %v6496_v60  ;;  %v2242_v63 = vsel %vm2223_vm6, 0, %v7121_v59  ;;  %v773_v27 = vadd.s32 272, %v6649_v10 }
  0xc8   : > { %v1752_v21 = vshrl.u32 %v1637_v19, 16  ;;  %v1755_v23 = vshll.u32 %v1637_v19, 16  ;;  %v1584_v24 = vsel %vm1460_vm9, %v1579_v30, %v1583_v57  ;;  %6058 = vmatprep.subr.bf16.mxu0 %v6498_v26  ;;  %v7529_v43 = vsel %vm1642_vm8, %v1738_v13, %v1749_v47 }
  0xc9   : > { %vm1619_vm7 = vcmp.ne.s16.totalorder %v1584_v24, 0  ;;  %v1587_v60 = vor.u32 %v1585_v45, %v1583_v57  ;;  %v1589_v38 = vshll.u32 %v5194_v50, 16  ;;  %5804 = vmatprep.mubr.bf16.mxu1 %v7529_v43  ;;  %v2264_v52 = vshll.u32 %v2242_v63, 16 }
  0xca   : > { %v1754_v59 = vrot.slane %v1752_v21, 7  ;;  %v1638_v10 = vsel %vm1619_vm7, 0, %v7520_v56  ;;  %v1017_v22 = vand.u32 15, %v773_v27  ;;  %v2262_v57 = vshrl.u32 %v2242_v63, 16  ;;  %v6502_v21 = vld [vmem:[%s7797_s5 + $0x1e8] sm:$0xff]  }
  0xcb   : > { %v1760_v19 = vshrl.u32 %v1638_v10, 16  ;;  %v1763_v30 = vshll.u32 %v1638_v10, 16  ;;  %v1591_v53 = vrot.slane %v1589_v38, 1  ;;  %6059 = vmatpush3.bf16.msra.mxu0 %v6498_v26  ;;  %v2266_v47 = vrot.slane %v2264_v52, 1 }
  0xcc   : > { %v1757_v33 = vor.u32 %v1755_v23, %v1754_v59  ;;  %6060 = vmatprep.subr.bf16.mxu0 %v6500_v2  ;;  %vm1260_vm10 = vcmp.eq.s32.totalorder %v1017_v22, 0 }
  0xcd   : > { %v1762_v13 = vrot.slane %v1760_v19, 7  ;;  %v1592_v45 = vsel %vm1460_vm9, %v1587_v60, %v1591_v53  ;;  %vm1368_vm11 = vmpackc.low %vm1260_vm10, %vm1260_vm10  ;;  %v1593_v60 = vshrl.u32 %v5194_v50, 16 }
  0xce   : > { %v7540_v27 = vsel %vm1642_vm8, %v1746_v62, %v1757_v33  ;;  %6029 = vmatmul.mubr.bf16.gmra.mrb[8].mxu0 %v7441_v9  ;;  %vm1620_vm12 = vcmp.ne.s16.totalorder %v1592_v45, 0  ;;  %v1404_v26 = vsel %vm1368_vm11, 65537, %v7484_v14  ;;  %v2267_v62 = vor.u32 %v2266_v47, %v2262_v57  ;;  %v6504_v14 = vld [vmem:[%s7797_s5 + $0x1f0] sm:$0xff]  }
  0xcf   : > { %5805 = vmatmul.mubr.bf16.gmra.mrb[24].mxu1 %v7540_v27  ;;  %v1765_v23 = vor.u32 %v1763_v30, %v1762_v13  ;;  %6032 = vmatprep.mubr.bf16.mxu0 %v7464_v51  ;;  %v1639_v63 = vsel %vm1620_vm12, 0, %v7533_v61  ;;  %v5195_v24 = vcombine.low %v1404_v26, %v6791_v49  ;;  %v1595_v19 = vor.u32 %v1593_v60, %v1591_v53  ;;  %v6503_v26 = vld [vmem:[%s7797_s5 + $0xd0] sm:$0xff]  }
  0xd0   : > { %v1768_v38 = vshrl.u32 %v1639_v63, 16  ;;  %v1771_v10 = vshll.u32 %v1639_v63, 16  ;;  %6061 = vmatpush3.bf16.msra.mxu0 %v6500_v2  ;;  %v2272_v50 = vsel %vm1460_vm9, %v2267_v62, %v6914_v8  ;;  %v6506_v2 = vld [vmem:[%s7797_s5 + $0x1f8] sm:$0xff]   ;;  %v7570_v8 = vld [vmem:[%s7797_s5 + $0x200] sm:$0xff]  }
  0xd1   : > { %v7549_v33 = vsel %vm1642_vm8, %v1754_v59, %v1765_v23  ;;  %6062 = vmatprep.subr.bf16.mxu0 %v6502_v21  ;;  %v1597_v52 = vshll.u32 %v5195_v24, 16  ;;  %v1601_v45 = vshrl.u32 %v5195_v24, 16  ;;  %v7585_v24 = vld [vmem:[#allocation2 + $0x8] sm:$0xff] }
  0xd2   : > { %5808 = vmatprep.mubr.bf16.mxu1 %v7549_v33  ;;  %v1770_v22 = vrot.slane %v1768_v38, 7 }
  0xd3   : > { %v1599_v30 = vrot.slane %v1597_v52, 1 }
  0xd4   : > { %v1773_v49 = vor.u32 %v1771_v10, %v1770_v22  ;;  %6063 = vmatpush3.bf16.msra.mxu0 %v6502_v21  ;;  %v6507_v10 = vld [vmem:[%s7797_s5 + $0xe0] sm:$0xff]  }
  0xd5   : > { %6064 = vmatprep.subr.bf16.mxu0 %v6504_v14  ;;  %v1600_v53 = vsel %vm1460_vm9, %v1595_v19, %v1599_v30  ;;  %v1603_v47 = vor.u32 %v1601_v45, %v1599_v30  ;;  %v6509_v19 = vld [vmem:[%s7797_s5 + $0xe8] sm:$0xff]  }
  0xd6   : > { %v7561_v59 = vsel %vm1642_vm8, %v1762_v13, %v1773_v49  ;;  %6033 = vmatmul.mubr.bf16.gmra.mrb[12].mxu0 %v7476_v36  ;;  %vm1621_vm13 = vcmp.ne.s16.totalorder %v1600_v53, 0  ;;  %v6501_v13 = vld [vmem:[%s7797_s5 + $0xc8] sm:$0xff]   ;;  %v4299_v53 = vld [vmem:[#allocation2 + $0x20] sm:$0xff] }
  0xd7   : > { %5809 = vmatmul.mubr.bf16.gmra.mrb[28].mxu1 %v7561_v59  ;;  %6036 = vmatprep.mubr.bf16.mxu0 %v7498_v15  ;;  %v1640_v57 = vsel %vm1621_vm13, 0, %v7374_v25  ;;  %vm1622_vm14 = vcmp.ne.s16.totalorder %v1603_v47, 0  ;;  %v6510_v45 = vld [vmem:[%s7797_s5 + $0x208] sm:$0xff]   ;;  %v6514_v47 = vld [vmem:[%s7797_s5 + $0x218] sm:$0xff]  }
  0xd8   : > { %5828 = vmatprep.mubr.bf16.mxu1 %v2272_v50  ;;  %6065 = vmatpush3.bf16.msra.mxu0 %v6504_v14  ;;  %v1776_v21 = vshrl.u32 %v1640_v57, 16  ;;  %v1779_v63 = vshll.u32 %v1640_v57, 16  ;;  %v4298_v50 = vld [vmem:[#allocation2 + $0x18] sm:$0xff]  ;;  %v6512_v57 = vld [vmem:[%s7797_s5 + $0x210] sm:$0xff]  }
  0xd9   : > { %6066 = vmatprep.subr.bf16.mxu0 %v6506_v2 }
  0xda   : > { %v1778_v23 = vrot.slane %v1776_v21, 7  ;;  %v6529_v21 = vld [vmem:[%s7797_s5 + $0x120] sm:$0xff]  }
  0xdc   : > { %6067 = vmatpush3.bf16.msra.mxu0 %v6506_v2  ;;  %v1781_v38 = vor.u32 %v1779_v63, %v1778_v23  ;;  %v6513_v2 = vld [vmem:[%s7797_s5 + $0xf8] sm:$0xff]   ;;  %v6531_v63 = vld [vmem:[%s7797_s5 + $0x130] sm:$0xff]  }
  0xdd   : > { %6100 = vmatprep.subr.bf16.mxu0 %v7570_v8 }
  0xde   : > { %6037 = vmatmul.mubr.bf16.gmra.mrb[16].mxu0 %v7505_v1  ;;  %v7599_v52 = vsel %vm1642_vm8, %v1770_v22, %v1781_v38  ;;  %v6511_v22 = vld [vmem:[%s7797_s5 + $0xf0] sm:$0xff]  }
  0xdf   : > { %5829 = vmatmul.mubr.bf16.vlgmr.msra.gmra.mrb[0].mxu1 %v6935_v35  ;;  %6040 = vmatprep.mubr.bf16.mxu0 %v7529_v43  ;;  %v1641_v35 = vsel %vm1622_vm14, 0, %v7585_v24 }
  0xe0   : > { %5861 = vmatpush3.bf16.msra.mxu1 %v7346_v31  ;;  %5832 = vmatprep.mubr.bf16.mxu1 %v6973_v11  ;;  %v6505_v31 = vld [vmem:[%s7797_s5 + $0xd8] sm:$0xff]   ;;  %v1784_v60 = vshrl.u32 %v1641_v35, 16  ;;  %v1787_v14 = vshll.u32 %v1641_v35, 16 }
  0xe1   : > { %5862 = vmatprep.subr.bf16.mxu1 %v6501_v13 }
  0xe2   : > { %v1786_v62 = vrot.slane %v1784_v60, 7 }
  0xe4   : > { %5863 = vmatpush3.bf16.msra.mxu1 %v6501_v13  ;;  %v1789_v30 = vor.u32 %v1787_v14, %v1786_v62  ;;  %v6525_v13 = vld [vmem:[%s7797_s5 + $0x100] sm:$0xff]  }
  0xe5   : > { %5864 = vmatprep.subr.bf16.mxu1 %v6503_v26 }
  0xe6   : > { %6041 = vmatmul.mubr.bf16.gmra.mrb[20].mxu0 %v7540_v27  ;;  %v1790_v49 = vsel %vm1642_vm8, %v1778_v23, %v1789_v30  ;;  %v6530_v23 = vld [vmem:[%s7797_s5 + $0x128] sm:$0xff]  }
  0xe7   : > { %5833 = vmatmul.mubr.bf16.gmra.mrb[4].mxu1 %v6992_v32  ;;  %6044 = vmatprep.mubr.bf16.mxu0 %v7549_v33 }
  0xe8   : > { %5836 = vmatprep.mubr.bf16.mxu1 %v7026_v4  ;;  %5865 = vmatpush3.bf16.msra.mxu1 %v6503_v26  ;;  %v7848_v26 = vld [vmem:[#allocation7_spill] sm:$0xff] }
  0xe9   : > { %5866 = vmatprep.subr.bf16.mxu1 %v6505_v31 }
  0xec   : > { %5867 = vmatpush3.bf16.msra.mxu1 %v6505_v31 }
  0xed   : > { %5868 = vmatprep.subr.bf16.mxu1 %v6507_v10 }
  0xee   : > { %6045 = vmatmul.mubr.bf16.gmra.mrb[24].mxu0 %v7561_v59 }
  0xef   : > { %5837 = vmatmul.mubr.bf16.gmra.mrb[8].mxu1 %v7075_v0  ;;  %6048 = vmatprep.mubr.bf16.mxu0 %v7599_v52 }
  0xf0   : > { %5840 = vmatprep.mubr.bf16.mxu1 %v7090_v12  ;;  %5869 = vmatpush3.bf16.msra.mxu1 %v6507_v10 }
  0xf1   : > { %5870 = vmatprep.subr.bf16.mxu1 %v6509_v19 }
  0xf4   : > { %5871 = vmatpush3.bf16.msra.mxu1 %v6509_v19 }
  0xf5   : > { %5872 = vmatprep.subr.bf16.mxu1 %v6511_v22 }
  0xf6   : > { %6049 = vmatmul.mubr.bf16.gmra.mrb[28].mxu0 %v1790_v49 }
  0xf7   : > { %5841 = vmatmul.mubr.bf16.gmra.mrb[12].mxu1 %v7116_v58  ;;  %6068 = vmatprep.mubr.bf16.mxu0 %v4298_v50 }
  0xf8   : > { %5844 = vmatprep.mubr.bf16.mxu1 %v7134_v37  ;;  %5873 = vmatpush3.bf16.msra.mxu1 %v6511_v22 }
  0xf9   : > { %5874 = vmatprep.subr.bf16.mxu1 %v6513_v2 }
  0xfc   : > { %5875 = vmatpush3.bf16.msra.mxu1 %v6513_v2 }
  0xfd   : > { %6148 = vmatprep.subr.bf16.mxu1 %v6525_v13 }
  0xfe   : > { %6069 = vmatmul.mubr.bf16.vlgmr.msra.gmra.mrb[0].mxu0 %v4299_v53 }
  0xff   : > { %5845 = vmatmul.mubr.bf16.gmra.mrb[16].mxu1 %v7167_v5  ;;  %6101 = vmatpush3.bf16.msra.mxu0 %v7570_v8  ;;  %v6516_v8 = vld [vmem:[%s7797_s5 + $0x228] sm:$0xff]  }
 0x100   : > { %5848 = vmatprep.mubr.bf16.mxu1 %v7204_v28  ;;  %6072 = vmatprep.mubr.bf16.mxu0 %v7296_v18  ;;  %v6515_v18 = vld [vmem:[%s7797_s5 + $0x220] sm:$0xff]  }
 0x101   : > { %6102 = vmatprep.subr.bf16.mxu0 %v6510_v45 }
 0x103   : > { %6103 = vmatpush3.bf16.msra.mxu0 %v6510_v45 }
 0x104   : > { %6104 = vmatprep.subr.bf16.mxu0 %v6512_v57 }
 0x106   : > { %6073 = vmatmul.mubr.bf16.gmra.mrb[4].mxu0 %v7314_v34  ;;  %v6517_v34 = vld [vmem:[%s7797_s5 + $0x230] sm:$0xff]  }
 0x107   : > { %5849 = vmatmul.mubr.bf16.gmra.mrb[20].mxu1 %v7223_v44  ;;  %6076 = vmatprep.mubr.bf16.mxu0 %v7323_v42  ;;  %v6518_v42 = vld [vmem:[%s7797_s5 + $0x238] sm:$0xff]  }
 0x108   : > { %5852 = vmatprep.mubr.bf16.mxu1 %v7305_v41  ;;  %6105 = vmatpush3.bf16.msra.mxu0 %v6512_v57 }
 0x109   : > { %6106 = vmatprep.subr.bf16.mxu0 %v6514_v47 }
 0x10c   : > { %6107 = vmatpush3.bf16.msra.mxu0 %v6514_v47 }
 0x10d   : > { %6108 = vmatprep.subr.bf16.mxu0 %v6515_v18 }
 0x10e   : > { %6077 = vmatmul.mubr.bf16.gmra.mrb[8].mxu0 %v7400_v48  ;;  %v6526_v48 = vld [vmem:[%s7797_s5 + $0x108] sm:$0xff]  }
 0x10f   : > { %5853 = vmatmul.mubr.bf16.gmra.mrb[24].mxu1 %v7340_v16  ;;  %6080 = vmatprep.mubr.bf16.mxu0 %v7419_v46  ;;  %v7846_v46 = vld [vmem:[#allocation5_spill] sm:$0xff] }
 0x110   : > { %5856 = vmatprep.mubr.bf16.mxu1 %v7365_v6  ;;  %6109 = vmatpush3.bf16.msra.mxu0 %v6515_v18 }
 0x111   : > { %6110 = vmatprep.subr.bf16.mxu0 %v6516_v8 }
 0x114   : > { %6111 = vmatpush3.bf16.msra.mxu0 %v6516_v8 }
 0x115   : > { %6112 = vmatprep.subr.bf16.mxu0 %v6517_v34 }
 0x116   : > { %6081 = vmatmul.mubr.bf16.gmra.mrb[12].mxu0 %v7436_v7 }
 0x117   : > { %5857 = vmatmul.mubr.bf16.gmra.mrb[28].mxu1 %v7425_v17  ;;  %6084 = vmatprep.mubr.bf16.mxu0 %v7459_v29 }
 0x118   : > { %5876 = vmatprep.mubr.bf16.mxu1 %v7196_v3  ;;  %6113 = vmatpush3.bf16.msra.mxu0 %v6517_v34  ;;  %v6527_v3 = vld [vmem:[%s7797_s5 + $0x110] sm:$0xff]  }
 0x119   : > { %6114 = vmatprep.subr.bf16.mxu0 %v6518_v42 }
 0x11c   : > { %6115 = vmatpush3.bf16.msra.mxu0 %v6518_v42 }
 0x11e   : > { %6085 = vmatmul.mubr.bf16.gmra.mrb[16].mxu0 %v7470_v54 }
 0x11f   : > { %5877 = vmatmul.mubr.bf16.vlgmr.msra.gmra.mrb[0].mxu1 %v7215_v39  ;;  %6088 = vmatprep.mubr.bf16.mxu0 %v7489_v20  ;;  %v7847_v39 = vld [vmem:[#allocation6_spill] sm:$0xff] }
 0x120   : > { %6156 = vmatpush3.bf16.msra.mxu1 %v6525_v13  ;;  %5880 = vmatprep.mubr.bf16.mxu1 %v7241_v55  ;;  %v6528_v55 = vld [vmem:[%s7797_s5 + $0x118] sm:$0xff]  }
 0x121   : > { %6149 = vmatprep.subr.bf16.mxu1 %v6526_v48 }
 0x124   : > { %6157 = vmatpush3.bf16.msra.mxu1 %v6526_v48 }
 0x125   : > { %6150 = vmatprep.subr.bf16.mxu1 %v6527_v3 }
 0x126   : > { %6089 = vmatmul.mubr.bf16.gmra.mrb[20].mxu0 %v7507_v40 }
 0x127   : > { %5881 = vmatmul.mubr.bf16.gmra.mrb[4].mxu1 %v7846_v46  ;;  %6092 = vmatprep.mubr.bf16.mxu0 %v7520_v56 }
 0x128   : > { %5884 = vmatprep.mubr.bf16.mxu1 %v7847_v39  ;;  %6158 = vmatpush3.bf16.msra.mxu1 %v6527_v3 }
 0x129   : > { %6151 = vmatprep.subr.bf16.mxu1 %v6528_v55 }
 0x12c   : > { %6159 = vmatpush3.bf16.msra.mxu1 %v6528_v55 }
 0x12d   : > { %6152 = vmatprep.subr.bf16.mxu1 %v6529_v21 }
 0x12e   : > { %6093 = vmatmul.mubr.bf16.gmra.mrb[24].mxu0 %v7533_v61 }
 0x12f   : > { %5885 = vmatmul.mubr.bf16.gmra.mrb[8].mxu1 %v7848_v26  ;;  %6096 = vmatprep.mubr.bf16.mxu0 %v7374_v25  ;;  %v6532_v25 = vld [vmem:[%s7797_s5 + $0x138] sm:$0xff]  }
 0x130   : > { %5888 = vmatprep.mubr.bf16.mxu1 %v7441_v9  ;;  %6160 = vmatpush3.bf16.msra.mxu1 %v6529_v21 }
 0x131   : > { %6153 = vmatprep.subr.bf16.mxu1 %v6530_v23 }
 0x134   : > { %6161 = vmatpush3.bf16.msra.mxu1 %v6530_v23 }
 0x135   : > { %6154 = vmatprep.subr.bf16.mxu1 %v6531_v63 }
 0x136   : > { %6097 = vmatmul.mubr.bf16.gmra.mrb[28].mxu0 %v7585_v24 }
 0x137   : > { %5889 = vmatmul.mubr.bf16.gmra.mrb[12].mxu1 %v7464_v51  ;;  %6116 = vmatprep.mubr.bf16.mxu0 %v6973_v11  ;;  %v1845_v11 = vld [vmem:[#allocation2 + $0x98] sm:$0x1] }
 0x138   : > { %5892 = vmatprep.mubr.bf16.mxu1 %v7476_v36  ;;  %6162 = vmatpush3.bf16.msra.mxu1 %v6531_v63 }
 0x139   : > { %6155 = vmatprep.subr.bf16.mxu1 %v6532_v25 }
 0x13c   : > { %6163 = vmatpush3.bf16.msra.mxu1 %v6532_v25 }
 0x13e   : > { %6117 = vmatmul.mubr.bf16.vlgmr.msra.gmra.mrb[0].mxu0 %v6992_v32  ;;  %v7849_v32 = vld [vmem:[#allocation8_spill] sm:$0xff] }
 0x13f   : > { %5893 = vmatmul.mubr.bf16.gmra.mrb[16].mxu1 %v7498_v15  ;;  %6120 = vmatprep.mubr.bf16.mxu0 %v7026_v4  ;;  %vm2241_vm8 = vcmp.ne.s16.totalorder %v7849_v32, 0 }
 0x140   : > { %5896 = vmatprep.mubr.bf16.mxu1 %v7505_v1  ;;  %v2260_v4 = vsel %vm2241_vm8, 0, %v1845_v11 }
 0x146   : > { %6121 = vmatmul.mubr.bf16.gmra.mrb[4].mxu0 %v7075_v0  ;;  %v7850_v0 = vld [vmem:[#allocation9_spill] sm:$0xff] }
 0x147   : > { %5897 = vmatmul.mubr.bf16.gmra.mrb[20].mxu1 %v7529_v43  ;;  %6124 = vmatprep.mubr.bf16.mxu0 %v7090_v12  ;;  %v2401_v12 = vshrl.u32 %v7850_v0, 16 }
 0x148   : > { %5900 = vmatprep.mubr.bf16.mxu1 %v7540_v27 }
 0x14e   : > { %6125 = vmatmul.mubr.bf16.gmra.mrb[8].mxu0 %v7116_v58  ;;  %v2405_v58 = vshll.u32 %v2260_v4, 16 }
 0x14f   : > { %5901 = vmatmul.mubr.bf16.gmra.mrb[24].mxu1 %v7549_v33  ;;  %6128 = vmatprep.mubr.bf16.mxu0 %v7134_v37  ;;  %v7851_v37 = vld [vmem:[#allocation11_spill] sm:$0xff] }
 0x150   : > { %5904 = vmatprep.mubr.bf16.mxu1 %v7561_v59 }
 0x156   : > { %6129 = vmatmul.mubr.bf16.gmra.mrb[12].mxu0 %v7167_v5  ;;  %v7852_v5 = vld [vmem:[#allocation10_spill] sm:$0xff] }
 0x157   : > { %5905 = vmatmul.mubr.bf16.gmra.mrb[28].mxu1 %v7599_v52  ;;  %6132 = vmatprep.mubr.bf16.mxu0 %v7204_v28  ;;  %v2403_v28 = vor.u32 %v2401_v12, %v7852_v5 }
 0x158   : > { %5940 = vmatprep.mubr.bf16.mxu1 %v7436_v7 }
 0x15e   : > { %6133 = vmatmul.mubr.bf16.gmra.mrb[16].mxu0 %v7223_v44  ;;  %v2407_v44 = vrot.slane %v2405_v58, 1 }
 0x15f   : > { %5941 = vmatmul.mubr.bf16.vlgmr.msra.gmra.mrb[16].mxu1 %v7459_v29  ;;  %6136 = vmatprep.mubr.bf16.mxu0 %v7305_v41 }
 0x160   : > { %5944 = vmatprep.mubr.bf16.mxu1 %v7470_v54  ;;  %v2408_v41 = vsel %vm1460_vm9, %v2403_v28, %v2407_v44 }
 0x166   : > { %6137 = vmatmul.mubr.bf16.gmra.mrb[20].mxu0 %v7340_v16  ;;  %v3491_v16 = vld [vmem:[#allocation2 + $0x88] sm:$0xff] }
 0x167   : > { %5945 = vmatmul.mubr.bf16.gmra.mrb[20].mxu1 %v7489_v20  ;;  %6140 = vmatprep.mubr.bf16.mxu0 %v7365_v6 }
 0x168   : > { %5948 = vmatprep.mubr.bf16.mxu1 %v7507_v40 }
 0x16e   : > { %6141 = vmatmul.mubr.bf16.gmra.mrb[24].mxu0 %v7425_v17 }
 0x16f   : > { %5949 = vmatmul.mubr.bf16.gmra.mrb[24].mxu1 %v7520_v56  ;;  %6144 = vmatprep.mubr.bf16.mxu0 %v7851_v37 }
 0x170   : > { %5952 = vmatprep.mubr.bf16.mxu1 %v7533_v61 }
 0x176   : > { %6145 = vmatmul.mubr.bf16.gmra.mrb[28].mxu0 %v2408_v41 }
 0x177   : > { %5953 = vmatmul.mubr.bf16.gmra.mrb[28].mxu1 %v3491_v16 }
 0x1f2   : > { %v5878_v6 = vpop.f32.mrb[0].mxu1 }
 0x1f3   : > { %v3317_v7 = vpop.f32.mrb[1].mxu1 }
 0x1f4   : > { %v5879_v9 = vpop.f32.mrb[2].mxu1 }
 0x1f5   : > { %v3320_v29 = vpop.f32.mrb[3].mxu1 }
 0x1fa   : > { %v5882_v17 = vpop.f32.mrb[4].mxu1 }
 0x1fb   : > { %v3333_v51 = vpop.f32.mrb[5].mxu1 }
 0x1fc   : > { %v5883_v54 = vpop.f32.mrb[6].mxu1 }
 0x1fd   : > { %v3336_v36 = vpop.f32.mrb[7].mxu1 }
 0x202   : > { %v5886_v20 = vpop.f32.mrb[8].mxu1 }
 0x203   : > { %v3349_v15 = vpop.f32.mrb[9].mxu1 }
 0x204   : > { %v5887_v1 = vpop.f32.mrb[10].mxu1 }
 0x205   : > { %v7726_v40 = vpop.f32.mrb[11].mxu1 }
 0x20a   : > { %v7728_v61 = vpop.f32.mrb[12].mxu1 }
 0x20b   : > { %v7730_v56 = vpop.f32.mrb[13].mxu1 }
 0x20c   : > { %v7732_v43 = vpop.f32.mrb[14].mxu1 }
 0x20d   : > { %v7734_v27 = vpop.f32.mrb[15].mxu1 }
 0x211   : > { %v6118_v33 = vpop.f32.mrb[0].mxu0 }
 0x212   : > { %v6164_v59 = vadd.f32 %v6118_v33, %v5878_v6  ;;  %v4687_v24 = vpop.f32.mrb[1].mxu0 }
 0x213   : > { %v6165_v35 = vadd.f32 %v4687_v24, %v3317_v7  ;;  %v6119_v31 = vpop.f32.mrb[2].mxu0 }
 0x214   : > { %4848 = vst [vmem:[%s7740_s13 + $0x10] sm:$0xff] %v6164_v59  ;;  %v6166_v60 = vadd.f32 %v6119_v31, %v5879_v9  ;;  %v4690_v38 = vpop.f32.mrb[3].mxu0  ;;  %v4918_v19 = vmul.f32 %v6164_v59, %v6164_v59 }
 0x215   : > { %4846 = vst [vmem:[%s7740_s13] sm:$0xff] %v6165_v35  ;;  %v6167_v10 = vadd.f32 %v4690_v38, %v3320_v29  ;;  %v4916_v62 = vmul.f32 %v6165_v35, %v6165_v35 }
 0x216   : > { %4849 = vst [vmem:[%s7740_s13 + $0x18] sm:$0xff] %v6166_v60  ;;  %v4919_v53 = vmul.f32 %v6166_v60, %v6166_v60 }
 0x217   : > { %4847 = vst [vmem:[%s7740_s13 + $0x8] sm:$0xff] %v6167_v10  ;;  %v4878_v14 = vadd.f32 %v6167_v10, %v6165_v35  ;;  %v4917_v52 = vmul.f32 %v6167_v10, %v6167_v10 }
 0x219   : > { %v4879_v30 = vadd.f32 %v6164_v59, %v4878_v14  ;;  %v4948_v22 = vadd.f32 %v4917_v52, %v4916_v62  ;;  %v6122_v49 = vpop.f32.mrb[4].mxu0 }
 0x21a   : > { %v6168_v50 = vadd.f32 %v6122_v49, %v5882_v17  ;;  %v4703_v2 = vpop.f32.mrb[5].mxu0 }
 0x21b   : > { %v4949_v45 = vadd.f32 %v4948_v22, %v4918_v19  ;;  %v6169_v13 = vadd.f32 %v4703_v2, %v3333_v51  ;;  %v4880_v57 = vadd.f32 %v6166_v60, %v4879_v30  ;;  %v6123_v47 = vpop.f32.mrb[6].mxu0 }
 0x21c   : > { %4852 = vst [vmem:[%s7740_s13 + $0x30] sm:$0xff] %v6168_v50  ;;  %v6170_v18 = vadd.f32 %v6123_v47, %v5883_v54  ;;  %v4706_v8 = vpop.f32.mrb[7].mxu0  ;;  %v4922_v21 = vmul.f32 %v6168_v50, %v6168_v50 }
 0x21d   : > { %4850 = vst [vmem:[%s7740_s13 + $0x20] sm:$0xff] %v6169_v13  ;;  %v4881_v34 = vadd.f32 %v6169_v13, %v4880_v57  ;;  %v4920_v42 = vmul.f32 %v6169_v13, %v6169_v13  ;;  %v4950_v48 = vadd.f32 %v4949_v45, %v4919_v53  ;;  %v6171_v3 = vadd.f32 %v4706_v8, %v3336_v36 }
 0x21e   : > { %4853 = vst [vmem:[%s7740_s13 + $0x38] sm:$0xff] %v6170_v18  ;;  %v4923_v32 = vmul.f32 %v6170_v18, %v6170_v18 }
 0x21f   : > { %v4951_v46 = vadd.f32 %v4950_v48, %v4920_v42  ;;  %4851 = vst [vmem:[%s7740_s13 + $0x28] sm:$0xff] %v6171_v3  ;;  %v4882_v39 = vadd.f32 %v6171_v3, %v4881_v34  ;;  %v4921_v55 = vmul.f32 %v6171_v3, %v6171_v3 }
 0x221   : > { %v4883_v26 = vadd.f32 %v6168_v50, %v4882_v39  ;;  %v4952_v23 = vadd.f32 %v4951_v46, %v4921_v55  ;;  %v6126_v63 = vpop.f32.mrb[8].mxu0 }
 0x222   : > { %v6172_v25 = vadd.f32 %v6126_v63, %v5886_v20  ;;  %v4719_v11 = vpop.f32.mrb[9].mxu0 }
 0x223   : > { %v4953_v4 = vadd.f32 %v4952_v23, %v4922_v21  ;;  %v6173_v0 = vadd.f32 %v4719_v11, %v3349_v15  ;;  %v4884_v12 = vadd.f32 %v6170_v18, %v4883_v26  ;;  %v6127_v58 = vpop.f32.mrb[10].mxu0 }
 0x224   : > { %4856 = vst [vmem:[%s7740_s13 + $0x50] sm:$0xff] %v6172_v25  ;;  %v6174_v37 = vadd.f32 %v6127_v58, %v5887_v1  ;;  %v4722_v5 = vpop.f32.mrb[11].mxu0  ;;  %v4926_v29 = vmul.f32 %v6172_v25, %v6172_v25 }
 0x225   : > { %4854 = vst [vmem:[%s7740_s13 + $0x40] sm:$0xff] %v6173_v0  ;;  %v4885_v28 = vadd.f32 %v6173_v0, %v4884_v12  ;;  %v4924_v44 = vmul.f32 %v6173_v0, %v6173_v0  ;;  %v4954_v41 = vadd.f32 %v4953_v4, %v4923_v32  ;;  %v6175_v16 = vadd.f32 %v4722_v5, %v7726_v40 }
 0x226   : > { %4857 = vst [vmem:[%s7740_s13 + $0x58] sm:$0xff] %v6174_v37  ;;  %v4927_v15 = vmul.f32 %v6174_v37, %v6174_v37 }
 0x227   : > { %v4955_v6 = vadd.f32 %v4954_v41, %v4924_v44  ;;  %4855 = vst [vmem:[%s7740_s13 + $0x48] sm:$0xff] %v6175_v16  ;;  %v4886_v7 = vadd.f32 %v6175_v16, %v4885_v28  ;;  %v4925_v9 = vmul.f32 %v6175_v16, %v6175_v16 }
 0x229   : > { %v4887_v17 = vadd.f32 %v6172_v25, %v4886_v7  ;;  %v4956_v51 = vadd.f32 %v4955_v6, %v4925_v9  ;;  %v6130_v54 = vpop.f32.mrb[12].mxu0 }
 0x22a   : > { %v6176_v36 = vadd.f32 %v6130_v54, %v7728_v61  ;;  %v4735_v20 = vpop.f32.mrb[13].mxu0 }
 0x22b   : > { %v4957_v1 = vadd.f32 %v4956_v51, %v4926_v29  ;;  %v6177_v40 = vadd.f32 %v4735_v20, %v7730_v56  ;;  %v4888_v33 = vadd.f32 %v6174_v37, %v4887_v17  ;;  %v6131_v59 = vpop.f32.mrb[14].mxu0 }
 0x22c   : > { %4860 = vst [vmem:[%s7740_s13 + $0x70] sm:$0xff] %v6176_v36  ;;  %v6178_v24 = vadd.f32 %v6131_v59, %v7732_v43  ;;  %v4738_v35 = vpop.f32.mrb[15].mxu0  ;;  %v4930_v52 = vmul.f32 %v6176_v36, %v6176_v36 }
 0x22d   : > { %4858 = vst [vmem:[%s7740_s13 + $0x60] sm:$0xff] %v6177_v40  ;;  %v4889_v31 = vadd.f32 %v6177_v40, %v4888_v33  ;;  %v4928_v60 = vmul.f32 %v6177_v40, %v6177_v40  ;;  %v4958_v38 = vadd.f32 %v4957_v1, %v4927_v15  ;;  %v6179_v10 = vadd.f32 %v4738_v35, %v7734_v27 }
 0x22e   : > { %4861 = vst [vmem:[%s7740_s13 + $0x78] sm:$0xff] %v6178_v24  ;;  %v4931_v49 = vmul.f32 %v6178_v24, %v6178_v24 }
 0x22f   : > { %v4959_v61 = vadd.f32 %v4958_v38, %v4928_v60  ;;  %4859 = vst [vmem:[%s7740_s13 + $0x68] sm:$0xff] %v6179_v10  ;;  %v4890_v62 = vadd.f32 %v6179_v10, %v4889_v31  ;;  %v4929_v14 = vmul.f32 %v6179_v10, %v6179_v10 }
 0x231   : > { %v4891_v56 = vadd.f32 %v6176_v36, %v4890_v62  ;;  %v4960_v19 = vadd.f32 %v4959_v61, %v4929_v14  ;;  %v6134_v30 = vpop.f32.mrb[16].mxu0 }
 0x232   : > { %v5942_v22 = vpop.f32.mrb[16].mxu1  ;;  %v4751_v43 = vpop.f32.mrb[17].mxu0 }
 0x233   : > { %v4961_v50 = vadd.f32 %v4960_v19, %v4930_v52  ;;  %v6180_v2 = vadd.f32 %v6134_v30, %v5942_v22  ;;  %v3655_v53 = vpop.f32.mrb[17].mxu1  ;;  %v4892_v27 = vadd.f32 %v6178_v24, %v4891_v56  ;;  %v6135_v45 = vpop.f32.mrb[18].mxu0 }
 0x234   : > { %v6181_v13 = vadd.f32 %v4751_v43, %v3655_v53  ;;  %v5943_v57 = vpop.f32.mrb[18].mxu1  ;;  %v4754_v47 = vpop.f32.mrb[19].mxu0 }
 0x235   : > { %4864 = vst [vmem:[%s7740_s13 + $0x90] sm:$0xff] %v6180_v2  ;;  %v4962_v18 = vadd.f32 %v4961_v50, %v4931_v49  ;;  %v6182_v8 = vadd.f32 %v6135_v45, %v5943_v57  ;;  %v3658_v34 = vpop.f32.mrb[19].mxu1  ;;  %v4934_v26 = vmul.f32 %v6180_v2, %v6180_v2 }
 0x236   : > { %4862 = vst [vmem:[%s7740_s13 + $0x80] sm:$0xff] %v6181_v13  ;;  %v4893_v42 = vadd.f32 %v6181_v13, %v4892_v27  ;;  %v4932_v48 = vmul.f32 %v6181_v13, %v6181_v13  ;;  %v6183_v3 = vadd.f32 %v4754_v47, %v3658_v34 }
 0x237   : > { %4865 = vst [vmem:[%s7740_s13 + $0x98] sm:$0xff] %v6182_v8  ;;  %v4935_v12 = vmul.f32 %v6182_v8, %v6182_v8 }
 0x238   : > { %v4963_v46 = vadd.f32 %v4962_v18, %v4932_v48  ;;  %4863 = vst [vmem:[%s7740_s13 + $0x88] sm:$0xff] %v6183_v3  ;;  %v4894_v39 = vadd.f32 %v6183_v3, %v4893_v42  ;;  %v4933_v55 = vmul.f32 %v6183_v3, %v6183_v3 }
 0x239   : > { %v6138_v21 = vpop.f32.mrb[20].mxu0 }
 0x23a   : > { %v4895_v23 = vadd.f32 %v6180_v2, %v4894_v39  ;;  %v4964_v63 = vadd.f32 %v4963_v46, %v4933_v55  ;;  %v5946_v25 = vpop.f32.mrb[20].mxu1  ;;  %v4767_v11 = vpop.f32.mrb[21].mxu0 }
 0x23b   : > { %v6184_v32 = vadd.f32 %v6138_v21, %v5946_v25  ;;  %v3671_v4 = vpop.f32.mrb[21].mxu1  ;;  %v6139_v0 = vpop.f32.mrb[22].mxu0 }
 0x23c   : > { %v4965_v58 = vadd.f32 %v4964_v63, %v4934_v26  ;;  %v6185_v37 = vadd.f32 %v4767_v11, %v3671_v4  ;;  %v4896_v5 = vadd.f32 %v6182_v8, %v4895_v23  ;;  %v5947_v28 = vpop.f32.mrb[22].mxu1  ;;  %v4770_v44 = vpop.f32.mrb[23].mxu0 }
 0x23d   : > { %4868 = vst [vmem:[%s7740_s13 + $0xb0] sm:$0xff] %v6184_v32  ;;  %v6186_v41 = vadd.f32 %v6139_v0, %v5947_v28  ;;  %v3674_v16 = vpop.f32.mrb[23].mxu1  ;;  %v4938_v20 = vmul.f32 %v6184_v32, %v6184_v32 }
 0x23e   : > { %4866 = vst [vmem:[%s7740_s13 + $0xa0] sm:$0xff] %v6185_v37  ;;  %v4897_v6 = vadd.f32 %v6185_v37, %v4896_v5  ;;  %v4936_v7 = vmul.f32 %v6185_v37, %v6185_v37  ;;  %v4966_v9 = vadd.f32 %v4965_v58, %v4935_v12  ;;  %v6187_v29 = vadd.f32 %v4770_v44, %v3674_v16 }
 0x23f   : > { %4869 = vst [vmem:[%s7740_s13 + $0xb8] sm:$0xff] %v6186_v41  ;;  %v4939_v31 = vmul.f32 %v6186_v41, %v6186_v41 }
 0x240   : > { %v4967_v17 = vadd.f32 %v4966_v9, %v4936_v7  ;;  %4867 = vst [vmem:[%s7740_s13 + $0xa8] sm:$0xff] %v6187_v29  ;;  %v4898_v51 = vadd.f32 %v6187_v29, %v4897_v6  ;;  %v4937_v54 = vmul.f32 %v6187_v29, %v6187_v29 }
 0x241   : > { %v6142_v36 = vpop.f32.mrb[24].mxu0 }
 0x242   : > { %v4899_v15 = vadd.f32 %v6184_v32, %v4898_v51  ;;  %v4968_v1 = vadd.f32 %v4967_v17, %v4937_v54  ;;  %v5950_v40 = vpop.f32.mrb[24].mxu1  ;;  %v4783_v33 = vpop.f32.mrb[25].mxu0 }
 0x243   : > { %v6188_v59 = vadd.f32 %v6142_v36, %v5950_v40  ;;  %v3687_v24 = vpop.f32.mrb[25].mxu1  ;;  %v6143_v35 = vpop.f32.mrb[26].mxu0 }
 0x244   : > { %v4969_v60 = vadd.f32 %v4968_v1, %v4938_v20  ;;  %v6189_v38 = vadd.f32 %v4783_v33, %v3687_v24  ;;  %v4900_v10 = vadd.f32 %v6186_v41, %v4899_v15  ;;  %v5951_v61 = vpop.f32.mrb[26].mxu1  ;;  %v4786_v62 = vpop.f32.mrb[27].mxu0 }
 0x245   : > { %4872 = vst [vmem:[%s7740_s13 + $0xd0] sm:$0xff] %v6188_v59  ;;  %v6190_v14 = vadd.f32 %v6143_v35, %v5951_v61  ;;  %v3690_v52 = vpop.f32.mrb[27].mxu1  ;;  %v4942_v53 = vmul.f32 %v6188_v59, %v6188_v59 }
 0x246   : > { %4870 = vst [vmem:[%s7740_s13 + $0xc0] sm:$0xff] %v6189_v38  ;;  %v4901_v56 = vadd.f32 %v6189_v38, %v4900_v10  ;;  %v4940_v19 = vmul.f32 %v6189_v38, %v6189_v38  ;;  %v4970_v30 = vadd.f32 %v4969_v60, %v4939_v31  ;;  %v6191_v22 = vadd.f32 %v4786_v62, %v3690_v52 }
 0x247   : > { %4873 = vst [vmem:[%s7740_s13 + $0xd8] sm:$0xff] %v6190_v14  ;;  %v4943_v34 = vmul.f32 %v6190_v14, %v6190_v14 }
 0x248   : > { %v4971_v43 = vadd.f32 %v4970_v30, %v4940_v19  ;;  %4871 = vst [vmem:[%s7740_s13 + $0xc8] sm:$0xff] %v6191_v22  ;;  %v4902_v49 = vadd.f32 %v6191_v22, %v4901_v56  ;;  %v4941_v50 = vmul.f32 %v6191_v22, %v6191_v22 }
 0x249   : > { %v6146_v2 = vpop.f32.mrb[28].mxu0 }
 0x24a   : > { %v4903_v27 = vadd.f32 %v6188_v59, %v4902_v49  ;;  %v4972_v45 = vadd.f32 %v4971_v43, %v4941_v50  ;;  %v5954_v13 = vpop.f32.mrb[28].mxu1  ;;  %v4799_v57 = vpop.f32.mrb[29].mxu0 }
 0x24b   : > { %v6192_v47 = vadd.f32 %v6146_v2, %v5954_v13  ;;  %v3703_v18 = vpop.f32.mrb[29].mxu1  ;;  %v6147_v8 = vpop.f32.mrb[30].mxu0 }
 0x24c   : > { %v4973_v42 = vadd.f32 %v4972_v45, %v4942_v53  ;;  %v6193_v48 = vadd.f32 %v4799_v57, %v3703_v18  ;;  %v4904_v3 = vadd.f32 %v6190_v14, %v4903_v27  ;;  %v5955_v46 = vpop.f32.mrb[30].mxu1  ;;  %v4802_v39 = vpop.f32.mrb[31].mxu0 }
 0x24d   : > { %4876 = vst [vmem:[%s7740_s13 + $0xf0] sm:$0xff] %v6192_v47  ;;  %v6194_v55 = vadd.f32 %v6147_v8, %v5955_v46  ;;  %v3706_v21 = vpop.f32.mrb[31].mxu1  ;;  %v4946_v0 = vmul.f32 %v6192_v47, %v6192_v47 }
 0x24e   : > { %4874 = vst [vmem:[%s7740_s13 + $0xe0] sm:$0xff] %v6193_v48  ;;  %v4905_v26 = vadd.f32 %v6193_v48, %v4904_v3  ;;  %v4944_v23 = vmul.f32 %v6193_v48, %v6193_v48  ;;  %v4974_v63 = vadd.f32 %v4973_v42, %v4943_v34  ;;  %v6195_v25 = vadd.f32 %v4802_v39, %v3706_v21 }
 0x24f   : > { %4877 = vst [vmem:[%s7740_s13 + $0xf8] sm:$0xff] %v6194_v55  ;;  %v4947_v37 = vmul.f32 %v6194_v55, %v6194_v55 }
 0x250   : > { %v4975_v11 = vadd.f32 %v4974_v63, %v4944_v23  ;;  %4875 = vst [vmem:[%s7740_s13 + $0xe8] sm:$0xff] %v6195_v25  ;;  %v4906_v32 = vadd.f32 %v6195_v25, %v4905_v26  ;;  %v4945_v4 = vmul.f32 %v6195_v25, %v6195_v25 }
 0x252   : > { %v4907_v12 = vadd.f32 %v6192_v47, %v4906_v32  ;;  %v4976_v58 = vadd.f32 %v4975_v11, %v4945_v4 }
 0x254   : > { %v4908_v5 = vadd.f32 %v6194_v55, %v4907_v12  ;;  %v4977_v28 = vadd.f32 %v4976_v58, %v4946_v0 }
 0x256   : > { %v4909_v44 = vrot.slane %v4908_v5, 4  ;;  %v4978_v41 = vadd.f32 %v4977_v28, %v4947_v37 }
 0x258   : > { %v4910_v16 = vadd.f32 %v4909_v44, %v4908_v5  ;;  %v4979_v6 = vrot.slane %v4978_v41, 4 }
 0x25a   : > { %v4911_v7 = vrot.slane %v4910_v16, 2  ;;  %v4980_v9 = vadd.f32 %v4979_v6, %v4978_v41 }
 0x25c   : > { %v4912_v29 = vadd.f32 %v4911_v7, %v4910_v16  ;;  %v4981_v17 = vrot.slane %v4980_v9, 2 }
 0x25e   : > { %v4913_v51 = vrot.slane %v4912_v29, 1  ;;  %v4982_v54 = vadd.f32 %v4981_v17, %v4980_v9 }
 0x260   : > { %v4914_v36 = vadd.f32 %v4913_v51, %v4912_v29  ;;  %v4983_v20 = vrot.slane %v4982_v54, 1 }
 0x262   : > { %4915 = vst [vmem:[%s461_s17] sm:$0x1] %v4914_v36  ;;  %v4984_v15 = vadd.f32 %v4983_v20, %v4982_v54 }
 0x264   : > { %4985 = vst [vmem:[%s461_s17 + $0x1] sm:$0x1] %v4984_v15 }
 0x265 PF: > { %s18_s2 = sadd.s32 1, %s6555_s2   ;;  %s7853_s23 = smov %s6551_s24 }
 0x266   : > { %p15_p5 = scmp.ge.s32.totalorder %s18_s2, 4   ;;  %s7854_s24 = smov %s7856_s25 }
 0x268   :  { %17 = sbr.rel (!%p15_p5) target bundleno = 2 (0x2), region = 100 }

// kernel: conv_block_forward.3
= control target key start
LH: loop header
LB: loop body
LE: loop exit
PB: predicated region body
PF: predicated region fallthrough
CT: control target
= control target key end

     0   :  { %s6737_s23 = smov 0   ;;  %s6739_s24 = smov 0   ;;  %s7879_s0 = inlined_call_operand.vmem [shape: bf16[2,16,16,128], index: 0, kind: input, shape index: {}, may-alias: {0,1,2}]   ;;  %s7880_s1 = inlined_call_operand.vmem [shape: bf16[2,16,16,128], index: 1, kind: input, shape index: {}, may-alias: {0,1,2}]   ;;  %s7881_s2 = inlined_call_operand.vmem [shape: bf16[2,16,16,128], index: 2, kind: input, shape index: {}, may-alias: {0,1,2}]   ;;  %s7882_s3 = inlined_call_operand.vmem [shape: f32[1,128], index: 3, kind: input, shape index: {}]   ;;  %s7883_s4 = inlined_call_operand.vmem [shape: f32[1,128], index: 4, kind: input, shape index: {}]   ;;  %s7884_s5 = inlined_call_operand.vmem [shape: bf16[9,128,128], index: 5, kind: input, shape index: {}]   ;;  %s7885_s6 = inlined_call_operand.vmem [shape: bf16[2,16,16,128], index: 6, kind: output, shape index: {0}]   ;;  %s7886_s7 = inlined_call_operand.vmem [shape: f32[2,2,128], index: 7, kind: output, shape index: {1}]  }
   0x1   :  { %s6741_s2 = smov 0  }
   0x2 LB: > { %s30_s3 = sadd.s32 1, %s6689_s24  ;;  %p5194_p0 = scmp.ge.s32.totalorder %s6693_s2, 1  ;;  %s6693_s2 = sphi %s6741_s2, %s18_s2   ;;  %s6689_s24 = sphi %s6739_s24, %s7950_s24   ;;  %s6685_s23 = sphi %s6737_s23, %s7949_s23  }
   0x3   : > { %p32_p1 = scmp.ge.s32.totalorder %s30_s3, 2  ;;  %p328_p2 = scmp.lt.s32.totalorder %s6693_s2, 3 }
   0x5   : > { %s7952_s3 = smov (%p32_p1, %s30_s3), 0  ;;  %p329_p3 = pnand %p5194_p0, %p328_p2 }
   0x7   : > { %332 = sbr.rel (%p329_p3) target bundleno = 592 (0x250), region = 44 }
   0xe   : > { %v6570_v0 = vld [vmem:[%s7884_s5 + $0x40] sm:$0xff]   ;;  %v6695_v2 = vmov 0   ;;  %v6572_v4 = vld [vmem:[%s7884_s5 + $0x48] sm:$0xff]   ;;  %p419_p4 = scmp.lt.s32.totalorder %s6685_s23, 1  ;;  %v6574_v6 = vld [vmem:[%s7884_s5 + $0x50] sm:$0xff]   ;;  %v642_v10 = vlaneseq  ;;  %vm6696_vm4 = vmmov 0  }
   0xf   : > { %v6571_v1 = vld [vmem:[%s7884_s5 + $0x100] sm:$0xff]   ;;  %v6765_v3 = vcombine.low %v6695_v2, %v6695_v2  ;;  %466 = vst [vmem:[#allocation2] sm:$0xff] %v6695_v2  ;;  %641 = vst [vmem:[#allocation2 + $0x98] sm:$0xff] %v6695_v2  ;;  %5840 = vmatprep.subr.bf16.mxu1 %v6570_v0  ;;  %v6573_v5 = vld [vmem:[%s7884_s5 + $0x108] sm:$0xff]   ;;  %vm1546_vm11 = vsmask.f32 256 }
  0x10   : > { %6032 = vmatprep.subr.bf16.mxu0 %v6571_v1  ;;  %5841 = vmatpush3.bf16.msra.mxu1 %v6570_v0  ;;  %v6575_v7 = vld [vmem:[%s7884_s5 + $0x110] sm:$0xff]   ;;  %s7954_s23 = smov (!%p419_p4, %s6685_s23), 1  ;;  %v6576_v8 = vld [vmem:[%s7884_s5 + $0x58] sm:$0xff]   ;;  %v6578_v11 = vld [vmem:[%s7884_s5 + $0x60] sm:$0xff]   ;;  %v6808_v13 = vshrl.u32 %v642_v10, 7 }
  0x11   : > { %481 = vst [vmem:[#allocation2 + $0x8] sm:$0xff] %v6765_v3  ;;  %640 = vst [vmem:[#allocation2 + $0x90] sm:$0xff] %v6765_v3  ;;  %6033 = vmatpush3.bf16.msra.mxu0 %v6571_v1  ;;  %5842 = vmatprep.subr.bf16.mxu1 %v6572_v4  ;;  %v6577_v9 = vld [vmem:[%s7884_s5 + $0x118] sm:$0xff]   ;;  %s5493_s17 = sshll.u32 %s7954_s23, 7  ;;  %v6579_v12 = vld [vmem:[%s7884_s5 + $0x120] sm:$0xff]  }
  0x12   : > { %6034 = vmatprep.subr.bf16.mxu0 %v6573_v5  ;;  %5856 = vmatprep.mubr.bf16.mxu1 %v6765_v3  ;;  %s6806_s4 = scalar_lea.vmem %s7880_s1, %s5493_s17  ;;  %v6580_v14 = vld [vmem:[%s7884_s5 + $0x68] sm:$0xff]   ;;  %v644_v17 = vadd.s32 8, %v6808_v13  ;;  %v646_v19 = vadd.s32 24, %v6808_v13  ;;  %v6582_v20 = vld [vmem:[%s7884_s5 + $0x70] sm:$0xff]   ;;  %v648_v22 = vadd.s32 40, %v6808_v13  ;;  %v650_v27 = vadd.s32 56, %v6808_v13  ;;  %vm1239_vm5 = vmpackc.low %vm6696_vm4, %vm6696_vm4  ;;  %s7844_s13 = scalar_lea.vmem %s7885_s6, %s5493_s17 }
  0x13   : > { %v6814_v15 = vld [vmem:[%s6806_s4] sm:$0xff]   ;;  %v6581_v16 = vld [vmem:[%s7884_s5 + $0x128] sm:$0xff]   ;;  %v6583_v21 = vld [vmem:[%s7884_s5 + $0x130] sm:$0xff]   ;;  %v652_v34 = vadd.s32 72, %v6808_v13  ;;  %v654_v36 = vadd.s32 88, %v6808_v13  ;;  %v656_v38 = vadd.s32 104, %v6808_v13 }
  0x14   : > { %5843 = vmatpush3.bf16.msra.mxu1 %v6572_v4  ;;  %6048 = vmatprep.mubr.bf16.mxu0 %v6814_v15  ;;  %v6822_v18 = vld [vmem:[%s6806_s4 + $0x8] sm:$0xff]   ;;  %v6834_v23 = vld [vmem:[%s6806_s4 + $0x10] sm:$0xff]   ;;  %v690_v24 = vand.u32 15, %v644_v17  ;;  %v704_v25 = vand.u32 15, %v646_v19  ;;  %v6838_v26 = vld [vmem:[%s6806_s4 + $0x18] sm:$0xff]   ;;  %v718_v29 = vand.u32 15, %v648_v22 }
  0x15   : > { %6035 = vmatpush3.bf16.msra.mxu0 %v6573_v5  ;;  %5844 = vmatprep.subr.bf16.mxu1 %v6574_v6  ;;  %611 = vst [vmem:[#allocation2 + $0x18] sm:$0xff] %v6822_v18  ;;  %612 = vst [vmem:[#allocation2 + $0x20] sm:$0xff] %v6834_v23  ;;  %v6584_v28 = vld [vmem:[%s7884_s5 + $0x78] sm:$0xff]   ;;  %v6587_v31 = vld [vmem:[%s7884_s5] sm:$0xff]   ;;  %v732_v35 = vand.u32 15, %v650_v27  ;;  %v746_v42 = vand.u32 15, %v652_v34 }
  0x16   : > { %6036 = vmatprep.subr.bf16.mxu0 %v6575_v7  ;;  %v6585_v30 = vld [vmem:[%s7884_s5 + $0x138] sm:$0xff]   ;;  %613 = vst [vmem:[#allocation2 + $0x28] sm:$0xff] %v6838_v26  ;;  %v6852_v32 = vld [vmem:[%s6806_s4 + $0x20] sm:$0xff]   ;;  %vm6854_vm0 = vcmp.eq.s32.totalorder %v690_v24, 15  ;;  %v6862_v37 = vld [vmem:[%s6806_s4 + $0x28] sm:$0xff]   ;;  %vm6868_vm1 = vcmp.eq.s32.totalorder %v704_v25, 15 }
  0x17   : > { %614 = vst [vmem:[#allocation2 + $0x30] sm:$0xff] %v6852_v32  ;;  %v6589_v39 = vld [vmem:[%s7884_s5 + $0x140] sm:$0xff]   ;;  %615 = vst [vmem:[#allocation2 + $0x38] sm:$0xff] %v6862_v37  ;;  %vm6873_vm2 = vcmp.eq.s32.totalorder %v718_v29, 15  ;;  %v6590_v43 = vld [vmem:[%s7884_s5 + $0x148] sm:$0xff]   ;;  %vm6883_vm3 = vcmp.eq.s32.totalorder %v732_v35, 15 }
  0x18   : > { %5845 = vmatpush3.bf16.msra.mxu1 %v6574_v6  ;;  %v6881_v44 = vld [vmem:[%s6806_s4 + $0x30] sm:$0xff]   ;;  %v760_v46 = vand.u32 15, %v654_v36  ;;  %v774_v47 = vand.u32 15, %v656_v38  ;;  %v6889_v48 = vld [vmem:[%s6806_s4 + $0x38] sm:$0xff]   ;;  %v6892_v49 = vadd.s32 120, %v6808_v13  ;;  %v6592_v50 = vld [vmem:[%s7884_s5 + $0x8] sm:$0xff]  }
  0x19   : > { %6037 = vmatpush3.bf16.msra.mxu0 %v6575_v7  ;;  %5846 = vmatprep.subr.bf16.mxu1 %v6576_v8  ;;  %616 = vst [vmem:[#allocation2 + $0x40] sm:$0xff] %v6881_v44  ;;  %v6899_v51 = vadd.s32 136, %v6808_v13  ;;  %v6594_v52 = vld [vmem:[%s7884_s5 + $0x150] sm:$0xff]   ;;  %617 = vst [vmem:[#allocation2 + $0x48] sm:$0xff] %v6889_v48  ;;  %v6907_v53 = vadd.s32 152, %v6808_v13  ;;  %vm6913_vm6 = vcmp.eq.s32.totalorder %v746_v42, 15 }
  0x1a   : > { %6038 = vmatprep.subr.bf16.mxu0 %v6577_v9  ;;  %v6597_v54 = vld [vmem:[%s7884_s5 + $0x10] sm:$0xff]   ;;  %vm6917_vm7 = vcmp.eq.s32.totalorder %v760_v46, 15  ;;  %v6922_v57 = vadd.s32 16, %v6808_v13  ;;  %v6926_v58 = vsel %vm1239_vm5, 65537, %v6695_v2  ;;  %vm1859_vm8 = vmpackc.low %vm6854_vm0, %vm6854_vm0  ;;  %v6932_v59 = vld [vmem:[%s6806_s4 + $0x40] sm:$0xff]   ;;  %vm6934_vm9 = vcmp.eq.s32.totalorder %v774_v47, 15 }
  0x1b   : > { %v788_v61 = vand.u32 15, %v6892_v49  ;;  %vm1861_vm10 = vmpackc.low %vm6868_vm1, %vm6868_vm1  ;;  %v1895_v62 = vsel %vm1859_vm8, 65537, %v6695_v2  ;;  %v802_v63 = vand.u32 15, %v6899_v51  ;;  %v6947_v0 = vld [vmem:[%s7884_s5 + $0x158] sm:$0xff]   ;;  %618 = vst [vmem:[#allocation2 + $0x50] sm:$0xff] %v6932_v59  ;;  %v816_v5 = vand.u32 15, %v6907_v53 }
  0x1c   : > { %5847 = vmatpush3.bf16.msra.mxu1 %v6576_v8  ;;  %vm1863_vm12 = vmpackc.low %vm6873_vm2, %vm6873_vm2  ;;  %v1897_v1 = vsel %vm1861_vm10, 65537, %v6695_v2  ;;  %v6954_v4 = vcombine.low %v6926_v58, %v1895_v62  ;;  %v6602_v6 = vld [vmem:[%s7884_s5 + $0x18] sm:$0xff]   ;;  %v697_v10 = vand.u32 15, %v6922_v57  ;;  %v6988_v22 = vld [vmem:[%s7884_s5 + $0x160] sm:$0xff]   ;;  %v6995_v29 = vadd.s32 168, %v6808_v13  ;;  %s5203_s17 = sshll.u32 %s7954_s23, 1 }
  0x1d   : > { %6039 = vmatpush3.bf16.msra.mxu0 %v6577_v9  ;;  %5848 = vmatprep.subr.bf16.mxu1 %v6578_v11  ;;  %v1899_v7 = vsel %vm1863_vm12, 65537, %v6695_v2  ;;  %v5241_v8 = vcombine.low %v6926_v58, %v1897_v1  ;;  %vm1865_vm13 = vmpackc.low %vm6883_vm3, %vm6883_vm3  ;;  %v683_v9 = vand.u32 15, %v6808_v13  ;;  %v7003_v33 = vld [vmem:[%s7884_s5 + $0x20] sm:$0xff]   ;;  %vm7006_vm0 = vcmp.eq.s32.totalorder %v788_v61, 15  ;;  %v6600_v62 = vld [vmem:[%s7884_s5 + $0x168] sm:$0xff]   ;;  %s461_s16 = scalar_lea.vmem %s7886_s7, %s5203_s17 }
  0x1e   : > { %6040 = vmatprep.subr.bf16.mxu0 %v6579_v12  ;;  %vm1867_vm14 = vmpackc.low %vm6913_vm6, %vm6913_vm6  ;;  %vm7018_vm1 = vcmp.eq.s32.totalorder %v802_v63, 15  ;;  %vm1364_vm2 = vsmask.f32 7424  ;;  %vm7026_vm4 = vcmp.eq.s32.totalorder %v816_v5, 15  ;;  %v7031_v49 = vadd.s32 32, %v6808_v13  ;;  %v7060_v5 = vld [vmem:[%s6806_s4 + $0x60] sm:$0xff]  }
  0x1f   : > { %v1995_v17 = vshll.u32 %v5241_v8, 16  ;;  %vm1869_vm15 = vmpackc.low %vm6917_vm7, %vm6917_vm7  ;;  %vm7036_vm5 = vcmp.eq.s32.totalorder %v683_v9, 0  ;;  %vm7043_vm6 = vcmp.eq.s32.totalorder %v697_v10, 0  ;;  %v6604_v60 = vld [vmem:[%s7884_s5 + $0x170] sm:$0xff]   ;;  %622 = vst [vmem:[#allocation2 + $0x70] sm:$0xff] %v7060_v5  ;;  %v6612_v61 = vld [vmem:[%s7884_s5 + $0x188] sm:$0xff]  }
  0x20   : > { %5849 = vmatpush3.bf16.msra.mxu1 %v6578_v11  ;;  %v5242_v11 = vcombine.low %v6926_v58, %v1899_v7  ;;  %v1905_v41 = vsel %vm1869_vm15, 65537, %v6695_v2  ;;  %vm1871_vm3 = vmpackc.low %vm6934_vm9, %vm6934_vm9 }
  0x21   : > { %6041 = vmatpush3.bf16.msra.mxu0 %v6579_v12  ;;  %5850 = vmatprep.subr.bf16.mxu1 %v6580_v14  ;;  %v1985_v12 = vshrl.u32 %v6954_v4, 16  ;;  %v5245_v46 = vcombine.low %v6926_v58, %v1905_v41  ;;  %v1907_v1 = vsel %vm1871_vm3, 65537, %v6695_v2  ;;  %vm1873_vm12 = vmpackc.low %vm7006_vm0, %vm7006_vm0 }
  0x22   : > { %6042 = vmatprep.subr.bf16.mxu0 %v6581_v16  ;;  %v2000_v24 = vshrl.u32 %v5242_v11, 16  ;;  %v2003_v25 = vshll.u32 %v5242_v11, 16  ;;  %vm1877_vm15 = vmpackc.low %vm7026_vm4, %vm7026_vm4 }
  0x23   : > { %v2024_v56 = vshrl.u32 %v5245_v46, 16  ;;  %v2027_v57 = vshll.u32 %v5245_v46, 16  ;;  %v6605_v46 = vld [vmem:[%s7884_s5 + $0x178] sm:$0xff]   ;;  %vm1238_vm3 = vmpackc.low %vm7036_vm5, %vm7036_vm5 }
  0x24   : > { %5851 = vmatpush3.bf16.msra.mxu1 %v6580_v14  ;;  %v1901_v14 = vsel %vm1865_vm13, 65537, %v6695_v2  ;;  %v2002_v38 = vrot.slane %v2000_v24, 7  ;;  %vm1875_vm13 = vmpackc.low %vm7018_vm1, %vm7018_vm1  ;;  %v1274_v47 = vsel %vm1238_vm3, 65537, %v6695_v2 }
  0x25   : > { %6043 = vmatpush3.bf16.msra.mxu0 %v6581_v16  ;;  %5852 = vmatprep.subr.bf16.mxu1 %v6582_v20  ;;  %v1992_v16 = vshrl.u32 %v5241_v8, 16  ;;  %v5243_v19 = vcombine.low %v6926_v58, %v1901_v14  ;;  %v6611_v8 = vld [vmem:[%s7884_s5 + $0x28] sm:$0xff]   ;;  %v7069_v9 = vrot.slane %v2024_v56, 7  ;;  %vm1240_vm0 = vmpackc.low %vm7043_vm6, %vm7043_vm6 }
  0x26   : > { %6044 = vmatprep.subr.bf16.mxu0 %v6583_v21 }
  0x27   : > { %v2008_v34 = vshrl.u32 %v5243_v19, 16  ;;  %v2011_v35 = vshll.u32 %v5243_v19, 16 }
  0x28   : > { %5853 = vmatpush3.bf16.msra.mxu1 %v6582_v20  ;;  %v6977_v20 = vld [vmem:[%s6806_s4 + $0x48] sm:$0xff]  }
  0x29   : > { %6045 = vmatpush3.bf16.msra.mxu0 %v6583_v21  ;;  %5854 = vmatprep.subr.bf16.mxu1 %v6584_v28  ;;  %v1903_v21 = vsel %vm1867_vm14, 65537, %v6695_v2  ;;  %619 = vst [vmem:[#allocation2 + $0x58] sm:$0xff] %v6977_v20  ;;  %v2010_v45 = vrot.slane %v2008_v34, 7  ;;  %v5246_v34 = vcombine.low %v6926_v58, %v1907_v1 }
  0x2a   : > { %6046 = vmatprep.subr.bf16.mxu0 %v6585_v30  ;;  %v5244_v27 = vcombine.low %v6926_v58, %v1903_v21  ;;  %v6615_v21 = vld [vmem:[%s7884_s5 + $0x30] sm:$0xff]  }
  0x2b   : > { %v2013_v55 = vor.u32 %v2011_v35, %v2010_v45 }
  0x2c   : > { %5855 = vmatpush3.bf16.msra.mxu1 %v6584_v28  ;;  %v6992_v28 = vld [vmem:[%s6806_s4 + $0x50] sm:$0xff]   ;;  %v2019_v40 = vshll.u32 %v5244_v27, 16 }
  0x2d   : > { %6047 = vmatpush3.bf16.msra.mxu0 %v6585_v30  ;;  %5888 = vmatprep.subr.bf16.mxu1 %v6587_v31  ;;  %v6998_v30 = vrot.slane %v1985_v12, 7  ;;  %620 = vst [vmem:[#allocation2 + $0x60] sm:$0xff] %v6992_v28  ;;  %v2014_v7 = vsel %vm1546_vm11, %v2002_v38, %v2013_v55 }
  0x2e   : > { %6080 = vmatprep.subr.bf16.mxu0 %v6589_v39  ;;  %vm2130_vm9 = vcmp.ne.s16.totalorder %v2014_v7, 0 }
  0x2f   : > { %5857 = vmatmul.mubr.bf16.vlgmr.msra.gmra.mrb[0].mxu1 %v6814_v15 }
  0x30   : > { %6049 = vmatmul.mubr.bf16.vlgmr.msra.gmra.mrb[0].mxu0 %v6822_v18  ;;  %5889 = vmatpush3.bf16.msra.mxu1 %v6587_v31  ;;  %v1994_v31 = vrot.slane %v1992_v16, 7 }
  0x31   : > { %6081 = vmatpush3.bf16.msra.mxu0 %v6589_v39  ;;  %5860 = vmatprep.mubr.bf16.mxu1 %v6822_v18  ;;  %v2016_v39 = vshrl.u32 %v5244_v27, 16 }
  0x32   : > { %6082 = vmatprep.subr.bf16.mxu0 %v6590_v43  ;;  %6052 = vmatprep.mubr.bf16.mxu0 %v6834_v23 }
  0x33   : > { %5890 = vmatprep.subr.bf16.mxu1 %v6592_v50  ;;  %v2018_v51 = vrot.slane %v2016_v39, 7 }
  0x34   : > { %5891 = vmatpush3.bf16.msra.mxu1 %v6592_v50  ;;  %v2005_v50 = vor.u32 %v2003_v25, %v2002_v38 }
  0x35   : > { %6083 = vmatpush3.bf16.msra.mxu0 %v6590_v43  ;;  %5892 = vmatprep.subr.bf16.mxu1 %v6597_v54  ;;  %v1997_v43 = vor.u32 %v1995_v17, %v1994_v31  ;;  %v2149_v17 = vsel %vm2130_vm9, 0, %v6834_v23 }
  0x36   : > { %6084 = vmatprep.subr.bf16.mxu0 %v6594_v52  ;;  %v2006_v63 = vsel %vm1546_vm11, %v1994_v31, %v2005_v50  ;;  %v2189_v25 = vshll.u32 %v2149_v17, 16  ;;  %v2029_v31 = vor.u32 %v2027_v57, %v7069_v9 }
  0x37   : > { %5861 = vmatmul.mubr.bf16.gmra.mrb[4].mxu1 %v6834_v23  ;;  %vm2129_vm8 = vcmp.ne.s16.totalorder %v2006_v63, 0  ;;  %v6619_v63 = vld [vmem:[%s7884_s5 + $0x38] sm:$0xff]  }
  0x38   : > { %6053 = vmatmul.mubr.bf16.gmra.mrb[4].mxu0 %v6838_v26  ;;  %5864 = vmatprep.mubr.bf16.mxu1 %v6838_v26  ;;  %v2148_v10 = vsel %vm2129_vm8, 0, %v6822_v18  ;;  %v7086_v18 = vld [vmem:[%s6806_s4 + $0x68] sm:$0xff]   ;;  %v2191_v38 = vrot.slane %v2189_v25, 1  ;;  %v2030_v41 = vsel %vm1546_vm11, %v2018_v51, %v2029_v31 }
  0x39   : > { %6085 = vmatpush3.bf16.msra.mxu0 %v6594_v52  ;;  %6056 = vmatprep.mubr.bf16.mxu0 %v6852_v32  ;;  %v7034_v52 = vld [vmem:[%s6806_s4 + $0x58] sm:$0xff]   ;;  %v2181_v14 = vshll.u32 %v2148_v10, 16  ;;  %v2185_v16 = vshrl.u32 %v2148_v10, 16  ;;  %623 = vst [vmem:[#allocation2 + $0x78] sm:$0xff] %v7086_v18  ;;  %vm2132_vm14 = vcmp.ne.s16.totalorder %v2030_v41, 0  ;;  %v1913_v10 = vsel %vm1877_vm15, 65537, %v6695_v2 }
  0x3a   : > { %6086 = vmatprep.subr.bf16.mxu0 %v6947_v0  ;;  %5893 = vmatpush3.bf16.msra.mxu1 %v6597_v54  ;;  %v1998_v54 = vsel %vm1546_vm11, %v6998_v30, %v1997_v43  ;;  %621 = vst [vmem:[#allocation2 + $0x68] sm:$0xff] %v7034_v52  ;;  %v2032_v43 = vshrl.u32 %v5246_v34, 16  ;;  %v2151_v56 = vsel %vm2132_vm14, 0, %v6852_v32  ;;  %v5249_v42 = vcombine.low %v6926_v58, %v1913_v10 }
  0x3b   : > { %5894 = vmatprep.subr.bf16.mxu1 %v6602_v6  ;;  %vm2128_vm7 = vcmp.ne.s16.totalorder %v1998_v54, 0  ;;  %v2183_v27 = vrot.slane %v2181_v14, 1  ;;  %v2205_v1 = vshll.u32 %v2151_v56, 16  ;;  %v2209_v36 = vshrl.u32 %v2151_v56, 16 }
  0x3c   : > { %v2034_v57 = vrot.slane %v2032_v43, 7  ;;  %v2056_v31 = vshrl.u32 %v5249_v42, 16 }
  0x3d   : > { %6087 = vmatpush3.bf16.msra.mxu0 %v6947_v0  ;;  %v2021_v0 = vor.u32 %v2019_v40, %v2018_v51 }
  0x3e   : > { %6088 = vmatprep.subr.bf16.mxu0 %v6988_v22  ;;  %5895 = vmatpush3.bf16.msra.mxu1 %v6602_v6  ;;  %v2147_v6 = vsel %vm2128_vm7, 0, %v6814_v15 }
  0x3f   : > { %5865 = vmatmul.mubr.bf16.gmra.mrb[8].mxu1 %v6852_v32  ;;  %5896 = vmatprep.subr.bf16.mxu1 %v7003_v33  ;;  %v2173_v11 = vshll.u32 %v2147_v6, 16  ;;  %v2177_v12 = vshrl.u32 %v2147_v6, 16  ;;  %v2022_v19 = vsel %vm1546_vm11, %v2010_v45, %v2021_v0  ;;  %v2035_v45 = vshll.u32 %v5246_v34, 16 }
  0x40   : > { %6057 = vmatmul.mubr.bf16.gmra.mrb[8].mxu0 %v6862_v37  ;;  %5868 = vmatprep.mubr.bf16.mxu1 %v6862_v37  ;;  %vm2131_vm10 = vcmp.ne.s16.totalorder %v2022_v19, 0  ;;  %v1276_v19 = vsel %vm1240_vm0, 65537, %v6695_v2 }
  0x41   : > { %6089 = vmatpush3.bf16.msra.mxu0 %v6988_v22  ;;  %6060 = vmatprep.mubr.bf16.mxu0 %v6881_v44  ;;  %v7088_v24 = vrot.slane %v2173_v11, 1  ;;  %v2193_v22 = vshrl.u32 %v2149_v17, 16  ;;  %v2150_v23 = vsel %vm2131_vm10, 0, %v6838_v26  ;;  %v2187_v26 = vor.u32 %v2185_v16, %v2183_v27 }
  0x42   : > { %6090 = vmatprep.subr.bf16.mxu0 %v6600_v62  ;;  %5897 = vmatpush3.bf16.msra.mxu1 %v7003_v33  ;;  %v2197_v39 = vshll.u32 %v2150_v23, 16  ;;  %v2201_v40 = vshrl.u32 %v2150_v23, 16  ;;  %v7100_v33 = vld [vmem:[%s6806_s4 + $0x70] sm:$0xff]   ;;  %v2037_v6 = vor.u32 %v2035_v45, %v2034_v57  ;;  %v2207_v11 = vrot.slane %v2205_v1, 1 }
  0x43   : > { %5898 = vmatprep.subr.bf16.mxu1 %v6611_v8  ;;  %v2179_v35 = vor.u32 %v2177_v12, %v7088_v24  ;;  %v2195_v54 = vor.u32 %v2193_v22, %v2191_v38  ;;  %624 = vst [vmem:[#allocation2 + $0x80] sm:$0xff] %v7100_v33  ;;  %v7118_v51 = vsel %vm1364_vm2, %v2187_v26, %v2191_v38  ;;  %v7187_v26 = vrot.slane %v2056_v31, 7 }
  0x44   : > { %v2199_v55 = vrot.slane %v2197_v39, 1  ;;  %v2038_v14 = vsel %vm1546_vm11, %v7069_v9, %v2037_v6  ;;  %v2211_v9 = vor.u32 %v2209_v36, %v2207_v11  ;;  %v2059_v39 = vshll.u32 %v5249_v42, 16 }
  0x45   : > { %6091 = vmatpush3.bf16.msra.mxu0 %v6600_v62  ;;  %v7110_v50 = vsel %vm1364_vm2, %v2179_v35, %v2183_v27  ;;  %v1909_v62 = vsel %vm1873_vm12, 65537, %v6695_v2  ;;  %vm2133_vm1 = vcmp.ne.s16.totalorder %v2038_v14, 0  ;;  %v7191_v41 = vcombine.low %v1276_v19, %v6926_v58 }
  0x46   : > { %6092 = vmatprep.subr.bf16.mxu0 %v6604_v60  ;;  %5899 = vmatpush3.bf16.msra.mxu1 %v6611_v8  ;;  %v7136_v32 = vsel %vm1364_vm2, %v2195_v54, %v2199_v55  ;;  %v2203_v0 = vor.u32 %v2201_v40, %v2199_v55  ;;  %v5247_v7 = vcombine.low %v6926_v58, %v1909_v62  ;;  %v1911_v8 = vsel %vm1875_vm13, 65537, %v6695_v2 }
  0x47   : > { %5869 = vmatmul.mubr.bf16.gmra.mrb[12].mxu1 %v6881_v44  ;;  %5900 = vmatprep.subr.bf16.mxu1 %v6615_v21  ;;  %v5248_v12 = vcombine.low %v6926_v58, %v1911_v8  ;;  %v2152_v22 = vsel %vm2133_vm1, 0, %v6862_v37  ;;  %v5222_v37 = vcombine.low %v1274_v47, %v6926_v58  ;;  %v711_v54 = vand.u32 15, %v7031_v49 }
  0x48   : > { %6061 = vmatmul.mubr.bf16.gmra.mrb[12].mxu0 %v6889_v48  ;;  %5872 = vmatprep.mubr.bf16.mxu1 %v6889_v48  ;;  %v2040_v16 = vshrl.u32 %v5247_v7, 16  ;;  %v2043_v17 = vshll.u32 %v5247_v7, 16  ;;  %v7180_v53 = vsel %vm1364_vm2, %v2203_v0, %v2207_v11  ;;  %v2213_v34 = vshll.u32 %v2152_v22, 16  ;;  %v7202_v0 = vld [vmem:[%s6806_s4 + $0x78] sm:$0xff]   ;;  %v1111_v11 = vld [vmem:[#allocation2] sm:$0x80] }
  0x49   : > { %6093 = vmatpush3.bf16.msra.mxu0 %v6604_v60  ;;  %6096 = vmatprep.mubr.bf16.mxu0 %v7110_v50  ;;  %v6608_v60 = vld [vmem:[%s7884_s5 + $0x180] sm:$0xff]   ;;  %v2048_v25 = vshrl.u32 %v5248_v12, 16  ;;  %v2051_v23 = vshll.u32 %v5248_v12, 16  ;;  %v2217_v35 = vshrl.u32 %v2152_v22, 16  ;;  %v2061_v56 = vor.u32 %v2059_v39, %v7187_v26  ;;  %625 = vst [vmem:[#allocation2 + $0x88] sm:$0xff] %v7202_v0 }
  0x4a   : > { %6094 = vmatprep.subr.bf16.mxu0 %v6605_v46  ;;  %5901 = vmatpush3.bf16.msra.mxu1 %v6615_v21  ;;  %v7177_v21 = vld [vmem:[%s7884_s5 + $0x80] sm:$0xff]   ;;  %v2042_v27 = vrot.slane %v2040_v16, 7  ;;  %v2215_v43 = vrot.slane %v2213_v34, 1  ;;  %v1366_v62 = vshll.u32 %v5222_v37, 16  ;;  %v1373_v19 = vshll.u32 %v7191_v41, 16 }
  0x4b   : > { %5902 = vmatprep.subr.bf16.mxu1 %v6619_v63  ;;  %v2050_v38 = vrot.slane %v2048_v25, 7  ;;  %vm1134_vm10 = vcmp.eq.s32.totalorder %v711_v54, 0 }
  0x4c   : > { %v2045_v40 = vor.u32 %v2043_v17, %v2042_v27  ;;  %v7205_v1 = vsel %vm1364_vm2, %v2211_v9, %v2215_v43  ;;  %v2219_v36 = vor.u32 %v2217_v35, %v2215_v43  ;;  %v1368_v7 = vrot.slane %v1366_v62, 1  ;;  %v6622_v35 = vld [vmem:[%s7884_s5 + $0x1a0] sm:$0xff]   ;;  %vm1242_vm12 = vmpackc.low %vm1134_vm10, %vm1134_vm10 }
  0x4d   : > { %6095 = vmatpush3.bf16.msra.mxu0 %v6605_v46  ;;  %v2053_v45 = vor.u32 %v2051_v23, %v2050_v38  ;;  %v830_v46 = vand.u32 15, %v6995_v29  ;;  %v6616_v29 = vld [vmem:[%s7884_s5 + $0x190] sm:$0xff]   ;;  %v2062_v6 = vsel %vm1546_vm11, %v2050_v38, %v2061_v56  ;;  %v1375_v23 = vrot.slane %v1373_v19, 1 }
  0x4e   : > { %6128 = vmatprep.subr.bf16.mxu0 %v6608_v60  ;;  %5903 = vmatpush3.bf16.msra.mxu1 %v6619_v63  ;;  %v2046_v55 = vsel %vm1546_vm11, %v2034_v57, %v2045_v40  ;;  %v1369_v63 = vshrl.u32 %v5222_v37, 16  ;;  %vm2136_vm6 = vcmp.ne.s16.totalorder %v2062_v6, 0  ;;  %vm1508_vm7 = vcmp.ne.s16.totalorder %v1368_v7, 0 }
  0x4f   : > { %5873 = vmatmul.mubr.bf16.gmra.mrb[16].mxu1 %v6932_v59  ;;  %5936 = vmatprep.subr.bf16.mxu1 %v7177_v21  ;;  %vm2134_vm4 = vcmp.ne.s16.totalorder %v2046_v55, 0  ;;  %v2054_v49 = vsel %vm1546_vm11, %v2042_v27, %v2053_v45  ;;  %v2155_v42 = vsel %vm2136_vm6, 0, %v6932_v59  ;;  %vm1771_vm8 = vcmp.eq.s32.totalorder %v830_v46, 15 }
  0x50   : > { %6097 = vmatmul.mubr.bf16.vlgmr.msra.gmra.mrb[0].mxu0 %v7118_v51  ;;  %5876 = vmatprep.mubr.bf16.mxu1 %v6977_v20  ;;  %v2153_v57 = vsel %vm2134_vm4, 0, %v6881_v44  ;;  %vm2135_vm5 = vcmp.ne.s16.totalorder %v2054_v49, 0  ;;  %v6620_v44 = vld [vmem:[%s7884_s5 + $0x198] sm:$0xff]   ;;  %v1371_v14 = vor.u32 %v1369_v63, %v1368_v7  ;;  %v2237_v17 = vshll.u32 %v2155_v42, 16  ;;  %vm1879_vm9 = vmpackc.low %vm1771_vm8, %vm1771_vm8 }
  0x51   : > { %6129 = vmatpush3.bf16.msra.mxu0 %v6608_v60  ;;  %6100 = vmatprep.mubr.bf16.mxu0 %v7136_v32  ;;  %v2221_v8 = vshll.u32 %v2153_v57, 16  ;;  %v2154_v10 = vsel %vm2135_vm5, 0, %v6889_v48  ;;  %v2225_v60 = vshrl.u32 %v2153_v57, 16  ;;  %v1377_v48 = vshrl.u32 %v7191_v41, 16 }
  0x52   : > { %6130 = vmatprep.subr.bf16.mxu0 %v6612_v61  ;;  %v2229_v12 = vshll.u32 %v2154_v10, 16  ;;  %v2233_v47 = vshrl.u32 %v2154_v10, 16  ;;  %v2241_v25 = vshrl.u32 %v2155_v42, 16  ;;  %v2239_v27 = vrot.slane %v2237_v17, 1  ;;  %v6626_v17 = vld [vmem:[%s7884_s5 + $0x1b0] sm:$0xff]  }
  0x53   : > { %v2223_v16 = vrot.slane %v2221_v8, 1  ;;  %v1915_v34 = vsel %vm1879_vm9, 65537, %v6695_v2  ;;  %v1376_v39 = vsel %vm1364_vm2, %v1371_v14, %v1375_v23  ;;  %v1379_v40 = vor.u32 %v1377_v48, %v1375_v23  ;;  %v7266_v48 = vld [vmem:[#allocation2] sm:$0xff] }
  0x54   : > { %v2231_v9 = vrot.slane %v2229_v12, 1  ;;  %vm1509_vm13 = vcmp.ne.s16.totalorder %v1376_v39, 0  ;;  %v5250_v43 = vcombine.low %v6926_v58, %v1915_v34  ;;  %v7240_v45 = vor.u32 %v2241_v25, %v2239_v27 }
  0x55   : > { %6131 = vmatpush3.bf16.msra.mxu0 %v6612_v61  ;;  %v7225_v59 = vsel %vm1364_vm2, %v2219_v36, %v2223_v16  ;;  %v2227_v22 = vor.u32 %v2225_v60, %v2223_v16  ;;  %v1527_v61 = vsel %vm1508_vm7, 0, %v1111_v11  ;;  %v1528_v46 = vsel %vm1509_vm13, 0, %v6765_v3  ;;  %v6624_v3 = vld [vmem:[%s7884_s5 + $0x1a8] sm:$0xff]  }
  0x56   : > { %6132 = vmatprep.subr.bf16.mxu0 %v6616_v29  ;;  %v2235_v31 = vor.u32 %v2233_v47, %v2231_v9  ;;  %v1548_v37 = vshrl.u32 %v1527_v61, 16  ;;  %v1278_v55 = vsel %vm1242_vm12, 65537, %v6695_v2  ;;  %v666_v56 = vadd.s32 184, %v6808_v13 }
  0x57   : > { %5877 = vmatmul.mubr.bf16.gmra.mrb[20].mxu1 %v6992_v28  ;;  %v7233_v38 = vsel %vm1364_vm2, %v2227_v22, %v2231_v9  ;;  %v1552_v62 = vshrl.u32 %v1528_v46, 16  ;;  %v1555_v63 = vshll.u32 %v1528_v46, 16  ;;  %v2064_v36 = vshrl.u32 %v5250_v43, 16 }
  0x58   : > { %6101 = vmatmul.mubr.bf16.gmra.mrb[4].mxu0 %v7180_v53  ;;  %5880 = vmatprep.mubr.bf16.mxu1 %v7034_v52  ;;  %v7237_v41 = vsel %vm1364_vm2, %v2235_v31, %v2239_v27  ;;  %v1550_v54 = vrot.slane %v1548_v37, 7  ;;  %v5224_v49 = vcombine.low %v1278_v55, %v6926_v58  ;;  %v844_v57 = vand.u32 15, %v666_v56 }
  0x59   : > { %6104 = vmatprep.mubr.bf16.mxu0 %v7205_v1  ;;  %6133 = vmatpush3.bf16.msra.mxu0 %v6616_v29  ;;  %v2067_v29 = vshll.u32 %v5250_v43, 16  ;;  %v649_v6 = vadd.s32 48, %v6808_v13  ;;  %v668_v7 = vadd.s32 200, %v6808_v13  ;;  %v7252_v2 = vrot.slane %v1552_v62, 7 }
  0x5a   : > { %6134 = vmatprep.subr.bf16.mxu0 %v6620_v44  ;;  %v7254_v8 = vrot.slane %v2064_v36, 7  ;;  %v651_v10 = vadd.s32 64, %v6808_v13  ;;  %v670_v60 = vadd.s32 216, %v6808_v13  ;;  %v1381_v11 = vshll.u32 %v5224_v49, 16 }
  0x5b   : > { %vm1773_vm14 = vcmp.eq.s32.totalorder %v844_v57, 15  ;;  %v725_v12 = vand.u32 15, %v649_v6  ;;  %v1385_v42 = vshrl.u32 %v5224_v49, 16  ;;  %v1557_v47 = vor.u32 %v1555_v63, %v7252_v2 }
  0x5c   : > { %vm1881_vm15 = vmpackc.low %vm1773_vm14, %vm1773_vm14  ;;  %v858_v14 = vand.u32 15, %v668_v7  ;;  %v739_v16 = vand.u32 15, %v651_v10  ;;  %v1383_v19 = vrot.slane %v1381_v11, 1  ;;  %v872_v25 = vand.u32 15, %v670_v60  ;;  %v7313_v10 = vld [vmem:[%s7884_s5 + $0x1c0] sm:$0xff]  }
  0x5d   : > { %6135 = vmatpush3.bf16.msra.mxu0 %v6620_v44  ;;  %v2069_v44 = vor.u32 %v2067_v29, %v7254_v8  ;;  %v1917_v9 = vsel %vm1881_vm15, 65537, %v7266_v48  ;;  %vm1136_vm3 = vcmp.eq.s32.totalorder %v725_v12, 0  ;;  %v1558_v22 = vsel %vm1546_vm11, %v1550_v54, %v1557_v47 }
  0x5e   : > { %6136 = vmatprep.subr.bf16.mxu0 %v6622_v35  ;;  %v5251_v23 = vcombine.low %v6926_v58, %v1917_v9  ;;  %vm1244_vm0 = vmpackc.low %vm1136_vm3, %vm1136_vm3  ;;  %vm7273_vm1 = vcmp.eq.s32.totalorder %v858_v14, 15  ;;  %v1384_v61 = vsel %vm1364_vm2, %v1379_v40, %v1383_v19  ;;  %v6629_v40 = vld [vmem:[%s7884_s5 + $0x1b8] sm:$0xff]   ;;  %vm7297_vm7 = vcmp.eq.s32.totalorder %v739_v16, 0 }
  0x5f   : > { %5881 = vmatmul.mubr.bf16.gmra.mrb[24].mxu1 %v7060_v5  ;;  %v2070_v27 = vsel %vm1546_vm11, %v7187_v26, %v2069_v44  ;;  %v1280_v34 = vsel %vm1244_vm0, 65537, %v7266_v48  ;;  %vm1883_vm5 = vmpackc.low %vm7273_vm1, %vm7273_vm1  ;;  %vm1510_vm6 = vcmp.ne.s16.totalorder %v1384_v61, 0  ;;  %vm7306_vm9 = vcmp.eq.s32.totalorder %v872_v25, 15 }
  0x60   : > { %6105 = vmatmul.mubr.bf16.gmra.mrb[8].mxu0 %v7225_v59  ;;  %5884 = vmatprep.mubr.bf16.mxu1 %v7086_v18  ;;  %vm2137_vm4 = vcmp.ne.s16.totalorder %v2070_v27, 0  ;;  %v2072_v26 = vshrl.u32 %v5251_v23, 16  ;;  %v2075_v37 = vshll.u32 %v5251_v23, 16  ;;  %v1529_v46 = vsel %vm1510_vm6, 0, %v6814_v15  ;;  %vm1246_vm8 = vmpackc.low %vm7297_vm7, %vm7297_vm7  ;;  %v6659_v23 = vld [vmem:[#allocation2 + $0x18] sm:$0xff] }
  0x61   : > { %6108 = vmatprep.mubr.bf16.mxu0 %v7233_v38  ;;  %6137 = vmatpush3.bf16.msra.mxu0 %v6622_v35  ;;  %v1387_v35 = vor.u32 %v1385_v42, %v1383_v19  ;;  %v2156_v39 = vsel %vm2137_vm4, 0, %v6977_v20  ;;  %v5225_v55 = vcombine.low %v1280_v34, %v6926_v58  ;;  %v1560_v56 = vshrl.u32 %v1529_v46, 16  ;;  %vm1885_vm12 = vmpackc.low %vm7306_vm9, %vm7306_vm9 }
  0x62   : > { %6138 = vmatprep.subr.bf16.mxu0 %v6624_v3  ;;  %v2245_v43 = vshll.u32 %v2156_v39, 16  ;;  %v2249_v54 = vshrl.u32 %v2156_v39, 16  ;;  %v1563_v62 = vshll.u32 %v1529_v46, 16  ;;  %v2074_v20 = vrot.slane %v2072_v26, 7  ;;  %v6625_v26 = vld [vmem:[%s7884_s5 + $0x90] sm:$0xff]  }
  0x63   : > { %v1919_v15 = vsel %vm1883_vm5, 65537, %v7266_v48  ;;  %v1389_v36 = vshll.u32 %v5225_v55, 16  ;;  %v7301_v57 = vrot.slane %v1560_v56, 7  ;;  %v1393_v7 = vshrl.u32 %v5225_v55, 16 }
  0x64   : > { %v2247_v63 = vrot.slane %v2245_v43, 1  ;;  %v5252_v29 = vcombine.low %v6926_v58, %v1919_v15  ;;  %v2077_v6 = vor.u32 %v2075_v37, %v2074_v20  ;;  %v1282_v16 = vsel %vm1246_vm8, 65537, %v7266_v48 }
  0x65   : > { %6139 = vmatpush3.bf16.msra.mxu0 %v6624_v3  ;;  %v1391_v12 = vrot.slane %v1389_v36, 1  ;;  %v1565_v47 = vor.u32 %v1563_v62, %v7301_v57  ;;  %v1921_v39 = vsel %vm1885_vm12, 65537, %v7266_v48 }
  0x66   : > { %6140 = vmatprep.subr.bf16.mxu0 %v6626_v17  ;;  %v7317_v60 = vsel %vm1364_vm2, %v7240_v45, %v2247_v63  ;;  %v2251_v11 = vor.u32 %v2249_v54, %v2247_v63  ;;  %v2080_v42 = vshrl.u32 %v5252_v29, 16  ;;  %v2078_v44 = vsel %vm1546_vm11, %v7254_v8, %v2077_v6 }
  0x67   : > { %5885 = vmatmul.mubr.bf16.gmra.mrb[28].mxu1 %v7100_v33  ;;  %v2083_v14 = vshll.u32 %v5252_v29, 16  ;;  %vm2138_vm10 = vcmp.ne.s16.totalorder %v2078_v44, 0  ;;  %v5226_v45 = vcombine.low %v1282_v16, %v6926_v58  ;;  %v7333_v9 = vsel %vm1546_vm11, %v7252_v2, %v1565_v47  ;;  %v6628_v44 = vld [vmem:[%s7884_s5 + $0x98] sm:$0xff]  }
  0x68   : > { %6109 = vmatmul.mubr.bf16.gmra.mrb[12].mxu0 %v7237_v41  ;;  %5904 = vmatprep.mubr.bf16.mxu1 %v1558_v22  ;;  %v7325_v19 = vrot.slane %v2080_v42, 7  ;;  %v2157_v8 = vsel %vm2138_vm10, 0, %v6992_v28  ;;  %v1395_v25 = vor.u32 %v1393_v7, %v1391_v12  ;;  %v6623_v22 = vld [vmem:[%s7884_s5 + $0x88] sm:$0xff]   ;;  %v5253_v46 = vcombine.low %v6926_v58, %v1921_v39 }
  0x69   : > { %6141 = vmatpush3.bf16.msra.mxu0 %v6626_v17  ;;  %6112 = vmatprep.mubr.bf16.mxu0 %v7317_v60  ;;  %v1392_v17 = vsel %vm1364_vm2, %v1387_v35, %v1391_v12  ;;  %v2253_v27 = vshll.u32 %v2157_v8, 16  ;;  %v2257_v34 = vshrl.u32 %v2157_v8, 16  ;;  %v1397_v28 = vshll.u32 %v5226_v45, 16  ;;  %v6660_v12 = vld [vmem:[#allocation2 + $0x20] sm:$0xff] }
  0x6a   : > { %6142 = vmatprep.subr.bf16.mxu0 %v6629_v40  ;;  %vm1511_vm13 = vcmp.ne.s16.totalorder %v1392_v17, 0  ;;  %v2085_v61 = vor.u32 %v2083_v14, %v7325_v19  ;;  %v653_v54 = vadd.s32 80, %v6808_v13  ;;  %v1401_v56 = vshrl.u32 %v5226_v45, 16 }
  0x6b   : > { %v1530_v31 = vsel %vm1511_vm13, 0, %v6659_v23  ;;  %v2255_v37 = vrot.slane %v2253_v27, 1  ;;  %v2088_v36 = vshrl.u32 %v5253_v46, 16  ;;  %v2091_v49 = vshll.u32 %v5253_v46, 16 }
  0x6c   : > { %v1568_v2 = vshrl.u32 %v1530_v31, 16  ;;  %v1571_v35 = vshll.u32 %v1530_v31, 16  ;;  %v2086_v43 = vsel %vm1546_vm11, %v2074_v20, %v2085_v61  ;;  %v753_v3 = vand.u32 15, %v653_v54 }
  0x6d   : > { %6143 = vmatpush3.bf16.msra.mxu0 %v6629_v40  ;;  %vm2139_vm14 = vcmp.ne.s16.totalorder %v2086_v43, 0  ;;  %v1399_v40 = vrot.slane %v1397_v28, 1  ;;  %v7356_v62 = vsel %vm1364_vm2, %v2251_v11, %v2255_v37  ;;  %v2259_v63 = vor.u32 %v2257_v34, %v2255_v37 }
  0x6e   : > { %6176 = vmatprep.subr.bf16.mxu0 %v7313_v10  ;;  %v1570_v55 = vrot.slane %v1568_v2, 7  ;;  %v2158_v15 = vsel %vm2139_vm14, 0, %v7034_v52  ;;  %v7361_v6 = vrot.slane %v2088_v36, 7  ;;  %vm1140_vm3 = vcmp.eq.s32.totalorder %v753_v3, 0 }
  0x6f   : > { %5905 = vmatmul.mubr.bf16.vlgmr.msra.gmra.mrb[0].mxu1 %v7333_v9  ;;  %v2261_v20 = vshll.u32 %v2158_v15, 16  ;;  %v1400_v29 = vsel %vm1364_vm2, %v1395_v25, %v1399_v40  ;;  %v2265_v7 = vshrl.u32 %v2158_v15, 16  ;;  %v1403_v47 = vor.u32 %v1401_v56, %v1399_v40  ;;  %vm1248_vm0 = vmpackc.low %vm1140_vm3, %vm1140_vm3  ;;  %v6636_v56 = vld [vmem:[%s7884_s5 + $0xb8] sm:$0xff]  }
  0x70   : > { %5937 = vmatpush3.bf16.msra.mxu1 %v7177_v21  ;;  %6113 = vmatmul.mubr.bf16.gmra.mrb[16].mxu0 %v7356_v62  ;;  %v1573_v21 = vor.u32 %v1571_v35, %v1570_v55  ;;  %vm1512_vm15 = vcmp.ne.s16.totalorder %v1400_v29, 0  ;;  %v2093_v17 = vor.u32 %v2091_v49, %v7361_v6  ;;  %v672_v8 = vadd.s32 232, %v6808_v13  ;;  %v6630_v35 = vld [vmem:[%s7884_s5 + $0xa0] sm:$0xff]  }
  0x71   : > { %5938 = vmatprep.subr.bf16.mxu1 %v6623_v22  ;;  %v2263_v52 = vrot.slane %v2261_v20, 1  ;;  %v1531_v42 = vsel %vm1512_vm15, 0, %v6660_v12  ;;  %v655_v25 = vadd.s32 96, %v6808_v13  ;;  %v1284_v23 = vsel %vm1248_vm0, 65537, %v7266_v48 }
  0x72   : > { %v7365_v11 = vsel %vm1546_vm11, %v7301_v57, %v1573_v21  ;;  %v1576_v14 = vshrl.u32 %v1531_v42, 16  ;;  %v1579_v16 = vshll.u32 %v1531_v42, 16  ;;  %v2094_v27 = vsel %vm1546_vm11, %v7325_v19, %v2093_v17  ;;  %v7403_v21 = vld [vmem:[#allocation2 + $0x28] sm:$0xff]  ;;  %v6634_v17 = vld [vmem:[%s7884_s5 + $0xb0] sm:$0xff]  }
  0x73   : > { %5908 = vmatprep.mubr.bf16.mxu1 %v7365_v11  ;;  %v7373_v45 = vsel %vm1364_vm2, %v2259_v63, %v2263_v52  ;;  %v2267_v57 = vor.u32 %v2265_v7, %v2263_v52  ;;  %v674_v31 = vadd.s32 248, %v6808_v13  ;;  %vm2140_vm1 = vcmp.ne.s16.totalorder %v2094_v27, 0 }
  0x74   : > { %5939 = vmatpush3.bf16.msra.mxu1 %v6623_v22  ;;  %6116 = vmatprep.mubr.bf16.mxu0 %v7373_v45  ;;  %v7378_v22 = vrot.slane %v1576_v14, 7  ;;  %v5227_v61 = vcombine.low %v1284_v23, %v6926_v58  ;;  %v886_v34 = vand.u32 15, %v672_v8  ;;  %v767_v2 = vand.u32 15, %v655_v25 }
  0x75   : > { %5940 = vmatprep.subr.bf16.mxu1 %v6625_v26  ;;  %v2159_v39 = vsel %vm2140_vm1, 0, %v7060_v5  ;;  %v900_v19 = vand.u32 15, %v674_v31  ;;  %v657_v37 = vadd.s32 112, %v6808_v13  ;;  %v6632_v5 = vld [vmem:[%s7884_s5 + $0xa8] sm:$0xff]   ;;  %v676_v49 = vadd.s32 264, %v6808_v13 }
  0x76   : > { %v1581_v28 = vor.u32 %v1579_v16, %v7378_v22  ;;  %v2269_v43 = vshll.u32 %v2159_v39, 16  ;;  %v1405_v46 = vshll.u32 %v5227_v61, 16  ;;  %vm1779_vm4 = vcmp.eq.s32.totalorder %v886_v34, 15 }
  0x77   : > { %vm1887_vm5 = vmpackc.low %vm1779_vm4, %vm1779_vm4  ;;  %vm1142_vm6 = vcmp.eq.s32.totalorder %v767_v2, 0  ;;  %v1409_v40 = vshrl.u32 %v5227_v61, 16  ;;  %vm7394_vm7 = vcmp.eq.s32.totalorder %v900_v19, 15  ;;  %v7412_v7 = vadd.s32 128, %v6808_v13  ;;  %v7434_v19 = vld [vmem:[#allocation2 + $0x30] sm:$0xff] }
  0x78   : > { %5941 = vmatpush3.bf16.msra.mxu1 %v6625_v26  ;;  %v2273_v26 = vshrl.u32 %v2159_v39, 16  ;;  %v7392_v54 = vsel %vm1546_vm11, %v1570_v55, %v1581_v28  ;;  %v2271_v15 = vrot.slane %v2269_v43, 1  ;;  %v1407_v63 = vrot.slane %v1405_v46, 1  ;;  %vm1250_vm8 = vmpackc.low %vm1142_vm6, %vm1142_vm6 }
  0x79   : > { %5942 = vmatprep.subr.bf16.mxu1 %v6628_v44  ;;  %7927 = vst [vmem:[#allocation5_spill] sm:$0xff] %v7392_v54  ;;  %5909 = vmatmul.mubr.bf16.gmra.mrb[4].mxu1 %v7392_v54  ;;  %v1923_v36 = vsel %vm1887_vm5, 65537, %v7266_v48  ;;  %v781_v55 = vand.u32 15, %v657_v37  ;;  %v1286_v29 = vsel %vm1250_vm8, 65537, %v7266_v48  ;;  %vm1889_vm9 = vmpackc.low %vm7394_vm7, %vm7394_vm7 }
  0x7a   : > { %v5254_v20 = vcombine.low %v6926_v58, %v1923_v36  ;;  %v7415_v3 = vsel %vm1364_vm2, %v2267_v57, %v2271_v15  ;;  %v1408_v52 = vsel %vm1364_vm2, %v1403_v47, %v1407_v63  ;;  %v7418_v12 = vor.u32 %v2273_v26, %v2271_v15 }
  0x7b   : > { %v5228_v42 = vcombine.low %v1286_v29, %v6926_v58  ;;  %6117 = vmatmul.mubr.bf16.gmra.mrb[20].mxu0 %v7415_v3  ;;  %vm1513_vm10 = vcmp.ne.s16.totalorder %v1408_v52, 0  ;;  %v1411_v16 = vor.u32 %v1409_v40, %v1407_v63  ;;  %v1925_v47 = vsel %vm1889_vm9, 65537, %v7266_v48 }
  0x7c   : > { %5943 = vmatpush3.bf16.msra.mxu1 %v6628_v44  ;;  %v2096_v44 = vshrl.u32 %v5254_v20, 16  ;;  %v2099_v14 = vshll.u32 %v5254_v20, 16  ;;  %v1532_v57 = vsel %vm1513_vm10, 0, %v7403_v21  ;;  %vm1144_vm12 = vcmp.eq.s32.totalorder %v781_v55, 0 }
  0x7d   : > { %5944 = vmatprep.subr.bf16.mxu1 %v6630_v35  ;;  %v1413_v8 = vshll.u32 %v5228_v42, 16  ;;  %v1584_v25 = vshrl.u32 %v1532_v57, 16  ;;  %v1587_v27 = vshll.u32 %v1532_v57, 16  ;;  %v5255_v31 = vcombine.low %v6926_v58, %v1925_v47  ;;  %vm1252_vm13 = vmpackc.low %vm1144_vm12, %vm1144_vm12  ;;  %v7454_v57 = vld [vmem:[%s7884_s5 + $0xc0] sm:$0xff]  }
  0x7e   : > { %v2098_v23 = vrot.slane %v2096_v44, 7  ;;  %v1288_v34 = vsel %vm1252_vm13, 65537, %v7266_v48  ;;  %v1417_v2 = vshrl.u32 %v5228_v42, 16  ;;  %v795_v47 = vand.u32 15, %v7412_v7 }
  0x7f   : > { %v1415_v61 = vrot.slane %v1413_v8, 1  ;;  %v1586_v28 = vrot.slane %v1584_v25, 7  ;;  %v2104_v37 = vshrl.u32 %v5255_v31, 16  ;;  %v2107_v43 = vshll.u32 %v5255_v31, 16 }
  0x80   : > { %5945 = vmatpush3.bf16.msra.mxu1 %v6630_v35  ;;  %v914_v35 = vand.u32 15, %v676_v49  ;;  %v2101_v39 = vor.u32 %v2099_v14, %v2098_v23  ;;  %v5229_v26 = vcombine.low %v1288_v34, %v6926_v58  ;;  %vm1146_vm5 = vcmp.eq.s32.totalorder %v795_v47, 0 }
  0x81   : > { %5946 = vmatprep.subr.bf16.mxu1 %v6632_v5  ;;  %v1416_v46 = vsel %vm1364_vm2, %v1411_v16, %v1415_v61  ;;  %v1419_v40 = vor.u32 %v1417_v2, %v1415_v61  ;;  %v1589_v15 = vor.u32 %v1587_v27, %v1586_v28  ;;  %v2106_v36 = vrot.slane %v2104_v37, 7  ;;  %vm1254_vm6 = vmpackc.low %vm1146_vm5, %vm1146_vm5 }
  0x82   : > { %vm1783_vm14 = vcmp.eq.s32.totalorder %v914_v35, 15  ;;  %v2102_v63 = vsel %vm1546_vm11, %v7361_v6, %v2101_v39  ;;  %vm1514_vm15 = vcmp.ne.s16.totalorder %v1416_v46, 0  ;;  %v1421_v55 = vshll.u32 %v5229_v26, 16 }
  0x83   : > { %vm1891_vm3 = vmpackc.low %vm1783_vm14, %vm1783_vm14  ;;  %vm2141_vm0 = vcmp.ne.s16.totalorder %v2102_v63, 0  ;;  %v7447_v29 = vsel %vm1546_vm11, %v7378_v22, %v1589_v15  ;;  %v2109_v44 = vor.u32 %v2107_v43, %v2106_v36  ;;  %v7456_v22 = vld [vmem:[#allocation2 + $0x38] sm:$0xff]  ;;  %v678_v61 = vadd.s32 280, %v6808_v13 }
  0x84   : > { %5947 = vmatpush3.bf16.msra.mxu1 %v6632_v5  ;;  %v1533_v5 = vsel %vm1514_vm15, 0, %v7434_v19  ;;  %v1927_v20 = vsel %vm1891_vm3, 65537, %v7266_v48  ;;  %7930 = vst [vmem:[#allocation6_spill] sm:$0xff] %v7447_v29  ;;  %v2160_v49 = vsel %vm2141_vm0, 0, %v7086_v18  ;;  %5912 = vmatprep.mubr.bf16.mxu1 %v7447_v29  ;;  %v1423_v16 = vrot.slane %v1421_v55, 1 }
  0x85   : > { %5948 = vmatprep.subr.bf16.mxu1 %v6634_v17  ;;  %v1592_v52 = vshrl.u32 %v1533_v5, 16  ;;  %v1595_v42 = vshll.u32 %v1533_v5, 16  ;;  %v2277_v6 = vshll.u32 %v2160_v49, 16  ;;  %v2281_v14 = vshrl.u32 %v2160_v49, 16 }
  0x86   : > { %v5256_v18 = vcombine.low %v6926_v58, %v1927_v20  ;;  %v2110_v27 = vsel %vm1546_vm11, %v2098_v23, %v2109_v44  ;;  %v1424_v31 = vsel %vm1364_vm2, %v1419_v40, %v1423_v16  ;;  %v928_v5 = vand.u32 15, %v678_v61 }
  0x87   : > { %v1594_v8 = vrot.slane %v1592_v52, 7  ;;  %v2279_v25 = vrot.slane %v2277_v6, 1  ;;  %vm2142_vm1 = vcmp.ne.s16.totalorder %v2110_v27, 0  ;;  %vm1515_vm4 = vcmp.ne.s16.totalorder %v1424_v31, 0 }
  0x88   : > { %5949 = vmatpush3.bf16.msra.mxu1 %v6634_v17  ;;  %v1425_v17 = vshrl.u32 %v5229_v26, 16  ;;  %v2112_v2 = vshrl.u32 %v5256_v18, 16  ;;  %v2161_v39 = vsel %vm2142_vm1, 0, %v7100_v33  ;;  %v1534_v37 = vsel %vm1515_vm4, 0, %v7456_v22 }
  0x89   : > { %5950 = vmatprep.subr.bf16.mxu1 %v6636_v56  ;;  %v1597_v34 = vor.u32 %v1595_v42, %v1594_v8  ;;  %v7465_v35 = vsel %vm1364_vm2, %v7418_v12, %v2279_v25  ;;  %v2283_v7 = vor.u32 %v2281_v14, %v2279_v25  ;;  %v2285_v43 = vshll.u32 %v2161_v39, 16 }
  0x8a   : > { %6120 = vmatprep.mubr.bf16.mxu0 %v7465_v35  ;;  %v1600_v46 = vshrl.u32 %v1534_v37, 16  ;;  %v1603_v26 = vshll.u32 %v1534_v37, 16  ;;  %v7475_v40 = vrot.slane %v2112_v2, 7  ;;  %v2115_v12 = vshll.u32 %v5256_v18, 16 }
  0x8b   : > { %v7472_v23 = vsel %vm1546_vm11, %v1586_v28, %v1597_v34  ;;  %v2287_v33 = vrot.slane %v2285_v43, 1  ;;  %v1427_v63 = vor.u32 %v1425_v17, %v1423_v16  ;;  %v1290_v28 = vsel %vm1254_vm6, 65537, %v7266_v48 }
  0x8c   : > { %5951 = vmatpush3.bf16.msra.mxu1 %v6636_v56  ;;  %7931 = vst [vmem:[#allocation7_spill] sm:$0xff] %v7472_v23  ;;  %v2289_v56 = vshrl.u32 %v2161_v39, 16  ;;  %v7477_v15 = vrot.slane %v1600_v46, 7  ;;  %v2117_v55 = vor.u32 %v2115_v12, %v7475_v40  ;;  %v661_v20 = vadd.s32 144, %v6808_v13  ;;  %v7501_v39 = vld [vmem:[#allocation2 + $0x40] sm:$0xff] }
  0x8d   : > { %5984 = vmatprep.subr.bf16.mxu1 %v7454_v57  ;;  %5913 = vmatmul.mubr.bf16.gmra.mrb[8].mxu1 %v7472_v23  ;;  %v663_v49 = vadd.s32 160, %v6808_v13  ;;  %v7484_v52 = vsel %vm1364_vm2, %v2283_v7, %v2287_v33  ;;  %v5230_v44 = vcombine.low %v1290_v28, %v6926_v58  ;;  %vm1785_vm7 = vcmp.eq.s32.totalorder %v928_v5, 15 }
  0x8e   : > { %v1605_v42 = vor.u32 %v1603_v26, %v7477_v15  ;;  %v2291_v6 = vor.u32 %v2289_v56, %v2287_v33  ;;  %6121 = vmatmul.mubr.bf16.gmra.mrb[24].mxu0 %v7484_v52  ;;  %v2118_v14 = vsel %vm1546_vm11, %v2106_v36, %v2117_v55  ;;  %v809_v16 = vand.u32 15, %v661_v20  ;;  %vm1893_vm9 = vmpackc.low %vm1785_vm7, %vm1785_vm7 }
  0x8f   : > { %v823_v18 = vand.u32 15, %v663_v49  ;;  %vm2143_vm8 = vcmp.ne.s16.totalorder %v2118_v14, 0  ;;  %v1429_v17 = vshll.u32 %v5230_v44, 16  ;;  %v1433_v25 = vshrl.u32 %v5230_v44, 16 }
  0x90   : > { %v7491_v47 = vsel %vm1546_vm11, %v1594_v8, %v1605_v42  ;;  %v2162_v27 = vsel %vm2143_vm8, 0, %v7202_v0  ;;  %v1929_v31 = vsel %vm1893_vm9, 65537, %v7266_v48  ;;  %vm1148_vm10 = vcmp.eq.s32.totalorder %v809_v16, 0 }
  0x91   : > { %7932 = vst [vmem:[#allocation8_spill] sm:$0xff] %v7491_v47  ;;  %5916 = vmatprep.mubr.bf16.mxu1 %v7491_v47  ;;  %vm7496_vm12 = vcmp.eq.s32.totalorder %v823_v18, 0  ;;  %v2293_v36 = vshll.u32 %v2162_v27, 16  ;;  %v1431_v34 = vrot.slane %v1429_v17, 1  ;;  %v5257_v8 = vcombine.low %v6926_v58, %v1929_v31  ;;  %vm1256_vm13 = vmpackc.low %vm1148_vm10, %vm1148_vm10 }
  0x92   : > { %v2297_v2 = vshrl.u32 %v2162_v27, 16  ;;  %v1292_v7 = vsel %vm1256_vm13, 65537, %v7266_v48  ;;  %vm1258_vm14 = vmpackc.low %vm7496_vm12, %vm7496_vm12  ;;  %v665_v0 = vadd.s32 176, %v6808_v13  ;;  %v667_v37 = vadd.s32 192, %v6808_v13 }
  0x93   : > { %v7510_v43 = vadd.s32 208, %v6808_v13  ;;  %v2295_v46 = vrot.slane %v2293_v36, 1  ;;  %v1432_v26 = vsel %vm1364_vm2, %v1427_v63, %v1431_v34  ;;  %v2120_v12 = vshrl.u32 %v5257_v8, 16 }
  0x94   : > { %v2123_v56 = vshll.u32 %v5257_v8, 16  ;;  %vm1516_vm15 = vcmp.ne.s16.totalorder %v1432_v26, 0  ;;  %v5231_v33 = vcombine.low %v1292_v7, %v6926_v58  ;;  %v1435_v5 = vor.u32 %v1433_v25, %v1431_v34 }
  0x95   : > { %v1294_v55 = vsel %vm1258_vm14, 65537, %v7266_v48  ;;  %v7516_v28 = vsel %vm1364_vm2, %v2291_v6, %v2295_v46  ;;  %v1535_v20 = vsel %vm1516_vm15, 0, %v7501_v39  ;;  %v7519_v49 = vrot.slane %v2120_v12, 7  ;;  %v7524_v6 = vld [vmem:[#allocation2 + $0x90] sm:$0xff] }
  0x96   : > { %v2299_v42 = vor.u32 %v2297_v2, %v2295_v46  ;;  %6124 = vmatprep.mubr.bf16.mxu0 %v7516_v28  ;;  %v1608_v44 = vshrl.u32 %v1535_v20, 16  ;;  %v1611_v63 = vshll.u32 %v1535_v20, 16  ;;  %v1437_v14 = vshll.u32 %v5231_v33, 16  ;;  %v7528_v2 = vld [vmem:[#allocation2 + $0x48] sm:$0xff] }
  0x97   : > { %7935 = vst [vmem:[#allocation9_spill] sm:$0xff] %v7519_v49  ;;  %v5232_v16 = vcombine.low %v1294_v55, %v6926_v58  ;;  %v2125_v18 = vor.u32 %v2123_v56, %v7519_v49  ;;  %v1441_v17 = vshrl.u32 %v5231_v33, 16  ;;  %v837_v25 = vand.u32 15, %v665_v0  ;;  %v7549_v55 = vld [vmem:[#allocation2 + $0x50] sm:$0xff] }
  0x98   : > { %v851_v27 = vand.u32 15, %v667_v37  ;;  %v1610_v31 = vrot.slane %v1608_v44, 7  ;;  %v1439_v61 = vrot.slane %v1437_v14, 1  ;;  %v865_v46 = vand.u32 15, %v7510_v43 }
  0x99   : > { %v1445_v36 = vshll.u32 %v5232_v16, 16  ;;  %v1449_v34 = vshrl.u32 %v5232_v16, 16  ;;  %v2126_v8 = vsel %vm1546_vm11, %v7475_v40, %v2125_v18  ;;  %vm1152_vm3 = vcmp.eq.s32.totalorder %v837_v25, 0 }
  0x9a   : > { %vm7530_vm0 = vcmp.eq.s32.totalorder %v851_v27, 0  ;;  %v1613_v0 = vor.u32 %v1611_v63, %v1610_v31  ;;  %vm2144_vm1 = vcmp.ne.s16.totalorder %v2126_v8, 0  ;;  %v1440_v37 = vsel %vm1364_vm2, %v1435_v5, %v1439_v61  ;;  %vm1260_vm4 = vmpackc.low %vm1152_vm3, %vm1152_vm3 }
  0x9b   : > { %v1443_v26 = vor.u32 %v1441_v17, %v1439_v61  ;;  %v7537_v12 = vsel %vm2144_vm1, 0, %v7524_v6  ;;  %vm1517_vm5 = vcmp.ne.s16.totalorder %v1440_v37, 0  ;;  %v1447_v40 = vrot.slane %v1445_v36, 1  ;;  %vm1262_vm6 = vmpackc.low %vm7530_vm0, %vm7530_vm0 }
  0x9c   : > { %v1296_v56 = vsel %vm1260_vm4, 65537, %v7266_v48  ;;  %v7545_v43 = vsel %vm1546_vm11, %v7477_v15, %v1613_v0  ;;  %v2301_v33 = vshll.u32 %v7537_v12, 16  ;;  %v1536_v5 = vsel %vm1517_vm5, 0, %v7528_v2 }
  0x9d   : > { %v5233_v20 = vcombine.low %v1296_v56, %v6926_v58  ;;  %5917 = vmatmul.mubr.bf16.gmra.mrb[12].mxu1 %v7545_v43  ;;  %v1616_v44 = vshrl.u32 %v1536_v5, 16  ;;  %v1619_v63 = vshll.u32 %v1536_v5, 16  ;;  %v1448_v14 = vsel %vm1364_vm2, %v1443_v26, %v1447_v40  ;;  %v7564_v26 = vld [vmem:[#allocation2 + $0x58] sm:$0xff] }
  0x9e   : > { %v1451_v16 = vor.u32 %v1449_v34, %v1447_v40  ;;  %v7554_v18 = vrot.slane %v2301_v33, 1  ;;  %vm1518_vm7 = vcmp.ne.s16.totalorder %v1448_v14, 0  ;;  %v1298_v17 = vsel %vm1262_vm6, 65537, %v7266_v48 }
  0x9f   : > { %v1453_v15 = vshll.u32 %v5233_v20, 16  ;;  %v1618_v25 = vrot.slane %v1616_v44, 7  ;;  %v1537_v27 = vsel %vm1518_vm7, 0, %v7549_v55  ;;  %v5234_v61 = vcombine.low %v1298_v17, %v6926_v58  ;;  %v7575_v17 = vld [vmem:[#allocation2 + $0x60] sm:$0xff] }
  0xa0   : > { %v1457_v36 = vshrl.u32 %v5233_v20, 16  ;;  %v7561_v8 = vsel %vm1364_vm2, %v2299_v42, %v7554_v18  ;;  %v1624_v7 = vshrl.u32 %v1537_v27, 16  ;;  %v1627_v0 = vshll.u32 %v1537_v27, 16 }
  0xa1   : > { %7938 = vst [vmem:[#allocation10_spill] sm:$0xff] %v7561_v8  ;;  %v1455_v37 = vrot.slane %v1453_v15, 1  ;;  %6125 = vmatmul.mubr.bf16.gmra.mrb[28].mxu0 %v7561_v8  ;;  %v1621_v34 = vor.u32 %v1619_v63, %v1618_v25  ;;  %v1461_v40 = vshll.u32 %v5234_v61, 16  ;;  %vm1156_vm8 = vcmp.eq.s32.totalorder %v865_v46, 0 }
  0xa2   : > { %v1465_v56 = vshrl.u32 %v5234_v61, 16  ;;  %6144 = vmatprep.mubr.bf16.mxu0 %v7365_v11  ;;  %v1626_v33 = vrot.slane %v1624_v7, 7  ;;  %vm1264_vm9 = vmpackc.low %vm1156_vm8, %vm1156_vm8  ;;  %v671_v42 = vadd.s32 224, %v6808_v13  ;;  %v1988_v8 = vshll.u32 %v6954_v4, 16 }
  0xa3   : > { %v1456_v5 = vsel %vm1364_vm2, %v1451_v16, %v1455_v37  ;;  %v1459_v20 = vor.u32 %v1457_v36, %v1455_v37  ;;  %v7570_v44 = vsel %vm1546_vm11, %v1610_v31, %v1621_v34  ;;  %v1463_v14 = vrot.slane %v1461_v40, 1 }
  0xa4   : > { %vm1519_vm10 = vcmp.ne.s16.totalorder %v1456_v5, 0  ;;  %v1300_v63 = vsel %vm1264_vm9, 65537, %v7266_v48  ;;  %5920 = vmatprep.mubr.bf16.mxu1 %v7570_v44  ;;  %v1629_v46 = vor.u32 %v1627_v0, %v1626_v33  ;;  %v879_v27 = vand.u32 15, %v671_v42  ;;  %v6633_v5 = vld [vmem:[%s7884_s5 + $0x1c8] sm:$0xff]  }
  0xa5   : > { %v1538_v15 = vsel %vm1519_vm10, 0, %v7564_v26  ;;  %v5235_v16 = vcombine.low %v1300_v63, %v6926_v58  ;;  %v1464_v7 = vsel %vm1364_vm2, %v1459_v20, %v1463_v14  ;;  %v1467_v31 = vor.u32 %v1465_v56, %v1463_v14 }
  0xa6   : > { %v1632_v61 = vshrl.u32 %v1538_v15, 16  ;;  %v1635_v36 = vshll.u32 %v1538_v15, 16  ;;  %v7580_v37 = vsel %vm1546_vm11, %v1618_v25, %v1629_v46  ;;  %vm1520_vm12 = vcmp.ne.s16.totalorder %v1464_v7, 0  ;;  %v7590_v15 = vld [vmem:[#allocation2 + $0x68] sm:$0xff] }
  0xa7   : > { %v1469_v34 = vshll.u32 %v5235_v16, 16  ;;  %vm1158_vm13 = vcmp.eq.s32.totalorder %v879_v27, 0  ;;  %5921 = vmatmul.mubr.bf16.gmra.mrb[16].mxu1 %v7580_v37  ;;  %v1539_v40 = vsel %vm1520_vm12, 0, %v7575_v17  ;;  %v1473_v42 = vshrl.u32 %v5235_v16, 16  ;;  %7939 = vst [vmem:[#allocation11_spill] sm:$0xff] %v7590_v15 }
  0xa8   : > { %v1634_v0 = vrot.slane %v1632_v61, 7  ;;  %vm1266_vm14 = vmpackc.low %vm1158_vm13, %vm1158_vm13  ;;  %v673_v20 = vadd.s32 240, %v6808_v13  ;;  %v1640_v56 = vshrl.u32 %v1539_v40, 16  ;;  %v1643_v14 = vshll.u32 %v1539_v40, 16 }
  0xa9   : > { %v1471_v25 = vrot.slane %v1469_v34, 1  ;;  %v1302_v63 = vsel %vm1266_vm14, 65537, %v7266_v48  ;;  %6145 = vmatmul.mubr.bf16.vlgmr.msra.gmra.mrb[0].mxu0 %v7392_v54  ;;  %v675_v7 = vadd.s32 256, %v6808_v13 }
  0xaa   : > { %v1637_v46 = vor.u32 %v1635_v36, %v1634_v0  ;;  %v5236_v27 = vcombine.low %v1302_v63, %v6926_v58  ;;  %v893_v61 = vand.u32 15, %v673_v20  ;;  %6177 = vmatpush3.bf16.msra.mxu0 %v7313_v10  ;;  %6148 = vmatprep.mubr.bf16.mxu0 %v7447_v29  ;;  %v1642_v16 = vrot.slane %v1640_v56, 7  ;;  %v6635_v20 = vld [vmem:[%s7884_s5 + $0x1d0] sm:$0xff]  }
  0xab   : > { %v1472_v40 = vsel %vm1364_vm2, %v1467_v31, %v1471_v25  ;;  %v1475_v34 = vor.u32 %v1473_v42, %v1471_v25  ;;  %6178 = vmatprep.subr.bf16.mxu0 %v6633_v5  ;;  %v907_v42 = vand.u32 15, %v675_v7 }
  0xac   : > { %v7599_v49 = vsel %vm1546_vm11, %v1626_v33, %v1637_v46  ;;  %vm1521_vm15 = vcmp.ne.s16.totalorder %v1472_v40, 0  ;;  %v1477_v36 = vshll.u32 %v5236_v27, 16  ;;  %vm1160_vm3 = vcmp.eq.s32.totalorder %v893_v61, 0  ;;  %v7610_v40 = vld [vmem:[#allocation2 + $0x70] sm:$0xff] }
  0xad   : > { %5924 = vmatprep.mubr.bf16.mxu1 %v7599_v49  ;;  %v1645_v10 = vor.u32 %v1643_v14, %v1642_v16  ;;  %v1540_v56 = vsel %vm1521_vm15, 0, %v7590_v15  ;;  %vm1268_vm0 = vmpackc.low %vm1160_vm3, %vm1160_vm3  ;;  %v1481_v31 = vshrl.u32 %v5236_v27, 16  ;;  %7940 = vst [vmem:[#allocation12_spill] sm:$0xff] %v7610_v40  ;;  %vm1162_vm1 = vcmp.eq.s32.totalorder %v907_v42, 0 }
  0xae   : > { %v1648_v4 = vshrl.u32 %v1540_v56, 16  ;;  %v1651_v25 = vshll.u32 %v1540_v56, 16  ;;  %v1479_v33 = vrot.slane %v1477_v36, 1  ;;  %v1304_v63 = vsel %vm1268_vm0, 65537, %v7266_v48  ;;  %6179 = vmatpush3.bf16.msra.mxu0 %v6633_v5  ;;  %vm1270_vm4 = vmpackc.low %vm1162_vm1, %vm1162_vm1  ;;  %v1731_v5 = vld [vmem:[#allocation2 + $0x8] sm:$0xff] }
  0xaf   : > { %v7608_v46 = vsel %vm1546_vm11, %v1634_v0, %v1645_v10  ;;  %v5237_v61 = vcombine.low %v1304_v63, %v6926_v58  ;;  %v1990_v14 = vor.u32 %v1988_v8, %v6998_v30  ;;  %6180 = vmatprep.subr.bf16.mxu0 %v6635_v20  ;;  %v6637_v0 = vld [vmem:[%s7884_s5 + $0x1d8] sm:$0xff]   ;;  %v677_v10 = vadd.s32 272, %v6808_v13 }
  0xb0   : > { %5925 = vmatmul.mubr.bf16.gmra.mrb[20].mxu1 %v7608_v46  ;;  %v1650_v27 = vrot.slane %v1648_v4, 7  ;;  %v1480_v7 = vsel %vm1364_vm2, %v1475_v34, %v1479_v33  ;;  %v1483_v36 = vor.u32 %v1481_v31, %v1479_v33  ;;  %v1306_v42 = vsel %vm1270_vm4, 65537, %v7266_v48  ;;  %v7628_v48 = vld [vmem:[#allocation2 + $0x78] sm:$0xff] }
  0xb1   : > { %vm1522_vm5 = vcmp.ne.s16.totalorder %v1480_v7, 0  ;;  %v1485_v56 = vshll.u32 %v5237_v61, 16  ;;  %v1489_v30 = vshrl.u32 %v5237_v61, 16  ;;  %6149 = vmatmul.mubr.bf16.gmra.mrb[4].mxu0 %v7472_v23  ;;  %v5238_v31 = vcombine.low %v1306_v42, %v6926_v58  ;;  %v6639_v42 = vld [vmem:[%s7884_s5 + $0x1e0] sm:$0xff]  }
  0xb2   : > { %v1653_v8 = vor.u32 %v1651_v25, %v1650_v27  ;;  %v1541_v34 = vsel %vm1522_vm5, 0, %v7610_v40  ;;  %vm2127_vm6 = vcmp.ne.s16.totalorder %v1990_v14, 0  ;;  %6152 = vmatprep.mubr.bf16.mxu0 %v7491_v47  ;;  %6181 = vmatpush3.bf16.msra.mxu0 %v6635_v20  ;;  %v7636_v47 = vld [vmem:[#allocation2 + $0x80] sm:$0xff] }
  0xb3   : > { %v1656_v4 = vshrl.u32 %v1541_v34, 16  ;;  %v1659_v33 = vshll.u32 %v1541_v34, 16  ;;  %v1487_v63 = vrot.slane %v1485_v56, 1  ;;  %v2146_v13 = vsel %vm2127_vm6, 0, %v1731_v5  ;;  %6182 = vmatprep.subr.bf16.mxu0 %v6637_v0 }
  0xb4   : > { %v7626_v7 = vsel %vm1546_vm11, %v1642_v16, %v1653_v8  ;;  %v1493_v61 = vshll.u32 %v5238_v31, 16  ;;  %v2168_v25 = vshll.u32 %v2146_v13, 16  ;;  %v921_v56 = vand.u32 15, %v677_v10 }
  0xb5   : > { %5928 = vmatprep.mubr.bf16.mxu1 %v7626_v7  ;;  %v1658_v14 = vrot.slane %v1656_v4, 7  ;;  %v1488_v34 = vsel %vm1364_vm2, %v1483_v36, %v1487_v63  ;;  %v1491_v20 = vor.u32 %v1489_v30, %v1487_v63  ;;  %v2166_v23 = vshrl.u32 %v2146_v13, 16  ;;  %v6641_v36 = vld [vmem:[%s7884_s5 + $0x1e8] sm:$0xff]   ;;  %v6661_v30 = vld [vmem:[#allocation2] sm:$0xff] }
  0xb6   : > { %vm1523_vm7 = vcmp.ne.s16.totalorder %v1488_v34, 0  ;;  %v1495_v5 = vrot.slane %v1493_v61, 1  ;;  %6183 = vmatpush3.bf16.msra.mxu0 %v6637_v0  ;;  %vm1164_vm8 = vcmp.eq.s32.totalorder %v921_v56, 0  ;;  %v2170_v54 = vrot.slane %v2168_v25, 1 }
  0xb7   : > { %v1661_v16 = vor.u32 %v1659_v33, %v1658_v14  ;;  %v1542_v8 = vsel %vm1523_vm7, 0, %v7628_v48  ;;  %6184 = vmatprep.subr.bf16.mxu0 %v6639_v42  ;;  %vm1272_vm9 = vmpackc.low %vm1164_vm8, %vm1164_vm8  ;;  %v1497_v25 = vshrl.u32 %v5238_v31, 16 }
  0xb8   : > { %v1664_v40 = vshrl.u32 %v1542_v8, 16  ;;  %v1667_v29 = vshll.u32 %v1542_v8, 16  ;;  %v1496_v15 = vsel %vm1364_vm2, %v1491_v20, %v1495_v5  ;;  %v1308_v4 = vsel %vm1272_vm9, 65537, %v6661_v30 }
  0xb9   : > { %v7643_v10 = vsel %vm1546_vm11, %v1650_v27, %v1661_v16  ;;  %vm1524_vm10 = vcmp.ne.s16.totalorder %v1496_v15, 0  ;;  %6153 = vmatmul.mubr.bf16.gmra.mrb[8].mxu0 %v7545_v43  ;;  %v5239_v63 = vcombine.low %v1308_v4, %v6926_v58  ;;  %v2171_v34 = vor.u32 %v2170_v54, %v2166_v23  ;;  %v6643_v15 = vld [vmem:[%s7884_s5 + $0x1f0] sm:$0xff]   ;;  %v6645_v23 = vld [vmem:[%s7884_s5 + $0x1f8] sm:$0xff]  }
  0xba   : > { %5929 = vmatmul.mubr.bf16.gmra.mrb[24].mxu1 %v7643_v10  ;;  %v1666_v0 = vrot.slane %v1664_v40, 7  ;;  %v1543_v33 = vsel %vm1524_vm10, 0, %v7636_v47  ;;  %6156 = vmatprep.mubr.bf16.mxu0 %v7570_v44  ;;  %v1499_v16 = vor.u32 %v1497_v25, %v1495_v5  ;;  %v7677_v5 = vld [vmem:[#allocation2 + $0x88] sm:$0xff]  ;;  %v6642_v4 = vld [vmem:[%s7884_s5 + $0xd0] sm:$0xff]   ;;  %v6646_v25 = vld [vmem:[%s7884_s5 + $0xe0] sm:$0xff]  }
  0xbb   : > { %v1672_v13 = vshrl.u32 %v1543_v33, 16  ;;  %v1675_v61 = vshll.u32 %v1543_v33, 16  ;;  %6185 = vmatpush3.bf16.msra.mxu0 %v6639_v42  ;;  %v1501_v20 = vshll.u32 %v5239_v63, 16  ;;  %v1505_v42 = vshrl.u32 %v5239_v63, 16 }
  0xbc   : > { %v1669_v27 = vor.u32 %v1667_v29, %v1666_v0  ;;  %6186 = vmatprep.subr.bf16.mxu0 %v6641_v36  ;;  %v2176_v29 = vsel %vm1364_vm2, %v2171_v34, %v7088_v24  ;;  %v7672_v24 = vld [vmem:[%s7884_s5 + $0x200] sm:$0xff]  }
  0xbd   : > { %v1674_v56 = vrot.slane %v1672_v13, 7  ;;  %v1503_v8 = vrot.slane %v1501_v20, 1  ;;  %v6648_v20 = vld [vmem:[%s7884_s5 + $0xe8] sm:$0xff]  }
  0xbe   : > { %v7654_v40 = vsel %vm1546_vm11, %v1658_v14, %v1669_v27  ;;  %v6640_v14 = vld [vmem:[%s7884_s5 + $0xc8] sm:$0xff]  }
  0xbf   : > { %5932 = vmatprep.mubr.bf16.mxu1 %v7654_v40  ;;  %v1677_v58 = vor.u32 %v1675_v61, %v1674_v56  ;;  %6187 = vmatpush3.bf16.msra.mxu0 %v6641_v36  ;;  %v1504_v31 = vsel %vm1364_vm2, %v1499_v16, %v1503_v8  ;;  %v1507_v30 = vor.u32 %v1505_v42, %v1503_v8  ;;  %v2305_v16 = vshrl.u32 %v7537_v12, 16  ;;  %v4203_v12 = vld [vmem:[#allocation2 + $0x20] sm:$0xff] }
  0xc0   : > { %6188 = vmatprep.subr.bf16.mxu0 %v6643_v15  ;;  %vm1525_vm12 = vcmp.ne.s16.totalorder %v1504_v31, 0  ;;  %v6652_v31 = vld [vmem:[%s7884_s5 + $0xf8] sm:$0xff]   ;;  %v6663_v42 = vld [vmem:[%s7884_s5 + $0x100] sm:$0xff]  }
  0xc1   : > { %v7660_v54 = vsel %vm1546_vm11, %v1666_v0, %v1677_v58  ;;  %6157 = vmatmul.mubr.bf16.gmra.mrb[12].mxu0 %v7580_v37  ;;  %v1544_v36 = vsel %vm1525_vm12, 0, %v7677_v5  ;;  %vm1526_vm13 = vcmp.ne.s16.totalorder %v1507_v30, 0  ;;  %v6664_v30 = vld [vmem:[%s7884_s5 + $0x108] sm:$0xff]  }
  0xc2   : > { %5933 = vmatmul.mubr.bf16.gmra.mrb[28].mxu1 %v7660_v54  ;;  %6160 = vmatprep.mubr.bf16.mxu0 %v7599_v49  ;;  %v1680_v0 = vshrl.u32 %v1544_v36, 16  ;;  %v1683_v63 = vshll.u32 %v1544_v36, 16  ;;  %v6653_v36 = vld [vmem:[%s7884_s5 + $0x218] sm:$0xff]  }
  0xc3   : > { %5952 = vmatprep.mubr.bf16.mxu1 %v2176_v29  ;;  %6189 = vmatpush3.bf16.msra.mxu0 %v6643_v15  ;;  %v7716_v29 = vor.u32 %v2305_v16, %v7554_v18  ;;  %v6649_v18 = vld [vmem:[%s7884_s5 + $0x208] sm:$0xff]  }
  0xc4   : > { %6190 = vmatprep.subr.bf16.mxu0 %v6645_v23  ;;  %v1682_v33 = vrot.slane %v1680_v0, 7  ;;  %v7945_v0 = vld [vmem:[#allocation7_spill] sm:$0xff] }
  0xc6   : > { %v1685_v61 = vor.u32 %v1683_v63, %v1682_v33  ;;  %v6667_v63 = vld [vmem:[%s7884_s5 + $0x120] sm:$0xff]  }
  0xc7   : > { %6191 = vmatpush3.bf16.msra.mxu0 %v6645_v23  ;;  %v4202_v23 = vld [vmem:[#allocation2 + $0x18] sm:$0xff] }
  0xc8   : > { %6224 = vmatprep.subr.bf16.mxu0 %v7672_v24  ;;  %v7701_v15 = vsel %vm1546_vm11, %v1674_v56, %v1685_v61  ;;  %v6650_v56 = vld [vmem:[%s7884_s5 + $0xf0] sm:$0xff]  }
  0xc9   : > { %6161 = vmatmul.mubr.bf16.gmra.mrb[16].mxu0 %v7608_v46 }
  0xca   : > { %5953 = vmatmul.mubr.bf16.vlgmr.msra.gmra.mrb[0].mxu1 %v7110_v50  ;;  %6164 = vmatprep.mubr.bf16.mxu0 %v7626_v7  ;;  %v1545_v50 = vsel %vm1526_vm13, 0, %v7524_v6 }
  0xcb   : > { %5985 = vmatpush3.bf16.msra.mxu1 %v7454_v57  ;;  %5956 = vmatprep.mubr.bf16.mxu1 %v7118_v51  ;;  %v6644_v57 = vld [vmem:[%s7884_s5 + $0xd8] sm:$0xff]   ;;  %v1688_v13 = vshrl.u32 %v1545_v50, 16  ;;  %v1691_v34 = vshll.u32 %v1545_v50, 16 }
  0xcc   : > { %5986 = vmatprep.subr.bf16.mxu1 %v6640_v14  ;;  %v7946_v50 = vld [vmem:[#allocation8_spill] sm:$0xff] }
  0xcd   : > { %v1690_v27 = vrot.slane %v1688_v13, 7  ;;  %v6669_v13 = vld [vmem:[%s7884_s5 + $0x130] sm:$0xff]  }
  0xcf   : > { %5987 = vmatpush3.bf16.msra.mxu1 %v6640_v14  ;;  %v1693_v58 = vor.u32 %v1691_v34, %v1690_v27  ;;  %v6651_v14 = vld [vmem:[%s7884_s5 + $0x210] sm:$0xff]  }
  0xd0   : > { %5988 = vmatprep.subr.bf16.mxu1 %v6642_v4 }
  0xd1   : > { %6165 = vmatmul.mubr.bf16.gmra.mrb[20].mxu0 %v7643_v10  ;;  %v1694_v8 = vsel %vm1546_vm11, %v1682_v33, %v1693_v58  ;;  %v6666_v33 = vld [vmem:[%s7884_s5 + $0x118] sm:$0xff]  }
  0xd2   : > { %5957 = vmatmul.mubr.bf16.gmra.mrb[4].mxu1 %v7136_v32  ;;  %6168 = vmatprep.mubr.bf16.mxu0 %v7654_v40 }
  0xd3   : > { %5960 = vmatprep.mubr.bf16.mxu1 %v7180_v53  ;;  %5989 = vmatpush3.bf16.msra.mxu1 %v6642_v4  ;;  %v7943_v4 = vld [vmem:[#allocation6_spill] sm:$0xff] }
  0xd4   : > { %5990 = vmatprep.subr.bf16.mxu1 %v6644_v57 }
  0xd7   : > { %5991 = vmatpush3.bf16.msra.mxu1 %v6644_v57  ;;  %v6668_v57 = vld [vmem:[%s7884_s5 + $0x128] sm:$0xff]  }
  0xd8   : > { %5992 = vmatprep.subr.bf16.mxu1 %v6646_v25 }
  0xd9   : > { %6169 = vmatmul.mubr.bf16.gmra.mrb[24].mxu0 %v7660_v54 }
  0xda   : > { %5961 = vmatmul.mubr.bf16.gmra.mrb[8].mxu1 %v7205_v1  ;;  %6172 = vmatprep.mubr.bf16.mxu0 %v7701_v15 }
  0xdb   : > { %5964 = vmatprep.mubr.bf16.mxu1 %v7225_v59  ;;  %5993 = vmatpush3.bf16.msra.mxu1 %v6646_v25 }
  0xdc   : > { %5994 = vmatprep.subr.bf16.mxu1 %v6648_v20 }
  0xdf   : > { %5995 = vmatpush3.bf16.msra.mxu1 %v6648_v20 }
  0xe0   : > { %5996 = vmatprep.subr.bf16.mxu1 %v6650_v56 }
  0xe1   : > { %6173 = vmatmul.mubr.bf16.gmra.mrb[28].mxu0 %v1694_v8 }
  0xe2   : > { %5965 = vmatmul.mubr.bf16.gmra.mrb[12].mxu1 %v7233_v38  ;;  %6192 = vmatprep.mubr.bf16.mxu0 %v4202_v23 }
  0xe3   : > { %5968 = vmatprep.mubr.bf16.mxu1 %v7237_v41  ;;  %5997 = vmatpush3.bf16.msra.mxu1 %v6650_v56 }
  0xe4   : > { %5998 = vmatprep.subr.bf16.mxu1 %v6652_v31 }
  0xe7   : > { %5999 = vmatpush3.bf16.msra.mxu1 %v6652_v31 }
  0xe8   : > { %6272 = vmatprep.subr.bf16.mxu1 %v6663_v42 }
  0xe9   : > { %6193 = vmatmul.mubr.bf16.vlgmr.msra.gmra.mrb[0].mxu0 %v4203_v12 }
  0xea   : > { %5969 = vmatmul.mubr.bf16.gmra.mrb[16].mxu1 %v7317_v60  ;;  %6225 = vmatpush3.bf16.msra.mxu0 %v7672_v24  ;;  %v6655_v24 = vld [vmem:[%s7884_s5 + $0x228] sm:$0xff]  }
  0xeb   : > { %5972 = vmatprep.mubr.bf16.mxu1 %v7356_v62  ;;  %6196 = vmatprep.mubr.bf16.mxu0 %v7403_v21  ;;  %v6654_v21 = vld [vmem:[%s7884_s5 + $0x220] sm:$0xff]  }
  0xec   : > { %6226 = vmatprep.subr.bf16.mxu0 %v6649_v18 }
  0xee   : > { %6227 = vmatpush3.bf16.msra.mxu0 %v6649_v18 }
  0xef   : > { %6228 = vmatprep.subr.bf16.mxu0 %v6651_v14 }
  0xf1   : > { %6197 = vmatmul.mubr.bf16.gmra.mrb[4].mxu0 %v7434_v19  ;;  %v6656_v19 = vld [vmem:[%s7884_s5 + $0x230] sm:$0xff]  }
  0xf2   : > { %5973 = vmatmul.mubr.bf16.gmra.mrb[20].mxu1 %v7373_v45  ;;  %6200 = vmatprep.mubr.bf16.mxu0 %v7456_v22  ;;  %v6657_v22 = vld [vmem:[%s7884_s5 + $0x238] sm:$0xff]  }
  0xf3   : > { %5976 = vmatprep.mubr.bf16.mxu1 %v7415_v3  ;;  %6229 = vmatpush3.bf16.msra.mxu0 %v6651_v14 }
  0xf4   : > { %6230 = vmatprep.subr.bf16.mxu0 %v6653_v36 }
  0xf7   : > { %6231 = vmatpush3.bf16.msra.mxu0 %v6653_v36 }
  0xf8   : > { %6232 = vmatprep.subr.bf16.mxu0 %v6654_v21 }
  0xf9   : > { %6201 = vmatmul.mubr.bf16.gmra.mrb[8].mxu0 %v7501_v39  ;;  %v7941_v39 = vld [vmem:[#allocation5_spill] sm:$0xff] }
  0xfa   : > { %5977 = vmatmul.mubr.bf16.gmra.mrb[24].mxu1 %v7465_v35  ;;  %6204 = vmatprep.mubr.bf16.mxu0 %v7528_v2  ;;  %v7942_v2 = vld [vmem:[#allocation11_spill] sm:$0xff] }
  0xfb   : > { %5980 = vmatprep.mubr.bf16.mxu1 %v7484_v52  ;;  %6233 = vmatpush3.bf16.msra.mxu0 %v6654_v21 }
  0xfc   : > { %6234 = vmatprep.subr.bf16.mxu0 %v6655_v24 }
  0xff   : > { %6235 = vmatpush3.bf16.msra.mxu0 %v6655_v24 }
 0x100   : > { %6236 = vmatprep.subr.bf16.mxu0 %v6656_v19 }
 0x101   : > { %6205 = vmatmul.mubr.bf16.gmra.mrb[12].mxu0 %v7549_v55 }
 0x102   : > { %5981 = vmatmul.mubr.bf16.gmra.mrb[28].mxu1 %v7516_v28  ;;  %6208 = vmatprep.mubr.bf16.mxu0 %v7564_v26 }
 0x103   : > { %6000 = vmatprep.mubr.bf16.mxu1 %v7333_v9  ;;  %6237 = vmatpush3.bf16.msra.mxu0 %v6656_v19  ;;  %v6665_v9 = vld [vmem:[%s7884_s5 + $0x110] sm:$0xff]  }
 0x104   : > { %6238 = vmatprep.subr.bf16.mxu0 %v6657_v22 }
 0x107   : > { %6239 = vmatpush3.bf16.msra.mxu0 %v6657_v22 }
 0x109   : > { %6209 = vmatmul.mubr.bf16.gmra.mrb[16].mxu0 %v7575_v17 }
 0x10a   : > { %6001 = vmatmul.mubr.bf16.vlgmr.msra.gmra.mrb[0].mxu1 %v7365_v11  ;;  %6212 = vmatprep.mubr.bf16.mxu0 %v7942_v2  ;;  %v7944_v11 = vld [vmem:[#allocation12_spill] sm:$0xff] }
 0x10b   : > { %6280 = vmatpush3.bf16.msra.mxu1 %v6663_v42  ;;  %6004 = vmatprep.mubr.bf16.mxu1 %v7941_v39 }
 0x10c   : > { %6273 = vmatprep.subr.bf16.mxu1 %v6664_v30 }
 0x10f   : > { %6281 = vmatpush3.bf16.msra.mxu1 %v6664_v30 }
 0x110   : > { %6274 = vmatprep.subr.bf16.mxu1 %v6665_v9 }
 0x111   : > { %6213 = vmatmul.mubr.bf16.gmra.mrb[20].mxu0 %v7944_v11 }
 0x112   : > { %6005 = vmatmul.mubr.bf16.gmra.mrb[4].mxu1 %v7943_v4  ;;  %6216 = vmatprep.mubr.bf16.mxu0 %v7628_v48 }
 0x113   : > { %6008 = vmatprep.mubr.bf16.mxu1 %v7945_v0  ;;  %6282 = vmatpush3.bf16.msra.mxu1 %v6665_v9 }
 0x114   : > { %6275 = vmatprep.subr.bf16.mxu1 %v6666_v33 }
 0x117   : > { %6283 = vmatpush3.bf16.msra.mxu1 %v6666_v33 }
 0x118   : > { %6276 = vmatprep.subr.bf16.mxu1 %v6667_v63 }
 0x119   : > { %6217 = vmatmul.mubr.bf16.gmra.mrb[24].mxu0 %v7636_v47 }
 0x11a   : > { %6009 = vmatmul.mubr.bf16.gmra.mrb[8].mxu1 %v7946_v50  ;;  %6220 = vmatprep.mubr.bf16.mxu0 %v7677_v5 }
 0x11b   : > { %6012 = vmatprep.mubr.bf16.mxu1 %v7545_v43  ;;  %6284 = vmatpush3.bf16.msra.mxu1 %v6667_v63  ;;  %v6670_v43 = vld [vmem:[%s7884_s5 + $0x138] sm:$0xff]  }
 0x11c   : > { %6277 = vmatprep.subr.bf16.mxu1 %v6668_v57 }
 0x11f   : > { %6285 = vmatpush3.bf16.msra.mxu1 %v6668_v57 }
 0x120   : > { %6278 = vmatprep.subr.bf16.mxu1 %v6669_v13 }
 0x121   : > { %6221 = vmatmul.mubr.bf16.gmra.mrb[28].mxu0 %v7524_v6 }
 0x122   : > { %6013 = vmatmul.mubr.bf16.gmra.mrb[12].mxu1 %v7570_v44  ;;  %6240 = vmatprep.mubr.bf16.mxu0 %v7118_v51  ;;  %v1749_v51 = vld [vmem:[#allocation2 + $0x98] sm:$0x1] }
 0x123   : > { %6016 = vmatprep.mubr.bf16.mxu1 %v7580_v37  ;;  %6286 = vmatpush3.bf16.msra.mxu1 %v6669_v13 }
 0x124   : > { %6279 = vmatprep.subr.bf16.mxu1 %v6670_v43 }
 0x127   : > { %6287 = vmatpush3.bf16.msra.mxu1 %v6670_v43 }
 0x129   : > { %6241 = vmatmul.mubr.bf16.vlgmr.msra.gmra.mrb[0].mxu0 %v7136_v32  ;;  %v7947_v32 = vld [vmem:[#allocation9_spill] sm:$0xff] }
 0x12a   : > { %6017 = vmatmul.mubr.bf16.gmra.mrb[16].mxu1 %v7599_v49  ;;  %6244 = vmatprep.mubr.bf16.mxu0 %v7180_v53  ;;  %vm2145_vm11 = vcmp.ne.s16.totalorder %v7947_v32, 0 }
 0x12b   : > { %6020 = vmatprep.mubr.bf16.mxu1 %v7608_v46  ;;  %v2164_v53 = vsel %vm2145_vm11, 0, %v1749_v51 }
 0x131   : > { %6245 = vmatmul.mubr.bf16.gmra.mrb[4].mxu0 %v7205_v1  ;;  %v2309_v1 = vshll.u32 %v2164_v53, 16 }
 0x132   : > { %6021 = vmatmul.mubr.bf16.gmra.mrb[20].mxu1 %v7626_v7  ;;  %6248 = vmatprep.mubr.bf16.mxu0 %v7225_v59  ;;  %v7948_v59 = vld [vmem:[#allocation10_spill] sm:$0xff] }
 0x133   : > { %6024 = vmatprep.mubr.bf16.mxu1 %v7643_v10 }
 0x139   : > { %6249 = vmatmul.mubr.bf16.gmra.mrb[8].mxu0 %v7233_v38  ;;  %v2311_v38 = vrot.slane %v2309_v1, 1 }
 0x13a   : > { %6025 = vmatmul.mubr.bf16.gmra.mrb[24].mxu1 %v7654_v40  ;;  %6252 = vmatprep.mubr.bf16.mxu0 %v7237_v41  ;;  %v3395_v41 = vld [vmem:[#allocation2 + $0x88] sm:$0xff] }
 0x13b   : > { %6028 = vmatprep.mubr.bf16.mxu1 %v7660_v54 }
 0x141   : > { %6253 = vmatmul.mubr.bf16.gmra.mrb[12].mxu0 %v7317_v60  ;;  %v2312_v60 = vsel %vm1364_vm2, %v7716_v29, %v2311_v38 }
 0x142   : > { %6029 = vmatmul.mubr.bf16.gmra.mrb[28].mxu1 %v7701_v15  ;;  %6256 = vmatprep.mubr.bf16.mxu0 %v7356_v62 }
 0x143   : > { %6064 = vmatprep.mubr.bf16.mxu1 %v7549_v55 }
 0x149   : > { %6257 = vmatmul.mubr.bf16.gmra.mrb[16].mxu0 %v7373_v45 }
 0x14a   : > { %6065 = vmatmul.mubr.bf16.vlgmr.msra.gmra.mrb[16].mxu1 %v7564_v26  ;;  %6260 = vmatprep.mubr.bf16.mxu0 %v7415_v3 }
 0x14b   : > { %6068 = vmatprep.mubr.bf16.mxu1 %v7575_v17 }
 0x151   : > { %6261 = vmatmul.mubr.bf16.gmra.mrb[20].mxu0 %v7465_v35 }
 0x152   : > { %6069 = vmatmul.mubr.bf16.gmra.mrb[20].mxu1 %v7942_v2  ;;  %6264 = vmatprep.mubr.bf16.mxu0 %v7484_v52 }
 0x153   : > { %6072 = vmatprep.mubr.bf16.mxu1 %v7944_v11 }
 0x159   : > { %6265 = vmatmul.mubr.bf16.gmra.mrb[24].mxu0 %v7516_v28 }
 0x15a   : > { %6073 = vmatmul.mubr.bf16.gmra.mrb[24].mxu1 %v7628_v48  ;;  %6268 = vmatprep.mubr.bf16.mxu0 %v7948_v59 }
 0x15b   : > { %6076 = vmatprep.mubr.bf16.mxu1 %v7636_v47 }
 0x161   : > { %6269 = vmatmul.mubr.bf16.gmra.mrb[28].mxu0 %v2312_v60 }
 0x162   : > { %6077 = vmatmul.mubr.bf16.gmra.mrb[28].mxu1 %v3395_v41 }
 0x1dd   : > { %v6002_v62 = vpop.f32.mrb[0].mxu1 }
 0x1de   : > { %v3221_v45 = vpop.f32.mrb[1].mxu1 }
 0x1df   : > { %v6003_v3 = vpop.f32.mrb[2].mxu1 }
 0x1e0   : > { %v3224_v35 = vpop.f32.mrb[3].mxu1 }
 0x1e5   : > { %v6006_v52 = vpop.f32.mrb[4].mxu1 }
 0x1e6   : > { %v3237_v49 = vpop.f32.mrb[5].mxu1 }
 0x1e7   : > { %v6007_v6 = vpop.f32.mrb[6].mxu1 }
 0x1e8   : > { %v3240_v55 = vpop.f32.mrb[7].mxu1 }
 0x1ed   : > { %v6010_v28 = vpop.f32.mrb[8].mxu1 }
 0x1ee   : > { %v3253_v47 = vpop.f32.mrb[9].mxu1 }
 0x1ef   : > { %v6011_v26 = vpop.f32.mrb[10].mxu1 }
 0x1f0   : > { %v3256_v44 = vpop.f32.mrb[11].mxu1 }
 0x1f5   : > { %v7831_v17 = vpop.f32.mrb[12].mxu1 }
 0x1f6   : > { %v7833_v37 = vpop.f32.mrb[13].mxu1 }
 0x1f7   : > { %v7835_v46 = vpop.f32.mrb[14].mxu1 }
 0x1f8   : > { %v7837_v7 = vpop.f32.mrb[15].mxu1 }
 0x1fc   : > { %v6242_v48 = vpop.f32.mrb[0].mxu0 }
 0x1fd   : > { %v6288_v10 = vadd.f32 %v6242_v48, %v6002_v62  ;;  %v4591_v40 = vpop.f32.mrb[1].mxu0 }
 0x1fe   : > { %v6289_v54 = vadd.f32 %v4591_v40, %v3221_v45  ;;  %v6243_v5 = vpop.f32.mrb[2].mxu0 }
 0x1ff   : > { %v6290_v61 = vadd.f32 %v6243_v5, %v6003_v3  ;;  %v4594_v25 = vpop.f32.mrb[3].mxu0  ;;  %v4950_v16 = vmul.f32 %v6288_v10, %v6288_v10 }
 0x200   : > { %v6291_v27 = vadd.f32 %v4594_v25, %v3224_v35  ;;  %v4948_v15 = vmul.f32 %v6289_v54, %v6289_v54 }
 0x201   : > { %v5537_v34 = vpack.c.bf16 %v6290_v61, %v6288_v10  ;;  %v4951_v18 = vmul.f32 %v6290_v61, %v6290_v61 }
 0x202   : > { %v5532_v20 = vpack.c.bf16 %v6291_v27, %v6289_v54  ;;  %v4910_v58 = vadd.f32 %v6291_v27, %v6289_v54  ;;  %v4949_v56 = vmul.f32 %v6291_v27, %v6291_v27 }
 0x203   : > { %5609 = vst [vmem:[%s7844_s13 + $0x8] sm:$0xff] %v5537_v34  }
 0x204   : > { %5533 = vst [vmem:[%s7844_s13] sm:$0xff] %v5532_v20   ;;  %v4911_v8 = vadd.f32 %v6288_v10, %v4910_v58  ;;  %v4980_v29 = vadd.f32 %v4949_v56, %v4948_v15  ;;  %v6246_v23 = vpop.f32.mrb[4].mxu0 }
 0x205   : > { %v6292_v31 = vadd.f32 %v6246_v23, %v6006_v52  ;;  %v4607_v12 = vpop.f32.mrb[5].mxu0 }
 0x206   : > { %v4981_v42 = vadd.f32 %v4980_v29, %v4950_v16  ;;  %v6293_v14 = vadd.f32 %v4607_v12, %v3237_v49  ;;  %v4912_v36 = vadd.f32 %v6290_v61, %v4911_v8  ;;  %v6247_v21 = vpop.f32.mrb[6].mxu0 }
 0x207   : > { %v6294_v24 = vadd.f32 %v6247_v21, %v6007_v6  ;;  %v4610_v19 = vpop.f32.mrb[7].mxu0  ;;  %v4954_v63 = vmul.f32 %v6292_v31, %v6292_v31 }
 0x208   : > { %v4913_v22 = vadd.f32 %v6293_v14, %v4912_v36  ;;  %v4952_v39 = vmul.f32 %v6293_v14, %v6293_v14  ;;  %v4982_v2 = vadd.f32 %v4981_v42, %v4951_v18  ;;  %v6295_v30 = vadd.f32 %v4610_v19, %v3240_v55 }
 0x209   : > { %v5547_v9 = vpack.c.bf16 %v6294_v24, %v6292_v31  ;;  %v4955_v32 = vmul.f32 %v6294_v24, %v6294_v24 }
 0x20a   : > { %v4983_v4 = vadd.f32 %v4982_v2, %v4952_v39  ;;  %v5542_v11 = vpack.c.bf16 %v6295_v30, %v6293_v14  ;;  %v4914_v0 = vadd.f32 %v6295_v30, %v4913_v22  ;;  %v4953_v33 = vmul.f32 %v6295_v30, %v6295_v30 }
 0x20b   : > { %5611 = vst [vmem:[%s7844_s13 + $0x18] sm:$0xff] %v5547_v9  }
 0x20c   : > { %5610 = vst [vmem:[%s7844_s13 + $0x10] sm:$0xff] %v5542_v11   ;;  %v4915_v50 = vadd.f32 %v6292_v31, %v4914_v0  ;;  %v4984_v57 = vadd.f32 %v4983_v4, %v4953_v33  ;;  %v6250_v13 = vpop.f32.mrb[8].mxu0 }
 0x20d   : > { %v6296_v43 = vadd.f32 %v6250_v13, %v6010_v28  ;;  %v4623_v51 = vpop.f32.mrb[9].mxu0 }
 0x20e   : > { %v4985_v53 = vadd.f32 %v4984_v57, %v4954_v63  ;;  %v6297_v1 = vadd.f32 %v4623_v51, %v3253_v47  ;;  %v4916_v59 = vadd.f32 %v6294_v24, %v4915_v50  ;;  %v6251_v38 = vpop.f32.mrb[10].mxu0 }
 0x20f   : > { %v6298_v41 = vadd.f32 %v6251_v38, %v6011_v26  ;;  %v4626_v60 = vpop.f32.mrb[11].mxu0  ;;  %v4958_v28 = vmul.f32 %v6296_v43, %v6296_v43 }
 0x210   : > { %v4917_v62 = vadd.f32 %v6297_v1, %v4916_v59  ;;  %v4956_v45 = vmul.f32 %v6297_v1, %v6297_v1  ;;  %v4986_v3 = vadd.f32 %v4985_v53, %v4955_v32  ;;  %v6299_v35 = vadd.f32 %v4626_v60, %v3256_v44 }
 0x211   : > { %v5557_v52 = vpack.c.bf16 %v6298_v41, %v6296_v43  ;;  %v4959_v26 = vmul.f32 %v6298_v41, %v6298_v41 }
 0x212   : > { %v4987_v49 = vadd.f32 %v4986_v3, %v4956_v45  ;;  %v5552_v6 = vpack.c.bf16 %v6299_v35, %v6297_v1  ;;  %v4918_v55 = vadd.f32 %v6299_v35, %v4917_v62  ;;  %v4957_v48 = vmul.f32 %v6299_v35, %v6299_v35 }
 0x213   : > { %5613 = vst [vmem:[%s7844_s13 + $0x28] sm:$0xff] %v5557_v52  }
 0x214   : > { %5612 = vst [vmem:[%s7844_s13 + $0x20] sm:$0xff] %v5552_v6   ;;  %v4919_v10 = vadd.f32 %v6296_v43, %v4918_v55  ;;  %v4988_v40 = vadd.f32 %v4987_v49, %v4957_v48  ;;  %v6254_v47 = vpop.f32.mrb[12].mxu0 }
 0x215   : > { %v6300_v54 = vadd.f32 %v6254_v47, %v7831_v17  ;;  %v4639_v5 = vpop.f32.mrb[13].mxu0 }
 0x216   : > { %v4989_v61 = vadd.f32 %v4988_v40, %v4958_v28  ;;  %v6301_v25 = vadd.f32 %v4639_v5, %v7833_v37  ;;  %v4920_v44 = vadd.f32 %v6298_v41, %v4919_v10  ;;  %v6255_v27 = vpop.f32.mrb[14].mxu0 }
 0x217   : > { %v6302_v34 = vadd.f32 %v6255_v27, %v7835_v46  ;;  %v4642_v15 = vpop.f32.mrb[15].mxu0  ;;  %v4962_v12 = vmul.f32 %v6300_v54, %v6300_v54 }
 0x218   : > { %v4921_v20 = vadd.f32 %v6301_v25, %v4920_v44  ;;  %v4960_v58 = vmul.f32 %v6301_v25, %v6301_v25  ;;  %v4990_v56 = vadd.f32 %v4989_v61, %v4959_v26  ;;  %v6303_v16 = vadd.f32 %v4642_v15, %v7837_v7 }
 0x219   : > { %v5567_v8 = vpack.c.bf16 %v6302_v34, %v6300_v54  ;;  %v4963_v24 = vmul.f32 %v6302_v34, %v6302_v34 }
 0x21a   : > { %v4991_v29 = vadd.f32 %v4990_v56, %v4960_v58  ;;  %v5562_v17 = vpack.c.bf16 %v6303_v16, %v6301_v25  ;;  %v4922_v23 = vadd.f32 %v6303_v16, %v4921_v20  ;;  %v4961_v31 = vmul.f32 %v6303_v16, %v6303_v16 }
 0x21b   : > { %5615 = vst [vmem:[%s7844_s13 + $0x38] sm:$0xff] %v5567_v8  }
 0x21c   : > { %5614 = vst [vmem:[%s7844_s13 + $0x30] sm:$0xff] %v5562_v17   ;;  %v4923_v37 = vadd.f32 %v6300_v54, %v4922_v23  ;;  %v4992_v18 = vadd.f32 %v4991_v29, %v4961_v31  ;;  %v6258_v14 = vpop.f32.mrb[16].mxu0 }
 0x21d   : > { %v6066_v42 = vpop.f32.mrb[16].mxu1  ;;  %v4655_v21 = vpop.f32.mrb[17].mxu0 }
 0x21e   : > { %v6304_v36 = vadd.f32 %v6258_v14, %v6066_v42  ;;  %v3559_v46 = vpop.f32.mrb[17].mxu1  ;;  %v4993_v19 = vadd.f32 %v4992_v18, %v4962_v12  ;;  %v4924_v7 = vadd.f32 %v6302_v34, %v4923_v37  ;;  %v6259_v2 = vpop.f32.mrb[18].mxu0 }
 0x21f   : > { %v6305_v22 = vadd.f32 %v4655_v21, %v3559_v46  ;;  %v6067_v39 = vpop.f32.mrb[18].mxu1  ;;  %v4658_v4 = vpop.f32.mrb[19].mxu0 }
 0x220   : > { %v6306_v30 = vadd.f32 %v6259_v2, %v6067_v39  ;;  %v3562_v9 = vpop.f32.mrb[19].mxu1  ;;  %v4994_v33 = vadd.f32 %v4993_v19, %v4963_v24  ;;  %v4966_v32 = vmul.f32 %v6304_v36, %v6304_v36 }
 0x221   : > { %v4925_v11 = vadd.f32 %v6305_v22, %v4924_v7  ;;  %v4964_v0 = vmul.f32 %v6305_v22, %v6305_v22  ;;  %v6307_v63 = vadd.f32 %v4658_v4, %v3562_v9 }
 0x222   : > { %v5577_v50 = vpack.c.bf16 %v6306_v30, %v6304_v36  ;;  %v4967_v45 = vmul.f32 %v6306_v30, %v6306_v30 }
 0x223   : > { %v4995_v57 = vadd.f32 %v4994_v33, %v4964_v0  ;;  %v5572_v13 = vpack.c.bf16 %v6307_v63, %v6305_v22  ;;  %v4926_v43 = vadd.f32 %v6307_v63, %v4925_v11  ;;  %v4965_v51 = vmul.f32 %v6307_v63, %v6307_v63 }
 0x224   : > { %5617 = vst [vmem:[%s7844_s13 + $0x48] sm:$0xff] %v5577_v50   ;;  %v6262_v38 = vpop.f32.mrb[20].mxu0 }
 0x225   : > { %5616 = vst [vmem:[%s7844_s13 + $0x40] sm:$0xff] %v5572_v13   ;;  %v4927_v53 = vadd.f32 %v6304_v36, %v4926_v43  ;;  %v4996_v1 = vadd.f32 %v4995_v57, %v4965_v51  ;;  %v6070_v59 = vpop.f32.mrb[20].mxu1  ;;  %v4671_v62 = vpop.f32.mrb[21].mxu0 }
 0x226   : > { %v6308_v41 = vadd.f32 %v6262_v38, %v6070_v59  ;;  %v3575_v60 = vpop.f32.mrb[21].mxu1  ;;  %v6263_v6 = vpop.f32.mrb[22].mxu0 }
 0x227   : > { %v4997_v3 = vadd.f32 %v4996_v1, %v4966_v32  ;;  %v6309_v35 = vadd.f32 %v4671_v62, %v3575_v60  ;;  %v4928_v52 = vadd.f32 %v6306_v30, %v4927_v53  ;;  %v6071_v49 = vpop.f32.mrb[22].mxu1  ;;  %v4674_v28 = vpop.f32.mrb[23].mxu0 }
 0x228   : > { %v6310_v55 = vadd.f32 %v6263_v6, %v6071_v49  ;;  %v3578_v48 = vpop.f32.mrb[23].mxu1  ;;  %v4970_v27 = vmul.f32 %v6308_v41, %v6308_v41 }
 0x229   : > { %v4929_v10 = vadd.f32 %v6309_v35, %v4928_v52  ;;  %v4968_v40 = vmul.f32 %v6309_v35, %v6309_v35  ;;  %v4998_v47 = vadd.f32 %v4997_v3, %v4967_v45  ;;  %v6311_v54 = vadd.f32 %v4674_v28, %v3578_v48 }
 0x22a   : > { %v5587_v5 = vpack.c.bf16 %v6310_v55, %v6308_v41  ;;  %v4971_v29 = vmul.f32 %v6310_v55, %v6310_v55 }
 0x22b   : > { %v4999_v26 = vadd.f32 %v4998_v47, %v4968_v40  ;;  %v5582_v61 = vpack.c.bf16 %v6311_v54, %v6309_v35  ;;  %v4930_v25 = vadd.f32 %v6311_v54, %v4929_v10  ;;  %v4969_v44 = vmul.f32 %v6311_v54, %v6311_v54 }
 0x22c   : > { %5619 = vst [vmem:[%s7844_s13 + $0x58] sm:$0xff] %v5587_v5   ;;  %v6266_v58 = vpop.f32.mrb[24].mxu0 }
 0x22d   : > { %5618 = vst [vmem:[%s7844_s13 + $0x50] sm:$0xff] %v5582_v61   ;;  %v4931_v34 = vadd.f32 %v6308_v41, %v4930_v25  ;;  %v5000_v15 = vadd.f32 %v4999_v26, %v4969_v44  ;;  %v6074_v20 = vpop.f32.mrb[24].mxu1  ;;  %v4687_v8 = vpop.f32.mrb[25].mxu0 }
 0x22e   : > { %v6312_v56 = vadd.f32 %v6266_v58, %v6074_v20  ;;  %v3591_v16 = vpop.f32.mrb[25].mxu1  ;;  %v6267_v37 = vpop.f32.mrb[26].mxu0 }
 0x22f   : > { %v5001_v17 = vadd.f32 %v5000_v15, %v4970_v27  ;;  %v6313_v23 = vadd.f32 %v4687_v8, %v3591_v16  ;;  %v4932_v31 = vadd.f32 %v6310_v55, %v4931_v34  ;;  %v6075_v12 = vpop.f32.mrb[26].mxu1  ;;  %v4690_v14 = vpop.f32.mrb[27].mxu0 }
 0x230   : > { %v6314_v18 = vadd.f32 %v6267_v37, %v6075_v12  ;;  %v3594_v42 = vpop.f32.mrb[27].mxu1  ;;  %v4974_v30 = vmul.f32 %v6312_v56, %v6312_v56 }
 0x231   : > { %v4933_v36 = vadd.f32 %v6313_v23, %v4932_v31  ;;  %v4972_v46 = vmul.f32 %v6313_v23, %v6313_v23  ;;  %v5002_v21 = vadd.f32 %v5001_v17, %v4971_v29  ;;  %v6315_v24 = vadd.f32 %v4690_v14, %v3594_v42 }
 0x232   : > { %v5597_v19 = vpack.c.bf16 %v6314_v18, %v6312_v56  ;;  %v4975_v57 = vmul.f32 %v6314_v18, %v6314_v18 }
 0x233   : > { %v5003_v22 = vadd.f32 %v5002_v21, %v4972_v46  ;;  %v5592_v7 = vpack.c.bf16 %v6315_v24, %v6313_v23  ;;  %v4934_v39 = vadd.f32 %v6315_v24, %v4933_v36  ;;  %v4973_v2 = vmul.f32 %v6315_v24, %v6315_v24 }
 0x234   : > { %5621 = vst [vmem:[%s7844_s13 + $0x68] sm:$0xff] %v5597_v19   ;;  %v6270_v0 = vpop.f32.mrb[28].mxu0 }
 0x235   : > { %5620 = vst [vmem:[%s7844_s13 + $0x60] sm:$0xff] %v5592_v7   ;;  %v4935_v9 = vadd.f32 %v6312_v56, %v4934_v39  ;;  %v5004_v4 = vadd.f32 %v5003_v22, %v4973_v2  ;;  %v6078_v11 = vpop.f32.mrb[28].mxu1  ;;  %v4703_v50 = vpop.f32.mrb[29].mxu0 }
 0x236   : > { %v6316_v33 = vadd.f32 %v6270_v0, %v6078_v11  ;;  %v3607_v63 = vpop.f32.mrb[29].mxu1  ;;  %v6271_v53 = vpop.f32.mrb[30].mxu0 }
 0x237   : > { %v5005_v13 = vadd.f32 %v5004_v4, %v4974_v30  ;;  %v6317_v43 = vadd.f32 %v4703_v50, %v3607_v63  ;;  %v4936_v51 = vadd.f32 %v6314_v18, %v4935_v9  ;;  %v6079_v32 = vpop.f32.mrb[30].mxu1  ;;  %v4706_v38 = vpop.f32.mrb[31].mxu0 }
 0x238   : > { %v6318_v1 = vadd.f32 %v6271_v53, %v6079_v32  ;;  %v3610_v59 = vpop.f32.mrb[31].mxu1  ;;  %v4978_v55 = vmul.f32 %v6316_v33, %v6316_v33 }
 0x239   : > { %v4937_v41 = vadd.f32 %v6317_v43, %v4936_v51  ;;  %v4976_v60 = vmul.f32 %v6317_v43, %v6317_v43  ;;  %v5006_v62 = vadd.f32 %v5005_v13, %v4975_v57  ;;  %v6319_v45 = vadd.f32 %v4706_v38, %v3610_v59 }
 0x23a   : > { %v5607_v3 = vpack.c.bf16 %v6318_v1, %v6316_v33  ;;  %v4979_v10 = vmul.f32 %v6318_v1, %v6318_v1 }
 0x23b   : > { %v5007_v35 = vadd.f32 %v5006_v62, %v4976_v60  ;;  %v5602_v52 = vpack.c.bf16 %v6319_v45, %v6317_v43  ;;  %v4938_v49 = vadd.f32 %v6319_v45, %v4937_v41  ;;  %v4977_v6 = vmul.f32 %v6319_v45, %v6319_v45 }
 0x23c   : > { %5623 = vst [vmem:[%s7844_s13 + $0x78] sm:$0xff] %v5607_v3  }
 0x23d   : > { %5622 = vst [vmem:[%s7844_s13 + $0x70] sm:$0xff] %v5602_v52   ;;  %v4939_v48 = vadd.f32 %v6316_v33, %v4938_v49  ;;  %v5008_v28 = vadd.f32 %v5007_v35, %v4977_v6 }
 0x23f   : > { %v4940_v40 = vadd.f32 %v6318_v1, %v4939_v48  ;;  %v5009_v47 = vadd.f32 %v5008_v28, %v4978_v55 }
 0x241   : > { %v4941_v54 = vrot.slane %v4940_v40, 4  ;;  %v5010_v5 = vadd.f32 %v5009_v47, %v4979_v10 }
 0x243   : > { %v4942_v26 = vadd.f32 %v4941_v54, %v4940_v40  ;;  %v5011_v61 = vrot.slane %v5010_v5, 4 }
 0x245   : > { %v4943_v25 = vrot.slane %v4942_v26, 2  ;;  %v5012_v44 = vadd.f32 %v5011_v61, %v5010_v5 }
 0x247   : > { %v4944_v27 = vadd.f32 %v4943_v25, %v4942_v26  ;;  %v5013_v34 = vrot.slane %v5012_v44, 2 }
 0x249   : > { %v4945_v15 = vrot.slane %v4944_v27, 1  ;;  %v5014_v20 = vadd.f32 %v5013_v34, %v5012_v44 }
 0x24b   : > { %v4946_v58 = vadd.f32 %v4945_v15, %v4944_v27  ;;  %v5015_v56 = vrot.slane %v5014_v20, 1 }
 0x24d   : > { %4947 = vst [vmem:[%s461_s16] sm:$0x1] %v4946_v58  ;;  %v5016_v16 = vadd.f32 %v5015_v56, %v5014_v20 }
 0x24f   : > { %5017 = vst [vmem:[%s461_s16 + $0x1] sm:$0x1] %v5016_v16 }
 0x250 PF: > { %s18_s2 = sadd.s32 1, %s6693_s2   ;;  %s7949_s23 = smov %s6689_s24 }
 0x251   : > { %p15_p5 = scmp.ge.s32.totalorder %s18_s2, 4   ;;  %s7950_s24 = smov %s7952_s3 }
 0x253   :  { %17 = sbr.rel (!%p15_p5) target bundleno = 2 (0x2), region = 100 }

</bundles_post_ra>
